<compile_context>
chip_gen: v6e
topology: v6e:2x2x1
jax: 0.10.0
libtpu: 0.0.40
codegen_flags: <defaults>
</compile_context>

<pallas_src>
import jax
import jax.numpy as jnp
from jax.experimental import pallas as pl
from jax.experimental.pallas import tpu as pltpu

L_IN = 70            # input length implied by fc1 in_features = 480 = 30 * 16
S0 = 72              # padded per-example row stride (even at every pooling stage)
L1 = L_IN - 2        # 68 valid rows after conv1 (k=3, stride 1, no pad)
P1 = L1 // 2         # 34 after maxpool(2,2)
L2 = P1 - 2          # 32 after conv2 (k=3)
P2 = L2 // 2         # 16 after maxpool(2,2)
C1, C2 = 15, 30
HID = 240
FLAT = C2 * P2       # 480
NC_PAD = 128         # lane-padded output width (sliced back in the wrapper)


def cnn1d_kernel(x_ref, w1_ref, b1_ref, w2_ref, b2_ref,
                 wfc1_ref, bfc1_ref, wfc2_ref, bfc2_ref,
                 out_ref, h1_ref, p1_ref, h2_ref, p2_ref):
    Bt = out_ref.shape[0]
    n_h1 = h1_ref.shape[0]          # 72*Bt - 2   conv1 rows (valid: 72b+l, l<68)
    n_p1 = p1_ref.shape[0]          # 36*Bt - 2   pool1 rows (valid: 36b+j, j<34)
    n_h2 = h2_ref.shape[0]          # 36*Bt - 4   conv2 rows (valid: 36b+l, l<32)
    n_p2 = p2_ref.shape[0]          # 18*Bt - 2   pool2 rows (valid: 18b+j, j<16)

    # ---- conv1 (Cin=1, k=3) + ReLU on the VPU: three offset ref loads, 3 FMAs ----
    h1 = (x_ref[pl.ds(0, n_h1), :] * w1_ref[pl.ds(0, 1), :]
          + x_ref[pl.ds(1, n_h1), :] * w1_ref[pl.ds(1, 1), :]
          + x_ref[pl.ds(2, n_h1), :] * w1_ref[pl.ds(2, 1), :]
          + b1_ref[...])                                            # (72Bt-2, 15)
    h1_ref[...] = jnp.maximum(h1, 0.0)

    # ---- MaxPool1d(2,2): stride-2 sublane reads (stride 72 per example, even) ----
    p1_ref[...] = jnp.maximum(h1_ref[pl.ds(0, n_p1, 2), :],
                              h1_ref[pl.ds(1, n_p1, 2), :])         # (36Bt-2, 15)

    # ---- conv2 (Cin=15, k=3) + ReLU: 3 accumulated MXU matmuls, no lane concat ----
    h2 = b2_ref[...] + jnp.dot(p1_ref[pl.ds(0, n_h2), :], w2_ref[0],
                               preferred_element_type=jnp.float32)
    h2 = h2 + jnp.dot(p1_ref[pl.ds(1, n_h2), :], w2_ref[1],
                      preferred_element_type=jnp.float32)
    h2 = h2 + jnp.dot(p1_ref[pl.ds(2, n_h2), :], w2_ref[2],
                      preferred_element_type=jnp.float32)           # (36Bt-4, 30)
    h2_ref[...] = jnp.maximum(h2, 0.0)

    # ---- MaxPool1d(2,2): stride-2 sublane reads (stride 36 per example, even) ----
    p2_ref[...] = jnp.maximum(h2_ref[pl.ds(0, n_p2, 2), :],
                              h2_ref[pl.ds(1, n_p2, 2), :])         # (18Bt-2, 30)

    # ---- fc1 + ReLU: 16 accumulated (Bt,30)@(30,240) matmuls; flatten never
    #      materialized as a 480-lane slab.  Stride-18 read j gathers position j
    #      of every example in the tile.  Dropout = identity (eval). ----
    h3 = bfc1_ref[...]                                              # (1, 240)
    for j in range(P2):
        h3 = h3 + jnp.dot(p2_ref[pl.ds(j, Bt, 18), :], wfc1_ref[j],
                          preferred_element_type=jnp.float32)       # (Bt, 240)
    h3 = jnp.maximum(h3, 0.0)

    # ---- fc2: one matmul, one full 128-lane output store ----
    out_ref[...] = (jnp.dot(h3, wfc2_ref[...], preferred_element_type=jnp.float32)
                    + bfc2_ref[...])                                # (Bt, 128)


def cnn1d_forward(x_ncw, params, *, block_b=8):
    """x_ncw: (B, 1, 70) float32 (PyTorch NCW). Returns (B, num_classes)."""
    W1, b1, W2, b2, Wf1, bf1, Wf2, bf2 = params  # PyTorch-layout parameters
    B = x_ncw.shape[0]
    nc = Wf2.shape[0]

    # --- glue: batch pad to the tile size, per-example zero pad to 72 rows ---
    Bp = ((B + block_b - 1) // block_b) * block_b
    x = x_ncw[:, 0, :]
    if Bp != B:
        x = jnp.pad(x, ((0, Bp - B), (0, 0)))
    x_pad = jnp.pad(x, ((0, 0), (0, S0 - L_IN)))                     # (Bp, 72)
    x_k = x_pad.reshape(Bp * S0, 1)                                  # stacked rows

    # --- weight repacking (plain JAX, no arithmetic) ---
    w1_k = W1[:, 0, :].T                                             # (3, 15): row k
    b1_k = b1.reshape(1, C1)
    w2_k = jnp.transpose(W2, (2, 1, 0))                              # (3, 15, 30): [k,ci,co]
    b2_k = b2.reshape(1, C2)
    wf1_k = Wf1.reshape(HID, C2, P2).transpose(2, 1, 0)              # (16, 30, 240): [pos,ci,o]
    bf1_k = bf1.reshape(1, HID)
    wf2_k = jnp.zeros((HID, NC_PAD), jnp.float32).at[:, :nc].set(Wf2.T)
    bf2_k = jnp.zeros((1, NC_PAD), jnp.float32).at[:, :nc].set(bf2.reshape(1, nc))

    n_h1 = S0 * block_b - 2
    n_p1 = 36 * block_b - 2
    n_h2 = 36 * block_b - 4
    n_p2 = 18 * block_b - 2

    const2 = lambda i: (0, 0)
    const3 = lambda i: (0, 0, 0)

    out_pad = pl.pallas_call(
        cnn1d_kernel,
        out_shape=jax.ShapeDtypeStruct((Bp, NC_PAD), jnp.float32),
        grid=(Bp // block_b,),
        in_specs=[
            pl.BlockSpec((S0 * block_b, 1), lambda i: (i, 0)),   # x tile
            pl.BlockSpec((3, C1), const2),                       # conv1 weight (resident)
            pl.BlockSpec((1, C1), const2),
            pl.BlockSpec((3, C1, C2), const3),                   # conv2 weight (resident)
            pl.BlockSpec((1, C2), const2),
            pl.BlockSpec((P2, C2, HID), const3),                 # fc1 weight slabs (resident)
            pl.BlockSpec((1, HID), const2),
            pl.BlockSpec((HID, NC_PAD), const2),                 # fc2 weight (resident)
            pl.BlockSpec((1, NC_PAD), const2),
        ],
        out_specs=pl.BlockSpec((block_b, NC_PAD), lambda i: (i, 0)),
        scratch_shapes=[pltpu.VMEM((n_h1, C1), jnp.float32),
                        pltpu.VMEM((n_p1, C1), jnp.float32),
                        pltpu.VMEM((n_h2, C2), jnp.float32),
                        pltpu.VMEM((n_p2, C2), jnp.float32)],
        compiler_params=pltpu.CompilerParams(
            dimension_semantics=("parallel",),
            vmem_limit_bytes=32 * 1024 * 1024),
    )(x_k, w1_k, b1_k, w2_k, b2_k, wf1_k, bf1_k, wf2_k, bf2_k)

    return out_pad[:B, :nc]


def cnn1d_reference(x_ncw, params):
    """Pure-JAX reference with PyTorch semantics (for validation)."""
    W1, b1, W2, b2, Wf1, bf1, Wf2, bf2 = params
    B = x_ncw.shape[0]
    x = x_ncw[:, 0, :]                                                   # (B, 70)
    X1 = jnp.stack([x[:, k:k + L1] for k in range(3)], axis=-1)          # (B, 68, 3)
    h1 = jnp.maximum(jnp.einsum('blk,ok->bol', X1, W1[:, 0, :])
                     + b1[None, :, None], 0.0)                           # (B, 15, 68)
    p1 = jnp.max(h1.reshape(B, C1, P1, 2), axis=-1)                      # (B, 15, 34)
    X2 = jnp.stack([p1[:, :, k:k + L2] for k in range(3)], axis=-1)      # (B, 15, 32, 3)
    h2 = jnp.maximum(jnp.einsum('bilk,oik->bol', X2, W2)
                     + b2[None, :, None], 0.0)                           # (B, 30, 32)
    p2 = jnp.max(h2.reshape(B, C2, P2, 2), axis=-1)                      # (B, 30, 16)
    flat = p2.reshape(B, FLAT)                                           # (channel, pos) order
    f1 = jnp.maximum(flat @ Wf1.T + bf1, 0.0)
    return f1 @ Wf2.T + bf2


if __name__ == "__main__":
    num_classes = 5
    B = 12            # not a multiple of the batch tile -> exercises the pad path
    key = jax.random.PRNGKey(0)
    ks = jax.random.split(key, 9)

    def uinit(k, shape, fan_in):
        bound = 1.0 / jnp.sqrt(jnp.float32(fan_in))
        return jax.random.uniform(k, shape, jnp.float32, -bound, bound)

    # Deterministic synthetic parameters (PyTorch default-init style bounds).
    W1 = uinit(ks[0], (C1, 1, 3), 3)             # Conv1d(1, 15, 3).weight
    b1 = uinit(ks[1], (C1,), 3)
    W2 = uinit(ks[2], (C2, C1, 3), C1 * 3)       # Conv1d(15, 30, 3).weight
    b2 = uinit(ks[3], (C2,), C1 * 3)
    Wf1 = uinit(ks[4], (HID, FLAT), FLAT)        # Linear(480, 240).weight
    bf1 = uinit(ks[5], (HID,), FLAT)
    Wf2 = uinit(ks[6], (num_classes, HID), HID)  # Linear(240, num_classes).weight
    bf2 = uinit(ks[7], (num_classes,), HID)
    params = (W1, b1, W2, b2, Wf1, bf1, Wf2, bf2)

    x = jax.random.normal(ks[8], (B, 1, L_IN), jnp.float32)   # PyTorch NCW input

    out = jax.block_until_ready(cnn1d_forward(x, params, block_b=8))
    ref = jax.block_until_ready(cnn1d_reference(x, params))
    assert out.shape == (B, num_classes)
    assert jnp.allclose(out, ref, atol=1e-4, rtol=1e-4), (out, ref)
    print("KERNEL_OK")
</pallas_src>

<mosaic_0001>
module attributes {stable_mosaic.version = 11 : i64} {
  func.func @cnn1d_kernel(%arg0: i32, %arg1: memref<576x1xf32, #tpu.memory_space<vmem>>, %arg2: memref<3x15xf32, #tpu.memory_space<vmem>>, %arg3: memref<1x15xf32, #tpu.memory_space<vmem>>, %arg4: memref<3x15x30xf32, #tpu.memory_space<vmem>>, %arg5: memref<1x30xf32, #tpu.memory_space<vmem>>, %arg6: memref<16x30x240xf32, #tpu.memory_space<vmem>>, %arg7: memref<1x240xf32, #tpu.memory_space<vmem>>, %arg8: memref<240x128xf32, #tpu.memory_space<vmem>>, %arg9: memref<1x128xf32, #tpu.memory_space<vmem>>, %arg10: memref<8x128xf32, #tpu.memory_space<vmem>>, %arg11: memref<574x15xf32, #tpu.memory_space<vmem>>, %arg12: memref<286x15xf32, #tpu.memory_space<vmem>>, %arg13: memref<284x30xf32, #tpu.memory_space<vmem>>, %arg14: memref<142x30xf32, #tpu.memory_space<vmem>>) attributes {dimension_semantics = [#tpu.dimension_semantics<parallel>], iteration_bounds = array<i64: 2>, scalar_prefetch = 0 : i64, scratch_operands = 4 : i64, tpu.core_type = #tpu.core_type<tc>, window_params = [{transform_indices = @transform_0, window_bounds = array<i64: 576, 1>}, {pipeline_mode = #tpu.pipeline_mode<synchronous>, transform_indices = @transform_1, window_bounds = array<i64: 3, 15>}, {pipeline_mode = #tpu.pipeline_mode<synchronous>, transform_indices = @transform_2, window_bounds = array<i64: 1, 15>}, {pipeline_mode = #tpu.pipeline_mode<synchronous>, transform_indices = @transform_3, window_bounds = array<i64: 3, 15, 30>}, {pipeline_mode = #tpu.pipeline_mode<synchronous>, transform_indices = @transform_4, window_bounds = array<i64: 1, 30>}, {pipeline_mode = #tpu.pipeline_mode<synchronous>, transform_indices = @transform_5, window_bounds = array<i64: 16, 30, 240>}, {pipeline_mode = #tpu.pipeline_mode<synchronous>, transform_indices = @transform_6, window_bounds = array<i64: 1, 240>}, {pipeline_mode = #tpu.pipeline_mode<synchronous>, transform_indices = @transform_7, window_bounds = array<i64: 240, 128>}, {pipeline_mode = #tpu.pipeline_mode<synchronous>, transform_indices = @transform_8, window_bounds = array<i64: 1, 128>}, {transform_indices = @transform_9, window_bounds = array<i64: 8, 128>}]} {
    %c0 = arith.constant 0 : index
    %c0_0 = arith.constant 0 : index
    %0 = vector.load %arg1[%c0, %c0_0] : memref<576x1xf32, #tpu.memory_space<vmem>>, vector<574x1xf32>
    %c0_1 = arith.constant 0 : index
    %c0_2 = arith.constant 0 : index
    %1 = vector.load %arg2[%c0_1, %c0_2] : memref<3x15xf32, #tpu.memory_space<vmem>>, vector<1x15xf32>
    %2 = vector.broadcast %0 : vector<574x1xf32> to vector<574x15xf32>
    %3 = vector.broadcast %1 : vector<1x15xf32> to vector<574x15xf32>
    %4 = arith.mulf %2, %3 : vector<574x15xf32>
    %c1 = arith.constant 1 : index
    %c0_3 = arith.constant 0 : index
    %5 = vector.load %arg1[%c1, %c0_3] : memref<576x1xf32, #tpu.memory_space<vmem>>, vector<574x1xf32>
    %c1_4 = arith.constant 1 : index
    %c0_5 = arith.constant 0 : index
    %6 = vector.load %arg2[%c1_4, %c0_5] : memref<3x15xf32, #tpu.memory_space<vmem>>, vector<1x15xf32>
    %7 = vector.broadcast %5 : vector<574x1xf32> to vector<574x15xf32>
    %8 = vector.broadcast %6 : vector<1x15xf32> to vector<574x15xf32>
    %9 = arith.mulf %7, %8 : vector<574x15xf32>
    %10 = arith.addf %4, %9 : vector<574x15xf32>
    %c2 = arith.constant 2 : index
    %c0_6 = arith.constant 0 : index
    %11 = vector.load %arg1[%c2, %c0_6] : memref<576x1xf32, #tpu.memory_space<vmem>>, vector<574x1xf32>
    %c2_7 = arith.constant 2 : index
    %c0_8 = arith.constant 0 : index
    %12 = vector.load %arg2[%c2_7, %c0_8] : memref<3x15xf32, #tpu.memory_space<vmem>>, vector<1x15xf32>
    %13 = vector.broadcast %11 : vector<574x1xf32> to vector<574x15xf32>
    %14 = vector.broadcast %12 : vector<1x15xf32> to vector<574x15xf32>
    %15 = arith.mulf %13, %14 : vector<574x15xf32>
    %16 = arith.addf %10, %15 : vector<574x15xf32>
    %c0_9 = arith.constant 0 : index
    %c0_10 = arith.constant 0 : index
    %17 = vector.load %arg3[%c0_9, %c0_10] : memref<1x15xf32, #tpu.memory_space<vmem>>, vector<1x15xf32>
    %18 = vector.broadcast %17 : vector<1x15xf32> to vector<574x15xf32>
    %19 = arith.addf %16, %18 : vector<574x15xf32>
    %cst = arith.constant 0.000000e+00 : f32
    %20 = vector.broadcast %cst : f32 to vector<574x15xf32>
    %21 = arith.maximumf %19, %20 : vector<574x15xf32>
    %c0_11 = arith.constant 0 : index
    %c0_12 = arith.constant 0 : index
    %22 = vector.load %arg11[%c0_11, %c0_12] : memref<574x15xf32, #tpu.memory_space<vmem>>, vector<574x15xf32>
    tpu.vector_store %arg11[%c0_11, %c0_12], %21 {strides = array<i32>} : memref<574x15xf32, #tpu.memory_space<vmem>>, vector<574x15xf32>,
    %c0_13 = arith.constant 0 : index
    %c0_14 = arith.constant 0 : index
    %23 = tpu.strided_load %arg11[%c0_13, %c0_14] {strides = array<i32: 2, 1>} : memref<574x15xf32, #tpu.memory_space<vmem>>, vector<286x15xf32>
    %c1_15 = arith.constant 1 : index
    %c0_16 = arith.constant 0 : index
    %24 = tpu.strided_load %arg11[%c1_15, %c0_16] {strides = array<i32: 2, 1>} : memref<574x15xf32, #tpu.memory_space<vmem>>, vector<286x15xf32>
    %25 = arith.maximumf %23, %24 : vector<286x15xf32>
    %c0_17 = arith.constant 0 : index
    %c0_18 = arith.constant 0 : index
    %26 = vector.load %arg12[%c0_17, %c0_18] : memref<286x15xf32, #tpu.memory_space<vmem>>, vector<286x15xf32>
    tpu.vector_store %arg12[%c0_17, %c0_18], %25 {strides = array<i32>} : memref<286x15xf32, #tpu.memory_space<vmem>>, vector<286x15xf32>,
    %c0_19 = arith.constant 0 : index
    %c0_20 = arith.constant 0 : index
    %27 = vector.load %arg5[%c0_19, %c0_20] : memref<1x30xf32, #tpu.memory_space<vmem>>, vector<1x30xf32>
    %c0_21 = arith.constant 0 : index
    %c0_22 = arith.constant 0 : index
    %28 = vector.load %arg12[%c0_21, %c0_22] : memref<286x15xf32, #tpu.memory_space<vmem>>, vector<284x15xf32>
    %c0_23 = arith.constant 0 : index
    %c0_24 = arith.constant 0 : index
    %c0_25 = arith.constant 0 : index
    %29 = vector.load %arg4[%c0_23, %c0_24, %c0_25] : memref<3x15x30xf32, #tpu.memory_space<vmem>>, vector<1x15x30xf32>
    %30 = vector.shape_cast %29 : vector<1x15x30xf32> to vector<15x30xf32>
    %cst_26 = arith.constant dense<0.000000e+00> : vector<284x30xf32>
    %31 = tpu.matmul %28, %30, %cst_26 {dimension_numbers = #tpu.dot_dimension_numbers<[1], [0], [0], [1], [0, 0, 1, 1], [], []>} : vector<284x15xf32>, vector<15x30xf32>, vector<284x30xf32> -> vector<284x30xf32>
    %32 = vector.broadcast %27 : vector<1x30xf32> to vector<284x30xf32>
    %33 = arith.addf %32, %31 : vector<284x30xf32>
    %c1_27 = arith.constant 1 : index
    %c0_28 = arith.constant 0 : index
    %34 = vector.load %arg12[%c1_27, %c0_28] : memref<286x15xf32, #tpu.memory_space<vmem>>, vector<284x15xf32>
    %c1_29 = arith.constant 1 : index
    %c0_30 = arith.constant 0 : index
    %c0_31 = arith.constant 0 : index
    %35 = vector.load %arg4[%c1_29, %c0_30, %c0_31] : memref<3x15x30xf32, #tpu.memory_space<vmem>>, vector<1x15x30xf32>
    %36 = vector.shape_cast %35 : vector<1x15x30xf32> to vector<15x30xf32>
    %cst_32 = arith.constant dense<0.000000e+00> : vector<284x30xf32>
    %37 = tpu.matmul %34, %36, %cst_32 {dimension_numbers = #tpu.dot_dimension_numbers<[1], [0], [0], [1], [0, 0, 1, 1], [], []>} : vector<284x15xf32>, vector<15x30xf32>, vector<284x30xf32> -> vector<284x30xf32>
    %38 = arith.addf %33, %37 : vector<284x30xf32>
    %c2_33 = arith.constant 2 : index
    %c0_34 = arith.constant 0 : index
    %39 = vector.load %arg12[%c2_33, %c0_34] : memref<286x15xf32, #tpu.memory_space<vmem>>, vector<284x15xf32>
    %c2_35 = arith.constant 2 : index
    %c0_36 = arith.constant 0 : index
    %c0_37 = arith.constant 0 : index
    %40 = vector.load %arg4[%c2_35, %c0_36, %c0_37] : memref<3x15x30xf32, #tpu.memory_space<vmem>>, vector<1x15x30xf32>
    %41 = vector.shape_cast %40 : vector<1x15x30xf32> to vector<15x30xf32>
    %cst_38 = arith.constant dense<0.000000e+00> : vector<284x30xf32>
    %42 = tpu.matmul %39, %41, %cst_38 {dimension_numbers = #tpu.dot_dimension_numbers<[1], [0], [0], [1], [0, 0, 1, 1], [], []>} : vector<284x15xf32>, vector<15x30xf32>, vector<284x30xf32> -> vector<284x30xf32>
    %43 = arith.addf %38, %42 : vector<284x30xf32>
    %cst_39 = arith.constant 0.000000e+00 : f32
    %44 = vector.broadcast %cst_39 : f32 to vector<284x30xf32>
    %45 = arith.maximumf %43, %44 : vector<284x30xf32>
    %c0_40 = arith.constant 0 : index
    %c0_41 = arith.constant 0 : index
    %46 = vector.load %arg13[%c0_40, %c0_41] : memref<284x30xf32, #tpu.memory_space<vmem>>, vector<284x30xf32>
    tpu.vector_store %arg13[%c0_40, %c0_41], %45 {strides = array<i32>} : memref<284x30xf32, #tpu.memory_space<vmem>>, vector<284x30xf32>,
    %c0_42 = arith.constant 0 : index
    %c0_43 = arith.constant 0 : index
    %47 = tpu.strided_load %arg13[%c0_42, %c0_43] {strides = array<i32: 2, 1>} : memref<284x30xf32, #tpu.memory_space<vmem>>, vector<142x30xf32>
    %c1_44 = arith.constant 1 : index
    %c0_45 = arith.constant 0 : index
    %48 = tpu.strided_load %arg13[%c1_44, %c0_45] {strides = array<i32: 2, 1>} : memref<284x30xf32, #tpu.memory_space<vmem>>, vector<142x30xf32>
    %49 = arith.maximumf %47, %48 : vector<142x30xf32>
    %c0_46 = arith.constant 0 : index
    %c0_47 = arith.constant 0 : index
    %50 = vector.load %arg14[%c0_46, %c0_47] : memref<142x30xf32, #tpu.memory_space<vmem>>, vector<142x30xf32>
    tpu.vector_store %arg14[%c0_46, %c0_47], %49 {strides = array<i32>} : memref<142x30xf32, #tpu.memory_space<vmem>>, vector<142x30xf32>,
    %c0_48 = arith.constant 0 : index
    %c0_49 = arith.constant 0 : index
    %51 = vector.load %arg7[%c0_48, %c0_49] : memref<1x240xf32, #tpu.memory_space<vmem>>, vector<1x240xf32>
    %c0_50 = arith.constant 0 : index
    %c0_51 = arith.constant 0 : index
    %52 = tpu.strided_load %arg14[%c0_50, %c0_51] {strides = array<i32: 18, 1>} : memref<142x30xf32, #tpu.memory_space<vmem>>, vector<8x30xf32>
    %c0_52 = arith.constant 0 : index
    %c0_53 = arith.constant 0 : index
    %c0_54 = arith.constant 0 : index
    %53 = vector.load %arg6[%c0_52, %c0_53, %c0_54] : memref<16x30x240xf32, #tpu.memory_space<vmem>>, vector<1x30x240xf32>
    %54 = vector.shape_cast %53 : vector<1x30x240xf32> to vector<30x240xf32>
    %cst_55 = arith.constant dense<0.000000e+00> : vector<8x240xf32>
    %55 = tpu.matmul %52, %54, %cst_55 {dimension_numbers = #tpu.dot_dimension_numbers<[1], [0], [0], [1], [0, 0, 1, 1], [], []>} : vector<8x30xf32>, vector<30x240xf32>, vector<8x240xf32> -> vector<8x240xf32>
    %56 = vector.broadcast %51 : vector<1x240xf32> to vector<8x240xf32>
    %57 = arith.addf %56, %55 : vector<8x240xf32>
    %c1_56 = arith.constant 1 : index
    %c0_57 = arith.constant 0 : index
    %58 = tpu.strided_load %arg14[%c1_56, %c0_57] {strides = array<i32: 18, 1>} : memref<142x30xf32, #tpu.memory_space<vmem>>, vector<8x30xf32>
    %c1_58 = arith.constant 1 : index
    %c0_59 = arith.constant 0 : index
    %c0_60 = arith.constant 0 : index
    %59 = vector.load %arg6[%c1_58, %c0_59, %c0_60] : memref<16x30x240xf32, #tpu.memory_space<vmem>>, vector<1x30x240xf32>
    %60 = vector.shape_cast %59 : vector<1x30x240xf32> to vector<30x240xf32>
    %cst_61 = arith.constant dense<0.000000e+00> : vector<8x240xf32>
    %61 = tpu.matmul %58, %60, %cst_61 {dimension_numbers = #tpu.dot_dimension_numbers<[1], [0], [0], [1], [0, 0, 1, 1], [], []>} : vector<8x30xf32>, vector<30x240xf32>, vector<8x240xf32> -> vector<8x240xf32>
    %62 = arith.addf %57, %61 : vector<8x240xf32>
    %c2_62 = arith.constant 2 : index
    %c0_63 = arith.constant 0 : index
    %63 = tpu.strided_load %arg14[%c2_62, %c0_63] {strides = array<i32: 18, 1>} : memref<142x30xf32, #tpu.memory_space<vmem>>, vector<8x30xf32>
    %c2_64 = arith.constant 2 : index
    %c0_65 = arith.constant 0 : index
    %c0_66 = arith.constant 0 : index
    %64 = vector.load %arg6[%c2_64, %c0_65, %c0_66] : memref<16x30x240xf32, #tpu.memory_space<vmem>>, vector<1x30x240xf32>
    %65 = vector.shape_cast %64 : vector<1x30x240xf32> to vector<30x240xf32>
    %cst_67 = arith.constant dense<0.000000e+00> : vector<8x240xf32>
    %66 = tpu.matmul %63, %65, %cst_67 {dimension_numbers = #tpu.dot_dimension_numbers<[1], [0], [0], [1], [0, 0, 1, 1], [], []>} : vector<8x30xf32>, vector<30x240xf32>, vector<8x240xf32> -> vector<8x240xf32>
    %67 = arith.addf %62, %66 : vector<8x240xf32>
    %c3 = arith.constant 3 : index
    %c0_68 = arith.constant 0 : index
    %68 = tpu.strided_load %arg14[%c3, %c0_68] {strides = array<i32: 18, 1>} : memref<142x30xf32, #tpu.memory_space<vmem>>, vector<8x30xf32>
    %c3_69 = arith.constant 3 : index
    %c0_70 = arith.constant 0 : index
    %c0_71 = arith.constant 0 : index
    %69 = vector.load %arg6[%c3_69, %c0_70, %c0_71] : memref<16x30x240xf32, #tpu.memory_space<vmem>>, vector<1x30x240xf32>
    %70 = vector.shape_cast %69 : vector<1x30x240xf32> to vector<30x240xf32>
    %cst_72 = arith.constant dense<0.000000e+00> : vector<8x240xf32>
    %71 = tpu.matmul %68, %70, %cst_72 {dimension_numbers = #tpu.dot_dimension_numbers<[1], [0], [0], [1], [0, 0, 1, 1], [], []>} : vector<8x30xf32>, vector<30x240xf32>, vector<8x240xf32> -> vector<8x240xf32>
    %72 = arith.addf %67, %71 : vector<8x240xf32>
    %c4 = arith.constant 4 : index
    %c0_73 = arith.constant 0 : index
    %73 = tpu.strided_load %arg14[%c4, %c0_73] {strides = array<i32: 18, 1>} : memref<142x30xf32, #tpu.memory_space<vmem>>, vector<8x30xf32>
    %c4_74 = arith.constant 4 : index
    %c0_75 = arith.constant 0 : index
    %c0_76 = arith.constant 0 : index
    %74 = vector.load %arg6[%c4_74, %c0_75, %c0_76] : memref<16x30x240xf32, #tpu.memory_space<vmem>>, vector<1x30x240xf32>
    %75 = vector.shape_cast %74 : vector<1x30x240xf32> to vector<30x240xf32>
    %cst_77 = arith.constant dense<0.000000e+00> : vector<8x240xf32>
    %76 = tpu.matmul %73, %75, %cst_77 {dimension_numbers = #tpu.dot_dimension_numbers<[1], [0], [0], [1], [0, 0, 1, 1], [], []>} : vector<8x30xf32>, vector<30x240xf32>, vector<8x240xf32> -> vector<8x240xf32>
    %77 = arith.addf %72, %76 : vector<8x240xf32>
    %c5 = arith.constant 5 : index
    %c0_78 = arith.constant 0 : index
    %78 = tpu.strided_load %arg14[%c5, %c0_78] {strides = array<i32: 18, 1>} : memref<142x30xf32, #tpu.memory_space<vmem>>, vector<8x30xf32>
    %c5_79 = arith.constant 5 : index
    %c0_80 = arith.constant 0 : index
    %c0_81 = arith.constant 0 : index
    %79 = vector.load %arg6[%c5_79, %c0_80, %c0_81] : memref<16x30x240xf32, #tpu.memory_space<vmem>>, vector<1x30x240xf32>
    %80 = vector.shape_cast %79 : vector<1x30x240xf32> to vector<30x240xf32>
    %cst_82 = arith.constant dense<0.000000e+00> : vector<8x240xf32>
    %81 = tpu.matmul %78, %80, %cst_82 {dimension_numbers = #tpu.dot_dimension_numbers<[1], [0], [0], [1], [0, 0, 1, 1], [], []>} : vector<8x30xf32>, vector<30x240xf32>, vector<8x240xf32> -> vector<8x240xf32>
    %82 = arith.addf %77, %81 : vector<8x240xf32>
    %c6 = arith.constant 6 : index
    %c0_83 = arith.constant 0 : index
    %83 = tpu.strided_load %arg14[%c6, %c0_83] {strides = array<i32: 18, 1>} : memref<142x30xf32, #tpu.memory_space<vmem>>, vector<8x30xf32>
    %c6_84 = arith.constant 6 : index
    %c0_85 = arith.constant 0 : index
    %c0_86 = arith.constant 0 : index
    %84 = vector.load %arg6[%c6_84, %c0_85, %c0_86] : memref<16x30x240xf32, #tpu.memory_space<vmem>>, vector<1x30x240xf32>
    %85 = vector.shape_cast %84 : vector<1x30x240xf32> to vector<30x240xf32>
    %cst_87 = arith.constant dense<0.000000e+00> : vector<8x240xf32>
    %86 = tpu.matmul %83, %85, %cst_87 {dimension_numbers = #tpu.dot_dimension_numbers<[1], [0], [0], [1], [0, 0, 1, 1], [], []>} : vector<8x30xf32>, vector<30x240xf32>, vector<8x240xf32> -> vector<8x240xf32>
    %87 = arith.addf %82, %86 : vector<8x240xf32>
    %c7 = arith.constant 7 : index
    %c0_88 = arith.constant 0 : index
    %88 = tpu.strided_load %arg14[%c7, %c0_88] {strides = array<i32: 18, 1>} : memref<142x30xf32, #tpu.memory_space<vmem>>, vector<8x30xf32>
    %c7_89 = arith.constant 7 : index
    %c0_90 = arith.constant 0 : index
    %c0_91 = arith.constant 0 : index
    %89 = vector.load %arg6[%c7_89, %c0_90, %c0_91] : memref<16x30x240xf32, #tpu.memory_space<vmem>>, vector<1x30x240xf32>
    %90 = vector.shape_cast %89 : vector<1x30x240xf32> to vector<30x240xf32>
    %cst_92 = arith.constant dense<0.000000e+00> : vector<8x240xf32>
    %91 = tpu.matmul %88, %90, %cst_92 {dimension_numbers = #tpu.dot_dimension_numbers<[1], [0], [0], [1], [0, 0, 1, 1], [], []>} : vector<8x30xf32>, vector<30x240xf32>, vector<8x240xf32> -> vector<8x240xf32>
    %92 = arith.addf %87, %91 : vector<8x240xf32>
    %c8 = arith.constant 8 : index
    %c0_93 = arith.constant 0 : index
    %93 = tpu.strided_load %arg14[%c8, %c0_93] {strides = array<i32: 18, 1>} : memref<142x30xf32, #tpu.memory_space<vmem>>, vector<8x30xf32>
    %c8_94 = arith.constant 8 : index
    %c0_95 = arith.constant 0 : index
    %c0_96 = arith.constant 0 : index
    %94 = vector.load %arg6[%c8_94, %c0_95, %c0_96] : memref<16x30x240xf32, #tpu.memory_space<vmem>>, vector<1x30x240xf32>
    %95 = vector.shape_cast %94 : vector<1x30x240xf32> to vector<30x240xf32>
    %cst_97 = arith.constant dense<0.000000e+00> : vector<8x240xf32>
    %96 = tpu.matmul %93, %95, %cst_97 {dimension_numbers = #tpu.dot_dimension_numbers<[1], [0], [0], [1], [0, 0, 1, 1], [], []>} : vector<8x30xf32>, vector<30x240xf32>, vector<8x240xf32> -> vector<8x240xf32>
    %97 = arith.addf %92, %96 : vector<8x240xf32>
    %c9 = arith.constant 9 : index
    %c0_98 = arith.constant 0 : index
    %98 = tpu.strided_load %arg14[%c9, %c0_98] {strides = array<i32: 18, 1>} : memref<142x30xf32, #tpu.memory_space<vmem>>, vector<8x30xf32>
    %c9_99 = arith.constant 9 : index
    %c0_100 = arith.constant 0 : index
    %c0_101 = arith.constant 0 : index
    %99 = vector.load %arg6[%c9_99, %c0_100, %c0_101] : memref<16x30x240xf32, #tpu.memory_space<vmem>>, vector<1x30x240xf32>
    %100 = vector.shape_cast %99 : vector<1x30x240xf32> to vector<30x240xf32>
    %cst_102 = arith.constant dense<0.000000e+00> : vector<8x240xf32>
    %101 = tpu.matmul %98, %100, %cst_102 {dimension_numbers = #tpu.dot_dimension_numbers<[1], [0], [0], [1], [0, 0, 1, 1], [], []>} : vector<8x30xf32>, vector<30x240xf32>, vector<8x240xf32> -> vector<8x240xf32>
    %102 = arith.addf %97, %101 : vector<8x240xf32>
    %c10 = arith.constant 10 : index
    %c0_103 = arith.constant 0 : index
    %103 = tpu.strided_load %arg14[%c10, %c0_103] {strides = array<i32: 18, 1>} : memref<142x30xf32, #tpu.memory_space<vmem>>, vector<8x30xf32>
    %c10_104 = arith.constant 10 : index
    %c0_105 = arith.constant 0 : index
    %c0_106 = arith.constant 0 : index
    %104 = vector.load %arg6[%c10_104, %c0_105, %c0_106] : memref<16x30x240xf32, #tpu.memory_space<vmem>>, vector<1x30x240xf32>
    %105 = vector.shape_cast %104 : vector<1x30x240xf32> to vector<30x240xf32>
    %cst_107 = arith.constant dense<0.000000e+00> : vector<8x240xf32>
    %106 = tpu.matmul %103, %105, %cst_107 {dimension_numbers = #tpu.dot_dimension_numbers<[1], [0], [0], [1], [0, 0, 1, 1], [], []>} : vector<8x30xf32>, vector<30x240xf32>, vector<8x240xf32> -> vector<8x240xf32>
    %107 = arith.addf %102, %106 : vector<8x240xf32>
    %c11 = arith.constant 11 : index
    %c0_108 = arith.constant 0 : index
    %108 = tpu.strided_load %arg14[%c11, %c0_108] {strides = array<i32: 18, 1>} : memref<142x30xf32, #tpu.memory_space<vmem>>, vector<8x30xf32>
    %c11_109 = arith.constant 11 : index
    %c0_110 = arith.constant 0 : index
    %c0_111 = arith.constant 0 : index
    %109 = vector.load %arg6[%c11_109, %c0_110, %c0_111] : memref<16x30x240xf32, #tpu.memory_space<vmem>>, vector<1x30x240xf32>
    %110 = vector.shape_cast %109 : vector<1x30x240xf32> to vector<30x240xf32>
    %cst_112 = arith.constant dense<0.000000e+00> : vector<8x240xf32>
    %111 = tpu.matmul %108, %110, %cst_112 {dimension_numbers = #tpu.dot_dimension_numbers<[1], [0], [0], [1], [0, 0, 1, 1], [], []>} : vector<8x30xf32>, vector<30x240xf32>, vector<8x240xf32> -> vector<8x240xf32>
    %112 = arith.addf %107, %111 : vector<8x240xf32>
    %c12 = arith.constant 12 : index
    %c0_113 = arith.constant 0 : index
    %113 = tpu.strided_load %arg14[%c12, %c0_113] {strides = array<i32: 18, 1>} : memref<142x30xf32, #tpu.memory_space<vmem>>, vector<8x30xf32>
    %c12_114 = arith.constant 12 : index
    %c0_115 = arith.constant 0 : index
    %c0_116 = arith.constant 0 : index
    %114 = vector.load %arg6[%c12_114, %c0_115, %c0_116] : memref<16x30x240xf32, #tpu.memory_space<vmem>>, vector<1x30x240xf32>
    %115 = vector.shape_cast %114 : vector<1x30x240xf32> to vector<30x240xf32>
    %cst_117 = arith.constant dense<0.000000e+00> : vector<8x240xf32>
    %116 = tpu.matmul %113, %115, %cst_117 {dimension_numbers = #tpu.dot_dimension_numbers<[1], [0], [0], [1], [0, 0, 1, 1], [], []>} : vector<8x30xf32>, vector<30x240xf32>, vector<8x240xf32> -> vector<8x240xf32>
    %117 = arith.addf %112, %116 : vector<8x240xf32>
    %c13 = arith.constant 13 : index
    %c0_118 = arith.constant 0 : index
    %118 = tpu.strided_load %arg14[%c13, %c0_118] {strides = array<i32: 18, 1>} : memref<142x30xf32, #tpu.memory_space<vmem>>, vector<8x30xf32>
    %c13_119 = arith.constant 13 : index
    %c0_120 = arith.constant 0 : index
    %c0_121 = arith.constant 0 : index
    %119 = vector.load %arg6[%c13_119, %c0_120, %c0_121] : memref<16x30x240xf32, #tpu.memory_space<vmem>>, vector<1x30x240xf32>
    %120 = vector.shape_cast %119 : vector<1x30x240xf32> to vector<30x240xf32>
    %cst_122 = arith.constant dense<0.000000e+00> : vector<8x240xf32>
    %121 = tpu.matmul %118, %120, %cst_122 {dimension_numbers = #tpu.dot_dimension_numbers<[1], [0], [0], [1], [0, 0, 1, 1], [], []>} : vector<8x30xf32>, vector<30x240xf32>, vector<8x240xf32> -> vector<8x240xf32>
    %122 = arith.addf %117, %121 : vector<8x240xf32>
    %c14 = arith.constant 14 : index
    %c0_123 = arith.constant 0 : index
    %123 = tpu.strided_load %arg14[%c14, %c0_123] {strides = array<i32: 18, 1>} : memref<142x30xf32, #tpu.memory_space<vmem>>, vector<8x30xf32>
    %c14_124 = arith.constant 14 : index
    %c0_125 = arith.constant 0 : index
    %c0_126 = arith.constant 0 : index
    %124 = vector.load %arg6[%c14_124, %c0_125, %c0_126] : memref<16x30x240xf32, #tpu.memory_space<vmem>>, vector<1x30x240xf32>
    %125 = vector.shape_cast %124 : vector<1x30x240xf32> to vector<30x240xf32>
    %cst_127 = arith.constant dense<0.000000e+00> : vector<8x240xf32>
    %126 = tpu.matmul %123, %125, %cst_127 {dimension_numbers = #tpu.dot_dimension_numbers<[1], [0], [0], [1], [0, 0, 1, 1], [], []>} : vector<8x30xf32>, vector<30x240xf32>, vector<8x240xf32> -> vector<8x240xf32>
    %127 = arith.addf %122, %126 : vector<8x240xf32>
    %c15 = arith.constant 15 : index
    %c0_128 = arith.constant 0 : index
    %128 = tpu.strided_load %arg14[%c15, %c0_128] {strides = array<i32: 18, 1>} : memref<142x30xf32, #tpu.memory_space<vmem>>, vector<8x30xf32>
    %c15_129 = arith.constant 15 : index
    %c0_130 = arith.constant 0 : index
    %c0_131 = arith.constant 0 : index
    %129 = vector.load %arg6[%c15_129, %c0_130, %c0_131] : memref<16x30x240xf32, #tpu.memory_space<vmem>>, vector<1x30x240xf32>
    %130 = vector.shape_cast %129 : vector<1x30x240xf32> to vector<30x240xf32>
    %cst_132 = arith.constant dense<0.000000e+00> : vector<8x240xf32>
    %131 = tpu.matmul %128, %130, %cst_132 {dimension_numbers = #tpu.dot_dimension_numbers<[1], [0], [0], [1], [0, 0, 1, 1], [], []>} : vector<8x30xf32>, vector<30x240xf32>, vector<8x240xf32> -> vector<8x240xf32>
    %132 = arith.addf %127, %131 : vector<8x240xf32>
    %cst_133 = arith.constant 0.000000e+00 : f32
    %133 = vector.broadcast %cst_133 : f32 to vector<8x240xf32>
    %134 = arith.maximumf %132, %133 : vector<8x240xf32>
    %c0_134 = arith.constant 0 : index
    %c0_135 = arith.constant 0 : index
    %135 = vector.load %arg8[%c0_134, %c0_135] : memref<240x128xf32, #tpu.memory_space<vmem>>, vector<240x128xf32>
    %cst_136 = arith.constant dense<0.000000e+00> : vector<8x128xf32>
    %136 = tpu.matmul %134, %135, %cst_136 {dimension_numbers = #tpu.dot_dimension_numbers<[1], [0], [0], [1], [0, 0, 1, 1], [], []>} : vector<8x240xf32>, vector<240x128xf32>, vector<8x128xf32> -> vector<8x128xf32>
    %c0_137 = arith.constant 0 : index
    %c0_138 = arith.constant 0 : index
    %137 = vector.load %arg9[%c0_137, %c0_138] : memref<1x128xf32, #tpu.memory_space<vmem>>, vector<1x128xf32>
    %138 = vector.broadcast %137 : vector<1x128xf32> to vector<8x128xf32>
    %139 = arith.addf %136, %138 : vector<8x128xf32>
    %c0_139 = arith.constant 0 : index
    %c0_140 = arith.constant 0 : index
    %140 = vector.load %arg10[%c0_139, %c0_140] : memref<8x128xf32, #tpu.memory_space<vmem>>, vector<8x128xf32>
    tpu.vector_store %arg10[%c0_139, %c0_140], %139 {strides = array<i32>} : memref<8x128xf32, #tpu.memory_space<vmem>>, vector<8x128xf32>,
    return
  }
  func.func @transform_0(%arg0: i32) -> (i32, i32) {
    %c0_i32 = arith.constant 0 : i32
    %c0_i32_0 = arith.constant 0 : i32
    return %arg0, %c0_i32 : i32, i32
  }
  func.func @transform_1(%arg0: i32) -> (i32, i32) {
    %c0_i32 = arith.constant 0 : i32
    %c0_i32_0 = arith.constant 0 : i32
    %c0_i32_1 = arith.constant 0 : i32
    return %c0_i32, %c0_i32_0 : i32, i32
  }
  func.func @transform_2(%arg0: i32) -> (i32, i32) {
    %c0_i32 = arith.constant 0 : i32
    %c0_i32_0 = arith.constant 0 : i32
    %c0_i32_1 = arith.constant 0 : i32
    return %c0_i32, %c0_i32_0 : i32, i32
  }
  func.func @transform_3(%arg0: i32) -> (i32, i32, i32) {
    %c0_i32 = arith.constant 0 : i32
    %c0_i32_0 = arith.constant 0 : i32
    %c0_i32_1 = arith.constant 0 : i32
    %c0_i32_2 = arith.constant 0 : i32
    return %c0_i32, %c0_i32_0, %c0_i32_1 : i32, i32, i32
  }
  func.func @transform_4(%arg0: i32) -> (i32, i32) {
    %c0_i32 = arith.constant 0 : i32
    %c0_i32_0 = arith.constant 0 : i32
    %c0_i32_1 = arith.constant 0 : i32
    return %c0_i32, %c0_i32_0 : i32, i32
  }
  func.func @transform_5(%arg0: i32) -> (i32, i32, i32) {
    %c0_i32 = arith.constant 0 : i32
    %c0_i32_0 = arith.constant 0 : i32
    %c0_i32_1 = arith.constant 0 : i32
    %c0_i32_2 = arith.constant 0 : i32
    return %c0_i32, %c0_i32_0, %c0_i32_1 : i32, i32, i32
  }
  func.func @transform_6(%arg0: i32) -> (i32, i32) {
    %c0_i32 = arith.constant 0 : i32
    %c0_i32_0 = arith.constant 0 : i32
    %c0_i32_1 = arith.constant 0 : i32
    return %c0_i32, %c0_i32_0 : i32, i32
  }
  func.func @transform_7(%arg0: i32) -> (i32, i32) {
    %c0_i32 = arith.constant 0 : i32
    %c0_i32_0 = arith.constant 0 : i32
    %c0_i32_1 = arith.constant 0 : i32
    return %c0_i32, %c0_i32_0 : i32, i32
  }
  func.func @transform_8(%arg0: i32) -> (i32, i32) {
    %c0_i32 = arith.constant 0 : i32
    %c0_i32_0 = arith.constant 0 : i32
    %c0_i32_1 = arith.constant 0 : i32
    return %c0_i32, %c0_i32_0 : i32, i32
  }
  func.func @transform_9(%arg0: i32) -> (i32, i32) {
    %c0_i32 = arith.constant 0 : i32
    %c0_i32_0 = arith.constant 0 : i32
    return %arg0, %c0_i32 : i32, i32
  }
}

</mosaic_0001>

<bundles_post_ra>
// kernel: tpu_custom_call.1
= control target key start
LH: loop header
LB: loop body
LE: loop exit
PB: predicated region body
PF: predicated region fallthrough
CT: control target
= control target key end

     0   :  { %14 = vsyncpa [#allocation7], 0  ;;  %s8101_s0 = inlined_call_operand.vmem [shape: f32[1152,1], index: 0, kind: input, shape index: {}]   ;;  %s8102_s1 = inlined_call_operand.vmem [shape: f32[3,15], index: 1, kind: input, shape index: {}]   ;;  %s8103_s2 = inlined_call_operand.vmem [shape: f32[1,15], index: 2, kind: input, shape index: {}]   ;;  %s8104_s3 = inlined_call_operand.vmem [shape: f32[3,15,30], index: 3, kind: input, shape index: {}]   ;;  %s8105_s4 = inlined_call_operand.vmem [shape: f32[1,30], index: 4, kind: input, shape index: {}]   ;;  %s8106_s5 = inlined_call_operand.vmem [shape: f32[16,30,240], index: 5, kind: input, shape index: {}]   ;;  %s8107_s6 = inlined_call_operand.vmem [shape: f32[1,240], index: 6, kind: input, shape index: {}]   ;;  %s8108_s7 = inlined_call_operand.vmem [shape: f32[240,128], index: 7, kind: input, shape index: {}]   ;;  %s8109_s8 = inlined_call_operand.vmem [shape: f32[1,128], index: 8, kind: input, shape index: {}]   ;;  %s8110_s9 = inlined_call_operand.hbm [shape: f32[16,128], index: 9, kind: output, shape index: {}]  }
   0x1   :  { %16 = vsyncpa [#allocation7 + $0x1], 0  ;;  %s6370_s30 = smov 0   ;;  %s6372_s10 = smov 0  }
   0x2   :  { %s6374_s11 = smov 0   ;;  %s6376_s12 = smov 0  }
   0x3 LB: > { %s6391_s13 = sadd.s32 4294967295, %s6315_s12   ;;  %s5612_s14 = sadd.s32 4294967294, %s6315_s12   ;;  %s6315_s12 = sphi %s6376_s12, %s8119_s12   ;;  %s6311_s11 = sphi %s6374_s11, %s8118_s11   ;;  %s6307_s10 = sphi %s6372_s10, %s8117_s10   ;;  %s6303_s30 = sphi %s6370_s30, %s8116_s30  }
   0x4   : > { %s6395_s15 = sadd.s32 1, %s6315_s12   ;;  %s223_s16 = sadd.s32 1, %s6311_s11 }
   0x5   : > { %s220_s17 = ssub.s32 %s6315_s12, %s6395_s15  ;;  %p233_p0 = scmp.ne.s32.totalorder %s6311_s11, %s6307_s10 }
   0x6   : > { %p221_p1 = scmp.eq.s32.totalorder %s220_s17, 0  ;;  %p234_p2 = scmp.eq.s32.totalorder %s6391_s13, 1 }
   0x7   : > { %p239_p3 = scmp.ne.s32.totalorder %s6307_s10, %s6303_s30  ;;  %p240_p4 = scmp.eq.s32.totalorder %s5612_s14, 1 }
   0x8   : > { %s6406_s18 = scalar_select %p221_p1, %s6311_s11, %s223_s16  }
   0x9   : > { %p6408_p5 = por %p234_p2, %p233_p0  ;;  %p6412_p6 = por %p240_p4, %p239_p3 }
   0xa   : > { %p5615_p7 = scmp.ge.s32.totalorder %s6315_s12, 1  ;;  %p291_p8 = scmp.lt.s32.totalorder %s6315_s12, 3 }
   0xc   : > { %p292_p9 = pnand %p5615_p7, %p291_p8 }
   0xd   : > { %s327_s21 = smul.u32 (!%p292_p9), 72, %s6391_s13  ;;  %s324_s23 = sand.u32 (!%p292_p9), 1, %s6307_s10  }
   0xe   : > { %295 = sbr.rel (%p292_p9) target bundleno = 1410 (0x582), region = 56  ;;  %s5616_s24 = sshll.u32 (!%p292_p9), %s324_s23, 3 }
   0xf   : > { %p328_p10 = scmp.lt.s32.totalorder (!%p292_p9), %s327_s21, 143  ;;  %s326_s28 = scalar_lea.vmem (!%p292_p9), [#allocation6], %s5616_s24 }
  0x10   : > { %s5553_s29 = sshll.u32 (!%p292_p9), %s326_s28, 4  ;;  %s6319_s26 = smov (!%p292_p9), [#allocation6]   ;;  %s5554_s29 = int_to_ptr.vmem [resolvable:$true] %s5553_s29 }
  0x13   : > { %v6317_v0 = vmov 0   ;;  %s8121_s21 = smov (!%p328_p10, %s327_s21), 143  ;;  %v2482_v23 = vld [vmem:[%s8104_s3 + $0x8] sm:$0x7f]  ;;  %vm2591_vm0 = vcmask 1046528   ;;  %v2481_v24 = vld [vmem:[%s8104_s3] sm:$0xff] }
  0x14   : > { %6246 = vset.pattern.permute.xlu1 %v6317_v0  ;;  %6245 = vset.pattern.permute.xlu0 %v6317_v0  ;;  %s5617_s22 = sshll.u32 %s8121_s21, 3  ;;  %vm2155_vm1 = vcmask 121856   ;;  %vm2227_vm2 = vcmask 119808   ;;  %vm3939_vm3 = vcmask 1045504   ;;  %vm3780_vm4 = vcmask 244736   ;;  %s5540_s21 = scalar_lea.sflag [#allocation7], %s324_s23 }
  0x15   : > { %s6422_s25 = scalar_lea.vmem %s8101_s0, %s5617_s22  ;;  %6026 = vmatprep.subr.msk.mxu0 %vm2591_vm0, %v2482_v23  ;;  %vm3816_vm5 = vcmask 240640   ;;  %vm3924_vm6 = vcmask 242688   ;;  %vm5464_vm7 = vcmask 916480   ;;  %s6255_s22 = scalar_lea.vmem %s5554_s29, 128 }
  0x16   : > { %v842_v1 = vld [vmem:[%s6422_s25 + $0x1] sm:$0xff]  ;;  %v843_v3 = vld [vmem:[%s6422_s25 + $0x9] sm:$0xff]  ;;  %v336_v5 = vld [vmem:[%s6422_s25 + $0x18] sm:$0xff]  ;;  %6027 = vmatpush3.msk.msra.mxu0 %vm2591_vm0, %v2482_v23  ;;  %p6256_p11 = scmp.ne.s32.totalorder %s5554_s29, %s6255_s22 }
  0x17   : > { %v333_v2 = vld [vmem:[%s6422_s25] sm:$0xff]  ;;  %917 = vperm.xlu1 %6246, %v842_v1   ;;  %v334_v4 = vld [vmem:[%s6422_s25 + $0x8] sm:$0xff]  ;;  %v335_v6 = vld [vmem:[%s6422_s25 + $0x10] sm:$0xff]  ;;  %6028 = vmatprep.subr.mxu0 %v2481_v24 }
  0x18   : > { %408 = vperm.xlu0 %6245, %v333_v2   ;;  %v845_v7 = vld [vmem:[%s6422_s25 + $0x19] sm:$0xff]  ;;  %v844_v8 = vld [vmem:[%s6422_s25 + $0x11] sm:$0xff]  ;;  %v1423_v10 = vld [vmem:[%s6422_s25 + $0x2] sm:$0xff]  ;;  %6029 = vmatpush3.msra.mxu0 %v2481_v24  ;;  %p6257_p12 = pnand %p6256_p11, %p6408_p5 }
  0x19   : > { %v1424_v9 = vld [vmem:[%s6422_s25 + $0xa] sm:$0xff]  ;;  %v1426_v11 = vld [vmem:[%s6422_s25 + $0x1a] sm:$0xff]  ;;  %v1425_v12 = vld [vmem:[%s6422_s25 + $0x12] sm:$0xff] }
  0x1a   : > { %v338_v13 = vld [vmem:[%s6422_s25 + $0x28] sm:$0xff]  ;;  %v337_v14 = vld [vmem:[%s6422_s25 + $0x20] sm:$0xff]  ;;  %v340_v17 = vld [vmem:[%s6422_s25 + $0x38] sm:$0xff]  ;;  %p6258_p13 = pneg %p6257_p12 }
  0x1b   : > { %922 = vperm.xlu1 %6246, %v843_v3   ;;  %v847_v15 = vld [vmem:[%s6422_s25 + $0x29] sm:$0xff]  ;;  %v846_v16 = vld [vmem:[%s6422_s25 + $0x21] sm:$0xff]  ;;  %v849_v19 = vld [vmem:[%s6422_s25 + $0x39] sm:$0xff] }
  0x1c   : > { %413 = vperm.xlu0 %6245, %v334_v4   ;;  %v339_v18 = vld [vmem:[%s6422_s25 + $0x30] sm:$0xff]  ;;  %v1427_v22 = vld [vmem:[%s6422_s25 + $0x22] sm:$0xff]  ;;  %v1430_v25 = vld [vmem:[%s6422_s25 + $0x3a] sm:$0xff] }
  0x1d   : > { %v848_v20 = vld [vmem:[%s6422_s25 + $0x31] sm:$0xff]  ;;  %v342_v27 = vld [vmem:[%s6422_s25 + $0x48] sm:$0xff]  ;;  %v341_v28 = vld [vmem:[%s6422_s25 + $0x40] sm:$0xff] }
  0x1e   : > { %v1428_v21 = vld [vmem:[%s6422_s25 + $0x2a] sm:$0xff]  ;;  %v1429_v26 = vld [vmem:[%s6422_s25 + $0x32] sm:$0xff]  ;;  %v850_v30 = vld [vmem:[%s6422_s25 + $0x41] sm:$0xff] }
  0x1f   : > { %423 = vperm.xlu1 %6246, %v336_v5   ;;  %v851_v29 = vld [vmem:[%s6422_s25 + $0x49] sm:$0xff]  ;;  %v344_v31 = vld [vmem:[%s6422_s25 + $0x58] sm:$0xff]  ;;  %v345_v40 = vld [vmem:[%s6422_s25 + $0x60] sm:$0xff] }
  0x20   : > { %418 = vperm.xlu0 %6245, %v335_v6   ;;  %v343_v32 = vld [vmem:[%s6422_s25 + $0x50] sm:$0xff]  ;;  %v853_v33 = vld [vmem:[%s6422_s25 + $0x59] sm:$0xff]  ;;  %v1431_v36 = vld [vmem:[%s6422_s25 + $0x42] sm:$0xff] }
  0x21   : > { %v852_v34 = vld [vmem:[%s6422_s25 + $0x51] sm:$0xff]  ;;  %v1434_v37 = vld [vmem:[%s6422_s25 + $0x5a] sm:$0xff]  ;;  %v346_v39 = vld [vmem:[%s6422_s25 + $0x68] sm:$0xff] }
  0x22   : > { %v1432_v35 = vld [vmem:[%s6422_s25 + $0x4a] sm:$0xff]  ;;  %v1433_v38 = vld [vmem:[%s6422_s25 + $0x52] sm:$0xff]  ;;  %v854_v42 = vld [vmem:[%s6422_s25 + $0x61] sm:$0xff] }
  0x23   : > { %932 = vperm.xlu1 %6246, %v845_v7   ;;  %v855_v41 = vld [vmem:[%s6422_s25 + $0x69] sm:$0xff]  ;;  %v348_v43 = vld [vmem:[%s6422_s25 + $0x78] sm:$0xff]  ;;  %v349_v52 = vld [vmem:[%s6422_s25 + $0x80] sm:$0xff] }
  0x24   : > { %927 = vperm.xlu0 %6245, %v844_v8   ;;  %v347_v44 = vld [vmem:[%s6422_s25 + $0x70] sm:$0xff]  ;;  %v857_v45 = vld [vmem:[%s6422_s25 + $0x79] sm:$0xff]  ;;  %v1435_v48 = vld [vmem:[%s6422_s25 + $0x62] sm:$0xff] }
  0x25   : > { %v856_v46 = vld [vmem:[%s6422_s25 + $0x71] sm:$0xff]  ;;  %v1438_v49 = vld [vmem:[%s6422_s25 + $0x7a] sm:$0xff]  ;;  %v350_v51 = vld [vmem:[%s6422_s25 + $0x88] sm:$0xff] }
  0x26   : > { %v1436_v47 = vld [vmem:[%s6422_s25 + $0x6a] sm:$0xff]  ;;  %v1437_v50 = vld [vmem:[%s6422_s25 + $0x72] sm:$0xff]  ;;  %v858_v54 = vld [vmem:[%s6422_s25 + $0x81] sm:$0xff] }
  0x27   : > { %1503 = vperm.xlu1 %6246, %v1424_v9   ;;  %v859_v53 = vld [vmem:[%s6422_s25 + $0x89] sm:$0xff]  ;;  %v352_v55 = vld [vmem:[%s6422_s25 + $0x98] sm:$0xff]  ;;  %v353_v0 = vld [vmem:[%s6422_s25 + $0xa0] sm:$0xff] }
  0x28   : > { %1498 = vperm.xlu0 %6245, %v1423_v10   ;;  %v351_v56 = vld [vmem:[%s6422_s25 + $0x90] sm:$0xff]  ;;  %v861_v57 = vld [vmem:[%s6422_s25 + $0x99] sm:$0xff]  ;;  %v1439_v60 = vld [vmem:[%s6422_s25 + $0x82] sm:$0xff] }
  0x29   : > { %v860_v58 = vld [vmem:[%s6422_s25 + $0x91] sm:$0xff]  ;;  %v1442_v61 = vld [vmem:[%s6422_s25 + $0x9a] sm:$0xff]  ;;  %v354_v63 = vld [vmem:[%s6422_s25 + $0xa8] sm:$0xff] }
  0x2a   : > { %v1440_v59 = vld [vmem:[%s6422_s25 + $0x8a] sm:$0xff]  ;;  %v1441_v62 = vld [vmem:[%s6422_s25 + $0x92] sm:$0xff]  ;;  %v862_v2 = vld [vmem:[%s6422_s25 + $0xa1] sm:$0xff] }
  0x2b   : > { %1513 = vperm.xlu1 %6246, %v1426_v11   ;;  %v863_v1 = vld [vmem:[%s6422_s25 + $0xa9] sm:$0xff]  ;;  %v356_v5 = vld [vmem:[%s6422_s25 + $0xb8] sm:$0xff]  ;;  %v6519_v23 = vld [vmem:[%s8102_s1 + $0x2] ss:$0 sm:$0xff] }
  0x2c   : > { %1508 = vperm.xlu0 %6245, %v1425_v12   ;;  %v355_v6 = vld [vmem:[%s6422_s25 + $0xb0] sm:$0xff]  ;;  %v865_v9 = vld [vmem:[%s6422_s25 + $0xb9] sm:$0xff] }
  0x2d   : > { %v864_v10 = vld [vmem:[%s6422_s25 + $0xb1] sm:$0xff]  ;;  %v1446_v24 = vld [vmem:[%s6422_s25 + $0xba] sm:$0xff] }
  0x2f   : > { %433 = vperm.xlu1 %6246, %v338_v13   ;;  %v6503_v13 = vld [vmem:[%s8102_s1 + $0x1] ss:$0 sm:$0xff] }
  0x30   : > { %428 = vperm.xlu0 %6245, %v337_v14   ;;  %v6508_v14 = vld [vmem:[%s8102_s1] ss:$0 sm:$0xff] }
  0x33   : > { %942 = vperm.xlu1 %6246, %v847_v15   ;;  %v1444_v15 = vld [vmem:[%s6422_s25 + $0xaa] sm:$0xff] }
  0x34   : > { %937 = vperm.xlu0 %6245, %v846_v16   ;;  %v1443_v16 = vld [vmem:[%s6422_s25 + $0xa2] sm:$0xff] }
  0x37   : > { %443 = vperm.xlu1 %6246, %v340_v17  }
  0x38   : > { %438 = vperm.xlu0 %6245, %v339_v18  }
  0x3b   : > { %952 = vperm.xlu1 %6246, %v849_v19  }
  0x3c   : > { %947 = vperm.xlu0 %6245, %v848_v20  }
  0x3f   : > { %1523 = vperm.xlu1 %6246, %v1428_v21  }
  0x40   : > { %1518 = vperm.xlu0 %6245, %v1427_v22  }
  0x43   : > { %1533 = vperm.xlu1 %6246, %v1430_v25   ;;  %v1445_v25 = vld [vmem:[%s6422_s25 + $0xb2] sm:$0xff] }
  0x44   : > { %1528 = vperm.xlu0 %6245, %v1429_v26  }
  0x47   : > { %453 = vperm.xlu1 %6246, %v342_v27  }
  0x48   : > { %448 = vperm.xlu0 %6245, %v341_v28  }
  0x4b   : > { %962 = vperm.xlu1 %6246, %v851_v29  }
  0x4c   : > { %957 = vperm.xlu0 %6245, %v850_v30  }
  0x4f   : > { %463 = vperm.xlu1 %6246, %v344_v31  }
  0x50   : > { %458 = vperm.xlu0 %6245, %v343_v32  }
  0x53   : > { %972 = vperm.xlu1 %6246, %v853_v33  }
  0x54   : > { %967 = vperm.xlu0 %6245, %v852_v34  }
  0x57   : > { %1543 = vperm.xlu1 %6246, %v1432_v35  }
  0x58   : > { %1538 = vperm.xlu0 %6245, %v1431_v36   ;;  %v6532_v36 = vld [vmem:[%s8103_s2] ss:$0 sm:$0xff] }
  0x5b   : > { %1553 = vperm.xlu1 %6246, %v1434_v37   ;;  %v358_v37 = vld [vmem:[%s6422_s25 + $0xc8] sm:$0xff] }
  0x5c   : > { %1548 = vperm.xlu0 %6245, %v1433_v38  }
  0x5f   : > { %473 = vperm.xlu1 %6246, %v346_v39  }
  0x60   : > { %468 = vperm.xlu0 %6245, %v345_v40   ;;  %v357_v40 = vld [vmem:[%s6422_s25 + $0xc0] sm:$0xff] }
  0x63   : > { %982 = vperm.xlu1 %6246, %v855_v41  }
  0x64   : > { %977 = vperm.xlu0 %6245, %v854_v42  }
  0x67   : > { %483 = vperm.xlu1 %6246, %v348_v43  }
  0x68   : > { %478 = vperm.xlu0 %6245, %v347_v44  }
  0x6b   : > { %992 = vperm.xlu1 %6246, %v857_v45  }
  0x6c   : > { %987 = vperm.xlu0 %6245, %v856_v46  }
  0x6f   : > { %1563 = vperm.xlu1 %6246, %v1436_v47  }
  0x70   : > { %1558 = vperm.xlu0 %6245, %v1435_v48  }
  0x73   : > { %1573 = vperm.xlu1 %6246, %v1438_v49   ;;  %v867_v49 = vld [vmem:[%s6422_s25 + $0xc9] sm:$0xff] }
  0x74   : > { %1568 = vperm.xlu0 %6245, %v1437_v50  }
  0x77   : > { %493 = vperm.xlu1 %6246, %v350_v51  }
  0x78   : > { %488 = vperm.xlu0 %6245, %v349_v52  }
  0x7b   : > { %1002 = vperm.xlu1 %6246, %v859_v53  }
  0x7c   : > { %997 = vperm.xlu0 %6245, %v858_v54   ;;  %v866_v54 = vld [vmem:[%s6422_s25 + $0xc1] sm:$0xff] }
  0x7f   : > { %503 = vperm.xlu1 %6246, %v352_v55  }
  0x80   : > { %498 = vperm.xlu0 %6245, %v351_v56  }
  0x83   : > { %1012 = vperm.xlu1 %6246, %v861_v57  }
  0x84   : > { %1007 = vperm.xlu0 %6245, %v860_v58  }
  0x87   : > { %1583 = vperm.xlu1 %6246, %v1440_v59   ;;  %v360_v59 = vld [vmem:[%s6422_s25 + $0xd8] sm:$0xff] }
  0x88   : > { %1578 = vperm.xlu0 %6245, %v1439_v60  }
  0x8b   : > { %1593 = vperm.xlu1 %6246, %v1442_v61  }
  0x8c   : > { %1588 = vperm.xlu0 %6245, %v1441_v62   ;;  %v359_v62 = vld [vmem:[%s6422_s25 + $0xd0] sm:$0xff] }
  0x8f   : > { %513 = vperm.xlu1 %6246, %v354_v63  }
  0x90   : > { %508 = vperm.xlu0 %6245, %v353_v0  }
  0x92   : > { %v918_v3 = vpop.permute.xlu1 %917 }
  0x93   : > { %v409_v4 = vpop.permute.xlu0 %408  ;;  %1022 = vperm.xlu1 %6246, %v863_v1   ;;  %v1279_v17 = vmul.f32 %v6503_v13, %v918_v3  ;;  %v869_v1 = vld [vmem:[%s6422_s25 + $0xd9] sm:$0xff] }
  0x94   : > { %1017 = vperm.xlu0 %6245, %v862_v2   ;;  %v770_v18 = vmul.f32 %v6508_v14, %v409_v4  ;;  %v868_v2 = vld [vmem:[%s6422_s25 + $0xd1] sm:$0xff] }
  0x96   : > { %v923_v7 = vpop.permute.xlu1 %922  ;;  %v1351_v26 = vadd.f32 %v1279_v17, %v770_v18 }
  0x97   : > { %v414_v8 = vpop.permute.xlu0 %413  ;;  %523 = vperm.xlu1 %6246, %v356_v5   ;;  %v1280_v21 = vmul.f32 %v6503_v13, %v923_v7 }
  0x98   : > { %518 = vperm.xlu0 %6245, %v355_v6   ;;  %v771_v22 = vmul.f32 %v6508_v14, %v414_v8  ;;  %v1448_v8 = vld [vmem:[%s6422_s25 + $0xca] sm:$0xff] }
  0x9a   : > { %v424_v11 = vpop.permute.xlu1 %423  ;;  %v1352_v31 = vadd.f32 %v1280_v21, %v771_v22  ;;  %v1449_v22 = vld [vmem:[%s6422_s25 + $0xd2] sm:$0xff] }
  0x9b   : > { %v419_v12 = vpop.permute.xlu0 %418  ;;  %1032 = vperm.xlu1 %6246, %v865_v9   ;;  %v773_v34 = vmul.f32 %v6508_v14, %v424_v11  ;;  %v1447_v9 = vld [vmem:[%s6422_s25 + $0xc2] sm:$0xff] }
  0x9c   : > { %1027 = vperm.xlu0 %6245, %v864_v10   ;;  %v772_v35 = vmul.f32 %v6508_v14, %v419_v12 }
  0x9e   : > { %v933_v19 = vpop.permute.xlu1 %932 }
  0x9f   : > { %v928_v20 = vpop.permute.xlu0 %927  ;;  %1603 = vperm.xlu1 %6246, %v1444_v15   ;;  %v1282_v27 = vmul.f32 %v6503_v13, %v933_v19  ;;  %v1450_v19 = vld [vmem:[%s6422_s25 + $0xda] sm:$0xff] }
  0xa0   : > { %1598 = vperm.xlu0 %6245, %v1443_v16   ;;  %v1281_v28 = vmul.f32 %v6503_v13, %v928_v20 }
  0xa1   : > { %v1354_v41 = vadd.f32 %v1282_v27, %v773_v34 }
  0xa2   : > { %v1504_v29 = vpop.permute.xlu1 %1503  ;;  %v1353_v42 = vadd.f32 %v1281_v28, %v772_v35  ;;  %v362_v35 = vld [vmem:[%s6422_s25 + $0xe8] sm:$0xff] }
  0xa3   : > { %v1499_v30 = vpop.permute.xlu0 %1498  ;;  %v1861_v32 = vmul.f32 %v6519_v23, %v1504_v29  ;;  %1613 = vperm.xlu1 %6246, %v1446_v24  }
  0xa4   : > { %v1860_v33 = vmul.f32 %v6519_v23, %v1499_v30  ;;  %1608 = vperm.xlu0 %6245, %v1445_v25  }
  0xa5   : > { %v1933_v38 = vadd.f32 %v1861_v32, %v1352_v31 }
  0xa6   : > { %v1932_v39 = vadd.f32 %v1860_v33, %v1351_v26  ;;  %v1514_v43 = vpop.permute.xlu1 %1513 }
  0xa7   : > { %v1509_v44 = vpop.permute.xlu0 %1508  ;;  %v2012_v45 = vadd.f32 %v6532_v36, %v1933_v38  ;;  %v1863_v47 = vmul.f32 %v6519_v23, %v1514_v43  ;;  %533 = vperm.xlu1 %6246, %v358_v37  }
  0xa8   : > { %v2011_v46 = vadd.f32 %v6532_v36, %v1932_v39  ;;  %v1862_v48 = vmul.f32 %v6519_v23, %v1509_v44  ;;  %528 = vperm.xlu0 %6245, %v357_v40   ;;  %v361_v39 = vld [vmem:[%s6422_s25 + $0xe0] sm:$0xff] }
  0xa9   : > { %v2084_v50 = vmax.f32 %v2012_v45, 0.0  ;;  %v1935_v52 = vadd.f32 %v1863_v47, %v1354_v41 }
  0xaa   : > { %v2083_v51 = vmax.f32 %v2011_v46, 0.0  ;;  %v1934_v53 = vadd.f32 %v1862_v48, %v1353_v42  ;;  %v434_v55 = vpop.permute.xlu1 %433 }
  0xab   : > { %v429_v56 = vpop.permute.xlu0 %428  ;;  %2157 = vst.msk [vmem:[#allocation2 + $0x8] sm:$0xff] %vm2155_vm1, %v2084_v50  ;;  %v2014_v57 = vadd.f32 %v6532_v36, %v1935_v52  ;;  %1042 = vperm.xlu1 %6246, %v867_v49   ;;  %v775_v20 = vmul.f32 %v6508_v14, %v434_v55  ;;  %v871_v49 = vld [vmem:[%s6422_s25 + $0xe9] sm:$0xff] }
  0xac   : > { %2156 = vst.msk [vmem:[#allocation2] sm:$0xff] %vm2155_vm1, %v2083_v51  ;;  %v2013_v58 = vadd.f32 %v6532_v36, %v1934_v53  ;;  %1037 = vperm.xlu0 %6245, %v866_v54   ;;  %v774_v21 = vmul.f32 %v6508_v14, %v429_v56  ;;  %v870_v54 = vld [vmem:[%s6422_s25 + $0xe1] sm:$0xff] }
  0xad   : > { %v2086_v60 = vmax.f32 %v2014_v57, 0.0 }
  0xae   : > { %v2085_v61 = vmax.f32 %v2013_v58, 0.0  ;;  %v943_v63 = vpop.permute.xlu1 %942 }
  0xaf   : > { %v938_v0 = vpop.permute.xlu0 %937  ;;  %2159 = vst.msk [vmem:[#allocation2 + $0x18] sm:$0xff] %vm2155_vm1, %v2086_v60  ;;  %543 = vperm.xlu1 %6246, %v360_v59   ;;  %v1284_v16 = vmul.f32 %v6503_v13, %v943_v63  ;;  %v364_v59 = vld [vmem:[%s6422_s25 + $0xf8] sm:$0xff] }
  0xb0   : > { %2158 = vst.msk [vmem:[#allocation2 + $0x10] sm:$0xff] %vm2155_vm1, %v2085_v61  ;;  %538 = vperm.xlu0 %6245, %v359_v62   ;;  %v1283_v17 = vmul.f32 %v6503_v13, %v938_v0  ;;  %v363_v62 = vld [vmem:[%s6422_s25 + $0xf0] sm:$0xff] }
  0xb1   : > { %v1356_v28 = vadd.f32 %v1284_v16, %v775_v20 }
  0xb2   : > { %v444_v3 = vpop.permute.xlu1 %443  ;;  %v1355_v29 = vadd.f32 %v1283_v17, %v774_v21 }
  0xb3   : > { %v439_v4 = vpop.permute.xlu0 %438  ;;  %v2229_v5 = vld [vmem:[#allocation2] ss:$2 sm:$0xff]  ;;  %v2301_v6 = vld [vmem:[#allocation2 + $0x1] ss:$2 sm:$0xff]  ;;  %1052 = vperm.xlu1 %6246, %v869_v1   ;;  %v777_v32 = vmul.f32 %v6508_v14, %v444_v3 }
  0xb4   : > { %v2372_v7 = vmax.f32 %v2229_v5, %v2301_v6  ;;  %1047 = vperm.xlu0 %6245, %v868_v2   ;;  %v776_v33 = vmul.f32 %v6508_v14, %v439_v4  ;;  %v873_v1 = vld [vmem:[%s6422_s25 + $0xf9] sm:$0xff]  ;;  %v872_v2 = vld [vmem:[%s6422_s25 + $0xf1] sm:$0xff] }
  0xb6   : > { %2408 = vst.msk [vmem:[#allocation3] sm:$0xff] %vm2155_vm1, %v2372_v7  ;;  %v953_v10 = vpop.permute.xlu1 %952 }
  0xb7   : > { %v948_v11 = vpop.permute.xlu0 %947  ;;  %v2231_v12 = vld [vmem:[#allocation2 + $0x10] ss:$2 sm:$0xff]  ;;  %v2303_v15 = vld [vmem:[#allocation2 + $0x11] ss:$2 sm:$0xff]  ;;  %1623 = vperm.xlu1 %6246, %v1448_v8   ;;  %v1286_v24 = vmul.f32 %v6503_v13, %v953_v10 }
  0xb8   : > { %v2373_v18 = vmax.f32 %v2231_v12, %v2303_v15  ;;  %1618 = vperm.xlu0 %6245, %v1447_v9   ;;  %v1285_v25 = vmul.f32 %v6503_v13, %v948_v11  ;;  %v1452_v8 = vld [vmem:[%s6422_s25 + $0xea] sm:$0xff]  ;;  %v1451_v9 = vld [vmem:[%s6422_s25 + $0xe2] sm:$0xff] }
  0xb9   : > { %v1358_v40 = vadd.f32 %v1286_v24, %v777_v32 }
  0xba   : > { %2409 = vst.msk [vmem:[#allocation3 + $0x8] sm:$0xff] %vm2155_vm1, %v2373_v18  ;;  %v1524_v26 = vpop.permute.xlu1 %1523  ;;  %v1357_v41 = vadd.f32 %v1285_v25, %v776_v33 }
  0xbb   : > { %v1519_v27 = vpop.permute.xlu0 %1518  ;;  %v1865_v30 = vmul.f32 %v6519_v23, %v1524_v26  ;;  %1633 = vperm.xlu1 %6246, %v1450_v19   ;;  %v1454_v19 = vld [vmem:[%s6422_s25 + $0xfa] sm:$0xff] }
  0xbc   : > { %v1864_v31 = vmul.f32 %v6519_v23, %v1519_v27  ;;  %1628 = vperm.xlu0 %6245, %v1449_v22   ;;  %v1453_v22 = vld [vmem:[%s6422_s25 + $0xf2] sm:$0xff] }
  0xbd   : > { %v2445_v34 = vld [vmem:[#allocation3] sm:$0xff]  ;;  %v1937_v37 = vadd.f32 %v1865_v30, %v1356_v28 }
  0xbe   : > { %v1936_v38 = vadd.f32 %v1864_v31, %v1355_v29  ;;  %6030 = vmatprep.mubr.msk.f32.mxu0 %vm2155_vm1, %v2445_v34  ;;  %v1534_v42 = vpop.permute.xlu1 %1533 }
  0xbf   : > { %v1529_v43 = vpop.permute.xlu0 %1528  ;;  %v2016_v44 = vadd.f32 %v6532_v36, %v1937_v37  ;;  %v1867_v46 = vmul.f32 %v6519_v23, %v1534_v42  ;;  %553 = vperm.xlu1 %6246, %v362_v35   ;;  %v366_v35 = vld [vmem:[%s6422_s25 + $0x108] sm:$0xff] }
  0xc0   : > { %v2015_v45 = vadd.f32 %v6532_v36, %v1936_v38  ;;  %v1866_v47 = vmul.f32 %v6519_v23, %v1529_v43  ;;  %548 = vperm.xlu0 %6245, %v361_v39   ;;  %v365_v39 = vld [vmem:[%s6422_s25 + $0x100] sm:$0xff] }
  0xc1   : > { %v2446_v48 = vld [vmem:[#allocation3 + $0x8] sm:$0xff]  ;;  %v2088_v50 = vmax.f32 %v2016_v44, 0.0  ;;  %v1939_v52 = vadd.f32 %v1867_v46, %v1358_v40 }
  0xc2   : > { %v2087_v51 = vmax.f32 %v2015_v45, 0.0  ;;  %v1938_v53 = vadd.f32 %v1866_v47, %v1357_v41  ;;  %6031 = vmatmul.mubr.msk.f32.vlgmr.msra.gmra.mxu0 %vm2155_vm1, %v2446_v48  ;;  %v454_v55 = vpop.permute.xlu1 %453 }
  0xc3   : > { %v449_v56 = vpop.permute.xlu0 %448  ;;  %2161 = vst.msk [vmem:[#allocation2 + $0x28] sm:$0xff] %vm2155_vm1, %v2088_v50  ;;  %v2018_v57 = vadd.f32 %v6532_v36, %v1939_v52  ;;  %1062 = vperm.xlu1 %6246, %v871_v49   ;;  %v779_v20 = vmul.f32 %v6508_v14, %v454_v55  ;;  %v875_v49 = vld [vmem:[%s6422_s25 + $0x109] sm:$0xff] }
  0xc4   : > { %2160 = vst.msk [vmem:[#allocation2 + $0x20] sm:$0xff] %vm2155_vm1, %v2087_v51  ;;  %v2017_v58 = vadd.f32 %v6532_v36, %v1938_v53  ;;  %1057 = vperm.xlu0 %6245, %v870_v54   ;;  %v778_v21 = vmul.f32 %v6508_v14, %v449_v56  ;;  %v874_v54 = vld [vmem:[%s6422_s25 + $0x101] sm:$0xff] }
  0xc5   : > { %v2090_v60 = vmax.f32 %v2018_v57, 0.0 }
  0xc6   : > { %v2089_v61 = vmax.f32 %v2017_v58, 0.0  ;;  %v963_v63 = vpop.permute.xlu1 %962 }
  0xc7   : > { %v958_v0 = vpop.permute.xlu0 %957  ;;  %2163 = vst.msk [vmem:[#allocation2 + $0x38] sm:$0xff] %vm2155_vm1, %v2090_v60  ;;  %563 = vperm.xlu1 %6246, %v364_v59   ;;  %v1288_v16 = vmul.f32 %v6503_v13, %v963_v63  ;;  %v368_v59 = vld [vmem:[%s6422_s25 + $0x118] sm:$0xff] }
  0xc8   : > { %2162 = vst.msk [vmem:[#allocation2 + $0x30] sm:$0xff] %vm2155_vm1, %v2089_v61  ;;  %558 = vperm.xlu0 %6245, %v363_v62   ;;  %v1287_v17 = vmul.f32 %v6503_v13, %v958_v0  ;;  %v367_v62 = vld [vmem:[%s6422_s25 + $0x110] sm:$0xff] }
  0xc9   : > { %v1360_v28 = vadd.f32 %v1288_v16, %v779_v20 }
  0xca   : > { %v464_v3 = vpop.permute.xlu1 %463  ;;  %v1359_v29 = vadd.f32 %v1287_v17, %v778_v21  ;;  %v1458_v21 = vld [vmem:[%s6422_s25 + $0x11a] sm:$0xff] }
  0xcb   : > { %v459_v4 = vpop.permute.xlu0 %458  ;;  %v2233_v5 = vld [vmem:[#allocation2 + $0x20] ss:$2 sm:$0xff]  ;;  %v2305_v6 = vld [vmem:[#allocation2 + $0x21] ss:$2 sm:$0xff]  ;;  %1072 = vperm.xlu1 %6246, %v873_v1   ;;  %v781_v32 = vmul.f32 %v6508_v14, %v464_v3  ;;  %v5661_v3 = vld [vmem:[%s8104_s3 + $0x18] sm:$0x7f] }
  0xcc   : > { %v2374_v7 = vmax.f32 %v2233_v5, %v2305_v6  ;;  %1067 = vperm.xlu0 %6245, %v872_v2   ;;  %v780_v33 = vmul.f32 %v6508_v14, %v459_v4  ;;  %v877_v1 = vld [vmem:[%s6422_s25 + $0x119] sm:$0xff]  ;;  %v876_v2 = vld [vmem:[%s6422_s25 + $0x111] sm:$0xff]  ;;  %6200 = vmatprep.subr.msk.mxu1 %vm2591_vm0, %v5661_v3 }
  0xcd   : > { %6084 = vmatprep.subr.msk.mxu0 %vm2591_vm0, %v5661_v3  ;;  %6202 = vmatpush3.msk.msra.mxu1 %vm2591_vm0, %v5661_v3 }
  0xce   : > { %2410 = vst.msk [vmem:[#allocation3 + $0x10] sm:$0xff] %vm2155_vm1, %v2374_v7  ;;  %v973_v10 = vpop.permute.xlu1 %972  ;;  %6085 = vmatpush3.msk.msra.mxu0 %vm2591_vm0, %v5661_v3  ;;  %v881_v3 = vld [vmem:[%s6422_s25 + $0x139] sm:$0xff] }
  0xcf   : > { %v968_v11 = vpop.permute.xlu0 %967  ;;  %v2235_v12 = vld [vmem:[#allocation2 + $0x30] ss:$2 sm:$0xff]  ;;  %v2307_v15 = vld [vmem:[#allocation2 + $0x31] ss:$2 sm:$0xff]  ;;  %1643 = vperm.xlu1 %6246, %v1452_v8   ;;  %v1290_v24 = vmul.f32 %v6503_v13, %v973_v10 }
  0xd0   : > { %v2375_v18 = vmax.f32 %v2235_v12, %v2307_v15  ;;  %1638 = vperm.xlu0 %6245, %v1451_v9   ;;  %v1289_v25 = vmul.f32 %v6503_v13, %v968_v11  ;;  %v5660_v9 = vld [vmem:[%s8104_s3 + $0x10] sm:$0xff]  ;;  %v1455_v11 = vld [vmem:[%s6422_s25 + $0x102] sm:$0xff] }
  0xd1   : > { %v1362_v40 = vadd.f32 %v1290_v24, %v781_v32  ;;  %v1456_v10 = vld [vmem:[%s6422_s25 + $0x10a] sm:$0xff]  ;;  %6201 = vmatprep.subr.mxu1 %v5660_v9  ;;  %6086 = vmatprep.subr.mxu0 %v5660_v9 }
  0xd2   : > { %2411 = vst.msk [vmem:[#allocation3 + $0x18] sm:$0xff] %vm2155_vm1, %v2375_v18  ;;  %v1544_v26 = vpop.permute.xlu1 %1543  ;;  %v1361_v41 = vadd.f32 %v1289_v25, %v780_v33  ;;  %6203 = vmatpush3.msra.mxu1 %v5660_v9  ;;  %6087 = vmatpush3.msra.mxu0 %v5660_v9  ;;  %v1457_v25 = vld [vmem:[%s6422_s25 + $0x112] sm:$0xff] }
  0xd3   : > { %v1539_v27 = vpop.permute.xlu0 %1538  ;;  %v1869_v30 = vmul.f32 %v6519_v23, %v1544_v26  ;;  %1653 = vperm.xlu1 %6246, %v1454_v19  }
  0xd4   : > { %v1868_v31 = vmul.f32 %v6519_v23, %v1539_v27  ;;  %1648 = vperm.xlu0 %6245, %v1453_v22  }
  0xd5   : > { %v2447_v34 = vld [vmem:[#allocation3 + $0x10] sm:$0xff]  ;;  %v1941_v37 = vadd.f32 %v1869_v30, %v1360_v28 }
  0xd6   : > { %v1940_v38 = vadd.f32 %v1868_v31, %v1359_v29  ;;  %6033 = vmatprep.mubr.msk.f32.mxu0 %vm2155_vm1, %v2447_v34  ;;  %v1554_v42 = vpop.permute.xlu1 %1553 }
  0xd7   : > { %v1549_v43 = vpop.permute.xlu0 %1548  ;;  %v2020_v44 = vadd.f32 %v6532_v36, %v1941_v37  ;;  %v1871_v46 = vmul.f32 %v6519_v23, %v1554_v42  ;;  %573 = vperm.xlu1 %6246, %v366_v35  }
  0xd8   : > { %v2019_v45 = vadd.f32 %v6532_v36, %v1940_v38  ;;  %v1870_v47 = vmul.f32 %v6519_v23, %v1549_v43  ;;  %568 = vperm.xlu0 %6245, %v365_v39   ;;  %v370_v38 = vld [vmem:[%s6422_s25 + $0x128] sm:$0xff] }
  0xd9   : > { %v2448_v48 = vld [vmem:[#allocation3 + $0x18] sm:$0xff]  ;;  %v2092_v50 = vmax.f32 %v2020_v44, 0.0  ;;  %v1943_v52 = vadd.f32 %v1871_v46, %v1362_v40 }
  0xda   : > { %v2091_v51 = vmax.f32 %v2019_v45, 0.0  ;;  %v1942_v53 = vadd.f32 %v1870_v47, %v1361_v41  ;;  %6034 = vmatmul.mubr.msk.f32.gmra.mxu0 %vm2155_vm1, %v2448_v48  ;;  %v474_v55 = vpop.permute.xlu1 %473  ;;  %v369_v41 = vld [vmem:[%s6422_s25 + $0x120] sm:$0xff] }
  0xdb   : > { %v469_v56 = vpop.permute.xlu0 %468  ;;  %2165 = vst.msk [vmem:[#allocation2 + $0x48] sm:$0xff] %vm2155_vm1, %v2092_v50  ;;  %v2022_v57 = vadd.f32 %v6532_v36, %v1943_v52  ;;  %1082 = vperm.xlu1 %6246, %v875_v49   ;;  %v783_v22 = vmul.f32 %v6508_v14, %v474_v55 }
  0xdc   : > { %2164 = vst.msk [vmem:[#allocation2 + $0x40] sm:$0xff] %vm2155_vm1, %v2091_v51  ;;  %v2021_v58 = vadd.f32 %v6532_v36, %v1942_v53  ;;  %1077 = vperm.xlu0 %6245, %v874_v54   ;;  %v782_v24 = vmul.f32 %v6508_v14, %v469_v56  ;;  %v879_v51 = vld [vmem:[%s6422_s25 + $0x129] sm:$0xff]  ;;  %v878_v56 = vld [vmem:[%s6422_s25 + $0x121] sm:$0xff] }
  0xdd   : > { %v2094_v60 = vmax.f32 %v2022_v57, 0.0 }
  0xde   : > { %v2093_v61 = vmax.f32 %v2021_v58, 0.0  ;;  %v983_v63 = vpop.permute.xlu1 %982 }
  0xdf   : > { %v978_v0 = vpop.permute.xlu0 %977  ;;  %2167 = vst.msk [vmem:[#allocation2 + $0x58] sm:$0xff] %vm2155_vm1, %v2094_v60  ;;  %583 = vperm.xlu1 %6246, %v368_v59   ;;  %v1292_v18 = vmul.f32 %v6503_v13, %v983_v63 }
  0xe0   : > { %2166 = vst.msk [vmem:[#allocation2 + $0x50] sm:$0xff] %vm2155_vm1, %v2093_v61  ;;  %578 = vperm.xlu0 %6245, %v367_v62   ;;  %v1291_v19 = vmul.f32 %v6503_v13, %v978_v0  ;;  %v372_v61 = vld [vmem:[%s6422_s25 + $0x138] sm:$0xff]  ;;  %v371_v0 = vld [vmem:[%s6422_s25 + $0x130] sm:$0xff] }
  0xe1   : > { %v1364_v30 = vadd.f32 %v1292_v18, %v783_v22 }
  0xe2   : > { %v484_v4 = vpop.permute.xlu1 %483  ;;  %v1363_v31 = vadd.f32 %v1291_v19, %v782_v24 }
  0xe3   : > { %v479_v5 = vpop.permute.xlu0 %478  ;;  %v2237_v6 = vld [vmem:[#allocation2 + $0x40] ss:$2 sm:$0xff]  ;;  %v2309_v7 = vld [vmem:[#allocation2 + $0x41] ss:$2 sm:$0xff]  ;;  %1092 = vperm.xlu1 %6246, %v877_v1   ;;  %v785_v34 = vmul.f32 %v6508_v14, %v484_v4  ;;  %v880_v4 = vld [vmem:[%s6422_s25 + $0x131] sm:$0xff] }
  0xe4   : > { %v2376_v8 = vmax.f32 %v2237_v6, %v2309_v7  ;;  %1087 = vperm.xlu0 %6245, %v876_v2   ;;  %v784_v35 = vmul.f32 %v6508_v14, %v479_v5 }
  0xe6   : > { %2412 = vst.msk [vmem:[#allocation3 + $0x20] sm:$0xff] %vm2155_vm1, %v2376_v8  ;;  %v993_v12 = vpop.permute.xlu1 %992 }
  0xe7   : > { %v988_v15 = vpop.permute.xlu0 %987  ;;  %v2239_v16 = vld [vmem:[#allocation2 + $0x50] ss:$2 sm:$0xff]  ;;  %v2311_v17 = vld [vmem:[#allocation2 + $0x51] ss:$2 sm:$0xff]  ;;  %1663 = vperm.xlu1 %6246, %v1456_v10   ;;  %v1294_v26 = vmul.f32 %v6503_v13, %v993_v12 }
  0xe8   : > { %v2377_v20 = vmax.f32 %v2239_v16, %v2311_v17  ;;  %1658 = vperm.xlu0 %6245, %v1455_v11   ;;  %v1293_v27 = vmul.f32 %v6503_v13, %v988_v15  ;;  %v1460_v10 = vld [vmem:[%s6422_s25 + $0x12a] sm:$0xff]  ;;  %v1459_v11 = vld [vmem:[%s6422_s25 + $0x122] sm:$0xff] }
  0xe9   : > { %v1366_v42 = vadd.f32 %v1294_v26, %v785_v34 }
  0xea   : > { %2413 = vst.msk [vmem:[#allocation3 + $0x28] sm:$0xff] %vm2155_vm1, %v2377_v20  ;;  %v1564_v28 = vpop.permute.xlu1 %1563  ;;  %v1365_v43 = vadd.f32 %v1293_v27, %v784_v35 }
  0xeb   : > { %v1559_v29 = vpop.permute.xlu0 %1558  ;;  %v1873_v32 = vmul.f32 %v6519_v23, %v1564_v28  ;;  %1673 = vperm.xlu1 %6246, %v1458_v21   ;;  %v1462_v21 = vld [vmem:[%s6422_s25 + $0x13a] sm:$0xff] }
  0xec   : > { %v1872_v33 = vmul.f32 %v6519_v23, %v1559_v29  ;;  %1668 = vperm.xlu0 %6245, %v1457_v25   ;;  %v1461_v25 = vld [vmem:[%s6422_s25 + $0x132] sm:$0xff] }
  0xed   : > { %v2449_v37 = vld [vmem:[#allocation3 + $0x20] sm:$0xff]  ;;  %v1945_v39 = vadd.f32 %v1873_v32, %v1364_v30 }
  0xee   : > { %v1944_v40 = vadd.f32 %v1872_v33, %v1363_v31  ;;  %6036 = vmatprep.mubr.msk.f32.mxu0 %vm2155_vm1, %v2449_v37  ;;  %v1574_v44 = vpop.permute.xlu1 %1573 }
  0xef   : > { %v1569_v45 = vpop.permute.xlu0 %1568  ;;  %v2024_v46 = vadd.f32 %v6532_v36, %v1945_v39  ;;  %v1875_v48 = vmul.f32 %v6519_v23, %v1574_v44  ;;  %593 = vperm.xlu1 %6246, %v370_v38   ;;  %v374_v38 = vld [vmem:[%s6422_s25 + $0x148] sm:$0xff] }
  0xf0   : > { %v2023_v47 = vadd.f32 %v6532_v36, %v1944_v40  ;;  %v1874_v49 = vmul.f32 %v6519_v23, %v1569_v45  ;;  %588 = vperm.xlu0 %6245, %v369_v41   ;;  %v373_v41 = vld [vmem:[%s6422_s25 + $0x140] sm:$0xff] }
  0xf1   : > { %v2450_v50 = vld [vmem:[#allocation3 + $0x28] sm:$0xff]  ;;  %v2096_v52 = vmax.f32 %v2024_v46, 0.0  ;;  %v1947_v54 = vadd.f32 %v1875_v48, %v1366_v42 }
  0xf2   : > { %v2095_v53 = vmax.f32 %v2023_v47, 0.0  ;;  %v1946_v55 = vadd.f32 %v1874_v49, %v1365_v43  ;;  %6037 = vmatmul.mubr.msk.f32.gmra.mxu0 %vm2155_vm1, %v2450_v50  ;;  %v494_v57 = vpop.permute.xlu1 %493 }
  0xf3   : > { %v489_v58 = vpop.permute.xlu0 %488  ;;  %2169 = vst.msk [vmem:[#allocation2 + $0x68] sm:$0xff] %vm2155_vm1, %v2096_v52  ;;  %v2026_v59 = vadd.f32 %v6532_v36, %v1947_v54  ;;  %1102 = vperm.xlu1 %6246, %v879_v51   ;;  %v787_v22 = vmul.f32 %v6508_v14, %v494_v57  ;;  %v883_v51 = vld [vmem:[%s6422_s25 + $0x149] sm:$0xff] }
  0xf4   : > { %2168 = vst.msk [vmem:[#allocation2 + $0x60] sm:$0xff] %vm2155_vm1, %v2095_v53  ;;  %v2025_v60 = vadd.f32 %v6532_v36, %v1946_v55  ;;  %1097 = vperm.xlu0 %6245, %v878_v56   ;;  %v786_v24 = vmul.f32 %v6508_v14, %v489_v58  ;;  %v882_v56 = vld [vmem:[%s6422_s25 + $0x141] sm:$0xff] }
  0xf5   : > { %v2098_v62 = vmax.f32 %v2026_v59, 0.0 }
  0xf6   : > { %v2097_v63 = vmax.f32 %v2025_v60, 0.0  ;;  %v1003_v1 = vpop.permute.xlu1 %1002 }
  0xf7   : > { %v998_v2 = vpop.permute.xlu0 %997  ;;  %2171 = vst.msk [vmem:[#allocation2 + $0x78] sm:$0xff] %vm2155_vm1, %v2098_v62  ;;  %603 = vperm.xlu1 %6246, %v372_v61   ;;  %v1296_v18 = vmul.f32 %v6503_v13, %v1003_v1  ;;  %v376_v61 = vld [vmem:[%s6422_s25 + $0x158] sm:$0xff] }
  0xf8   : > { %2170 = vst.msk [vmem:[#allocation2 + $0x70] sm:$0xff] %vm2155_vm1, %v2097_v63  ;;  %598 = vperm.xlu0 %6245, %v371_v0   ;;  %v1295_v19 = vmul.f32 %v6503_v13, %v998_v2  ;;  %v375_v0 = vld [vmem:[%s6422_s25 + $0x150] sm:$0xff] }
  0xf9   : > { %v1368_v30 = vadd.f32 %v1296_v18, %v787_v22 }
  0xfa   : > { %v504_v5 = vpop.permute.xlu1 %503  ;;  %v1367_v31 = vadd.f32 %v1295_v19, %v786_v24 }
  0xfb   : > { %v499_v6 = vpop.permute.xlu0 %498  ;;  %v2241_v7 = vld [vmem:[#allocation2 + $0x60] ss:$2 sm:$0xff]  ;;  %v2313_v8 = vld [vmem:[#allocation2 + $0x61] ss:$2 sm:$0xff]  ;;  %1112 = vperm.xlu1 %6246, %v881_v3   ;;  %v789_v34 = vmul.f32 %v6508_v14, %v504_v5 }
  0xfc   : > { %v2378_v9 = vmax.f32 %v2241_v7, %v2313_v8  ;;  %1107 = vperm.xlu0 %6245, %v880_v4   ;;  %v788_v35 = vmul.f32 %v6508_v14, %v499_v6  ;;  %v885_v3 = vld [vmem:[%s6422_s25 + $0x159] sm:$0xff]  ;;  %v884_v4 = vld [vmem:[%s6422_s25 + $0x151] sm:$0xff] }
  0xfe   : > { %2414 = vst.msk [vmem:[#allocation3 + $0x30] sm:$0xff] %vm2155_vm1, %v2378_v9  ;;  %v1013_v12 = vpop.permute.xlu1 %1012 }
  0xff   : > { %v1008_v15 = vpop.permute.xlu0 %1007  ;;  %v2243_v16 = vld [vmem:[#allocation2 + $0x70] ss:$2 sm:$0xff]  ;;  %v2315_v17 = vld [vmem:[#allocation2 + $0x71] ss:$2 sm:$0xff]  ;;  %1683 = vperm.xlu1 %6246, %v1460_v10   ;;  %v1298_v26 = vmul.f32 %v6503_v13, %v1013_v12 }
 0x100   : > { %v2379_v20 = vmax.f32 %v2243_v16, %v2315_v17  ;;  %1678 = vperm.xlu0 %6245, %v1459_v11   ;;  %v1297_v27 = vmul.f32 %v6503_v13, %v1008_v15  ;;  %v1464_v10 = vld [vmem:[%s6422_s25 + $0x14a] sm:$0xff]  ;;  %v1463_v11 = vld [vmem:[%s6422_s25 + $0x142] sm:$0xff] }
 0x101   : > { %v1370_v42 = vadd.f32 %v1298_v26, %v789_v34 }
 0x102   : > { %2415 = vst.msk [vmem:[#allocation3 + $0x38] sm:$0xff] %vm2155_vm1, %v2379_v20  ;;  %v1584_v28 = vpop.permute.xlu1 %1583  ;;  %v1369_v43 = vadd.f32 %v1297_v27, %v788_v35 }
 0x103   : > { %v1579_v29 = vpop.permute.xlu0 %1578  ;;  %v1877_v32 = vmul.f32 %v6519_v23, %v1584_v28  ;;  %1693 = vperm.xlu1 %6246, %v1462_v21   ;;  %v1466_v21 = vld [vmem:[%s6422_s25 + $0x15a] sm:$0xff] }
 0x104   : > { %v1876_v33 = vmul.f32 %v6519_v23, %v1579_v29  ;;  %1688 = vperm.xlu0 %6245, %v1461_v25   ;;  %v1465_v25 = vld [vmem:[%s6422_s25 + $0x152] sm:$0xff] }
 0x105   : > { %v2451_v37 = vld [vmem:[#allocation3 + $0x30] sm:$0xff]  ;;  %v1949_v39 = vadd.f32 %v1877_v32, %v1368_v30 }
 0x106   : > { %v1948_v40 = vadd.f32 %v1876_v33, %v1367_v31  ;;  %6039 = vmatprep.mubr.msk.f32.mxu0 %vm2155_vm1, %v2451_v37  ;;  %v1594_v44 = vpop.permute.xlu1 %1593 }
 0x107   : > { %v1589_v45 = vpop.permute.xlu0 %1588  ;;  %v2028_v46 = vadd.f32 %v6532_v36, %v1949_v39  ;;  %v1879_v48 = vmul.f32 %v6519_v23, %v1594_v44  ;;  %613 = vperm.xlu1 %6246, %v374_v38   ;;  %v378_v38 = vld [vmem:[%s6422_s25 + $0x168] sm:$0xff] }
 0x108   : > { %v2027_v47 = vadd.f32 %v6532_v36, %v1948_v40  ;;  %v1878_v49 = vmul.f32 %v6519_v23, %v1589_v45  ;;  %608 = vperm.xlu0 %6245, %v373_v41   ;;  %v377_v41 = vld [vmem:[%s6422_s25 + $0x160] sm:$0xff] }
 0x109   : > { %v2452_v50 = vld [vmem:[#allocation3 + $0x38] sm:$0xff]  ;;  %v2100_v52 = vmax.f32 %v2028_v46, 0.0  ;;  %v1951_v54 = vadd.f32 %v1879_v48, %v1370_v42 }
 0x10a   : > { %v2099_v53 = vmax.f32 %v2027_v47, 0.0  ;;  %v1950_v55 = vadd.f32 %v1878_v49, %v1369_v43  ;;  %6040 = vmatmul.mubr.msk.f32.gmra.mxu0 %vm2155_vm1, %v2452_v50  ;;  %v514_v57 = vpop.permute.xlu1 %513 }
 0x10b   : > { %v509_v58 = vpop.permute.xlu0 %508  ;;  %2173 = vst.msk [vmem:[#allocation2 + $0x88] sm:$0xff] %vm2155_vm1, %v2100_v52  ;;  %v2030_v59 = vadd.f32 %v6532_v36, %v1951_v54  ;;  %1122 = vperm.xlu1 %6246, %v883_v51   ;;  %v791_v22 = vmul.f32 %v6508_v14, %v514_v57  ;;  %v887_v51 = vld [vmem:[%s6422_s25 + $0x169] sm:$0xff] }
 0x10c   : > { %2172 = vst.msk [vmem:[#allocation2 + $0x80] sm:$0xff] %vm2155_vm1, %v2099_v53  ;;  %v2029_v60 = vadd.f32 %v6532_v36, %v1950_v55  ;;  %1117 = vperm.xlu0 %6245, %v882_v56   ;;  %v790_v24 = vmul.f32 %v6508_v14, %v509_v58  ;;  %v886_v56 = vld [vmem:[%s6422_s25 + $0x161] sm:$0xff] }
 0x10d   : > { %v2102_v62 = vmax.f32 %v2030_v59, 0.0 }
 0x10e   : > { %v2101_v63 = vmax.f32 %v2029_v60, 0.0  ;;  %v1023_v1 = vpop.permute.xlu1 %1022 }
 0x10f   : > { %v1018_v2 = vpop.permute.xlu0 %1017  ;;  %2175 = vst.msk [vmem:[#allocation2 + $0x98] sm:$0xff] %vm2155_vm1, %v2102_v62  ;;  %623 = vperm.xlu1 %6246, %v376_v61   ;;  %v1300_v18 = vmul.f32 %v6503_v13, %v1023_v1  ;;  %v380_v61 = vld [vmem:[%s6422_s25 + $0x178] sm:$0xff] }
 0x110   : > { %2174 = vst.msk [vmem:[#allocation2 + $0x90] sm:$0xff] %vm2155_vm1, %v2101_v63  ;;  %618 = vperm.xlu0 %6245, %v375_v0   ;;  %v1299_v19 = vmul.f32 %v6503_v13, %v1018_v2  ;;  %v379_v0 = vld [vmem:[%s6422_s25 + $0x170] sm:$0xff] }
 0x111   : > { %v1372_v30 = vadd.f32 %v1300_v18, %v791_v22 }
 0x112   : > { %v524_v5 = vpop.permute.xlu1 %523  ;;  %v1371_v31 = vadd.f32 %v1299_v19, %v790_v24  ;;  %v1469_v24 = vld [vmem:[%s6422_s25 + $0x172] sm:$0xff] }
 0x113   : > { %v519_v6 = vpop.permute.xlu0 %518  ;;  %v2245_v7 = vld [vmem:[#allocation2 + $0x80] ss:$2 sm:$0xff]  ;;  %v2317_v8 = vld [vmem:[#allocation2 + $0x81] ss:$2 sm:$0xff]  ;;  %1132 = vperm.xlu1 %6246, %v885_v3   ;;  %v793_v34 = vmul.f32 %v6508_v14, %v524_v5 }
 0x114   : > { %v2380_v9 = vmax.f32 %v2245_v7, %v2317_v8  ;;  %1127 = vperm.xlu0 %6245, %v884_v4   ;;  %v792_v35 = vmul.f32 %v6508_v14, %v519_v6  ;;  %v889_v3 = vld [vmem:[%s6422_s25 + $0x179] sm:$0xff]  ;;  %v888_v4 = vld [vmem:[%s6422_s25 + $0x171] sm:$0xff] }
 0x116   : > { %2416 = vst.msk [vmem:[#allocation3 + $0x40] sm:$0xff] %vm2155_vm1, %v2380_v9  ;;  %v1033_v12 = vpop.permute.xlu1 %1032 }
 0x117   : > { %v1028_v15 = vpop.permute.xlu0 %1027  ;;  %v2247_v16 = vld [vmem:[#allocation2 + $0x90] ss:$2 sm:$0xff]  ;;  %v2319_v17 = vld [vmem:[#allocation2 + $0x91] ss:$2 sm:$0xff]  ;;  %1703 = vperm.xlu1 %6246, %v1464_v10   ;;  %v1302_v26 = vmul.f32 %v6503_v13, %v1033_v12 }
 0x118   : > { %v2381_v20 = vmax.f32 %v2247_v16, %v2319_v17  ;;  %1698 = vperm.xlu0 %6245, %v1463_v11   ;;  %v1301_v27 = vmul.f32 %v6503_v13, %v1028_v15  ;;  %v1468_v10 = vld [vmem:[%s6422_s25 + $0x16a] sm:$0xff]  ;;  %v1467_v11 = vld [vmem:[%s6422_s25 + $0x162] sm:$0xff] }
 0x119   : > { %v1374_v42 = vadd.f32 %v1302_v26, %v793_v34 }
 0x11a   : > { %2417 = vst.msk [vmem:[#allocation3 + $0x48] sm:$0xff] %vm2155_vm1, %v2381_v20  ;;  %v1604_v28 = vpop.permute.xlu1 %1603  ;;  %v1373_v43 = vadd.f32 %v1301_v27, %v792_v35  ;;  %v382_v35 = vld [vmem:[%s6422_s25 + $0x188] sm:$0xff] }
 0x11b   : > { %v1599_v29 = vpop.permute.xlu0 %1598  ;;  %v1881_v32 = vmul.f32 %v6519_v23, %v1604_v28  ;;  %1713 = vperm.xlu1 %6246, %v1466_v21   ;;  %v1470_v21 = vld [vmem:[%s6422_s25 + $0x17a] sm:$0xff] }
 0x11c   : > { %v1880_v33 = vmul.f32 %v6519_v23, %v1599_v29  ;;  %1708 = vperm.xlu0 %6245, %v1465_v25  }
 0x11d   : > { %v2453_v37 = vld [vmem:[#allocation3 + $0x40] sm:$0xff]  ;;  %v1953_v39 = vadd.f32 %v1881_v32, %v1372_v30 }
 0x11e   : > { %v1952_v40 = vadd.f32 %v1880_v33, %v1371_v31  ;;  %6042 = vmatprep.mubr.msk.f32.mxu0 %vm2155_vm1, %v2453_v37  ;;  %v1614_v44 = vpop.permute.xlu1 %1613  ;;  %v6757_v32 = vld [vmem:[%s8102_s1 + $0x1] ss:$0 sm:$0xff] }
 0x11f   : > { %v1609_v45 = vpop.permute.xlu0 %1608  ;;  %v2032_v46 = vadd.f32 %v6532_v36, %v1953_v39  ;;  %v1883_v48 = vmul.f32 %v6519_v23, %v1614_v44  ;;  %633 = vperm.xlu1 %6246, %v378_v38   ;;  %v381_v39 = vld [vmem:[%s6422_s25 + $0x180] sm:$0xff] }
 0x120   : > { %v2031_v47 = vadd.f32 %v6532_v36, %v1952_v40  ;;  %v1882_v49 = vmul.f32 %v6519_v23, %v1609_v45  ;;  %628 = vperm.xlu0 %6245, %v377_v41   ;;  %v6775_v44 = vld [vmem:[%s8102_s1 + $0x2] ss:$0 sm:$0xff] }
 0x121   : > { %v2454_v50 = vld [vmem:[#allocation3 + $0x48] sm:$0xff]  ;;  %v2104_v52 = vmax.f32 %v2032_v46, 0.0  ;;  %v1955_v54 = vadd.f32 %v1883_v48, %v1374_v42 }
 0x122   : > { %v2103_v53 = vmax.f32 %v2031_v47, 0.0  ;;  %v1954_v55 = vadd.f32 %v1882_v49, %v1373_v43  ;;  %6043 = vmatmul.mubr.msk.f32.gmra.mxu0 %vm2155_vm1, %v2454_v50  ;;  %v534_v57 = vpop.permute.xlu1 %533 }
 0x123   : > { %2177 = vst.msk [vmem:[#allocation2 + $0xa8] sm:$0xff] %vm2155_vm1, %v2104_v52  ;;  %v2034_v58 = vadd.f32 %v6532_v36, %v1955_v54  ;;  %v529_v60 = vpop.permute.xlu0 %528  ;;  %1142 = vperm.xlu1 %6246, %v887_v51   ;;  %v795_v22 = vmul.f32 %v6508_v14, %v534_v57  ;;  %v891_v51 = vld [vmem:[%s6422_s25 + $0x189] sm:$0xff]  ;;  %v890_v54 = vld [vmem:[%s6422_s25 + $0x181] sm:$0xff] }
 0x124   : > { %2176 = vst.msk [vmem:[#allocation2 + $0xa0] sm:$0xff] %vm2155_vm1, %v2103_v53  ;;  %v2033_v59 = vadd.f32 %v6532_v36, %v1954_v55  ;;  %1137 = vperm.xlu0 %6245, %v886_v56   ;;  %v794_v25 = vmul.f32 %v6508_v14, %v529_v60 }
 0x125   : > { %v2106_v62 = vmax.f32 %v2034_v58, 0.0 }
 0x126   : > { %v2105_v63 = vmax.f32 %v2033_v59, 0.0  ;;  %v1043_v1 = vpop.permute.xlu1 %1042 }
 0x127   : > { %2179 = vst.msk [vmem:[#allocation2 + $0xb8] sm:$0xff] %vm2155_vm1, %v2106_v62  ;;  %v1038_v2 = vpop.permute.xlu0 %1037  ;;  %643 = vperm.xlu1 %6246, %v380_v61   ;;  %v1304_v17 = vmul.f32 %v6503_v13, %v1043_v1  ;;  %v384_v61 = vld [vmem:[%s6422_s25 + $0x198] sm:$0xff] }
 0x128   : > { %2178 = vst.msk [vmem:[#allocation2 + $0xb0] sm:$0xff] %vm2155_vm1, %v2105_v63  ;;  %638 = vperm.xlu0 %6245, %v379_v0   ;;  %v1303_v20 = vmul.f32 %v6503_v13, %v1038_v2  ;;  %v383_v63 = vld [vmem:[%s6422_s25 + $0x190] sm:$0xff] }
 0x129   : > { %v1376_v27 = vadd.f32 %v1304_v17, %v795_v22 }
 0x12a   : > { %v544_v5 = vpop.permute.xlu1 %543  ;;  %v1375_v31 = vadd.f32 %v1303_v20, %v794_v25  ;;  %v1474_v20 = vld [vmem:[%s6422_s25 + $0x19a] sm:$0xff] }
 0x12b   : > { %v2249_v6 = vld [vmem:[#allocation2 + $0xa0] ss:$2 sm:$0xff]  ;;  %v2321_v7 = vld [vmem:[#allocation2 + $0xa1] ss:$2 sm:$0xff]  ;;  %v539_v8 = vpop.permute.xlu0 %538  ;;  %1152 = vperm.xlu1 %6246, %v889_v3  }
 0x12c   : > { %v2382_v9 = vmax.f32 %v2249_v6, %v2321_v7  ;;  %1147 = vperm.xlu0 %6245, %v888_v4   ;;  %v893_v3 = vld [vmem:[%s6422_s25 + $0x199] sm:$0xff]  ;;  %v892_v4 = vld [vmem:[%s6422_s25 + $0x191] sm:$0xff] }
 0x12e   : > { %2418 = vst.msk [vmem:[#allocation3 + $0x50] sm:$0xff] %vm2155_vm1, %v2382_v9  ;;  %v1053_v12 = vpop.permute.xlu1 %1052  ;;  %v1472_v9 = vld [vmem:[%s6422_s25 + $0x18a] sm:$0xff] }
 0x12f   : > { %v2251_v15 = vld [vmem:[#allocation2 + $0xb0] ss:$2 sm:$0xff]  ;;  %v2323_v16 = vld [vmem:[#allocation2 + $0xb1] ss:$2 sm:$0xff]  ;;  %v1048_v18 = vpop.permute.xlu0 %1047  ;;  %1723 = vperm.xlu1 %6246, %v1468_v10   ;;  %v1306_v28 = vmul.f32 %v6503_v13, %v1053_v12  ;;  %v6765_v13 = vld [vmem:[%s8102_s1] ss:$0 sm:$0xff] }
 0x130   : > { %v2383_v19 = vmax.f32 %v2251_v15, %v2323_v16  ;;  %1718 = vperm.xlu0 %6245, %v1467_v11   ;;  %v1305_v33 = vmul.f32 %v6757_v32, %v1048_v18  ;;  %v797_v37 = vmul.f32 %v6765_v13, %v544_v5  ;;  %v796_v40 = vmul.f32 %v6765_v13, %v539_v8  ;;  %v1471_v11 = vld [vmem:[%s6422_s25 + $0x182] sm:$0xff] }
 0x132   : > { %2419 = vst.msk [vmem:[#allocation3 + $0x58] sm:$0xff] %vm2155_vm1, %v2383_v19  ;;  %v1624_v26 = vpop.permute.xlu1 %1623  ;;  %v1377_v47 = vadd.f32 %v1305_v33, %v796_v40 }
 0x133   : > { %v1885_v29 = vmul.f32 %v6519_v23, %v1624_v26  ;;  %v1619_v30 = vpop.permute.xlu0 %1618  ;;  %1733 = vperm.xlu1 %6246, %v1470_v21  }
 0x134   : > { %v1884_v34 = vmul.f32 %v6519_v23, %v1619_v30  ;;  %1728 = vperm.xlu0 %6245, %v1469_v24   ;;  %v1378_v23 = vadd.f32 %v1306_v28, %v797_v37  ;;  %v1473_v24 = vld [vmem:[%s6422_s25 + $0x192] sm:$0xff] }
 0x135   : > { %v2455_v14 = vld [vmem:[#allocation3 + $0x50] sm:$0xff]  ;;  %v1957_v38 = vadd.f32 %v1885_v29, %v1376_v27 }
 0x136   : > { %6045 = vmatprep.mubr.msk.f32.mxu0 %vm2155_vm1, %v2455_v14  ;;  %v1956_v41 = vadd.f32 %v1884_v34, %v1375_v31  ;;  %v1634_v42 = vpop.permute.xlu1 %1633  ;;  %v386_v14 = vld [vmem:[%s6422_s25 + $0x1a8] sm:$0xff] }
 0x137   : > { %v2036_v43 = vadd.f32 %v6532_v36, %v1957_v38  ;;  %v1887_v45 = vmul.f32 %v6775_v44, %v1634_v42  ;;  %v1629_v46 = vpop.permute.xlu0 %1628  ;;  %653 = vperm.xlu1 %6246, %v382_v35  }
 0x138   : > { %v2035_v48 = vadd.f32 %v6532_v36, %v1956_v41  ;;  %v1886_v49 = vmul.f32 %v6775_v44, %v1629_v46  ;;  %648 = vperm.xlu0 %6245, %v381_v39   ;;  %v6787_v36 = vld [vmem:[%s8103_s2] ss:$0 sm:$0xff] }
 0x139   : > { %v2456_v50 = vld [vmem:[#allocation3 + $0x58] sm:$0xff]  ;;  %v2108_v52 = vmax.f32 %v2036_v43, 0.0  ;;  %v1959_v53 = vadd.f32 %v1887_v45, %v1378_v23  ;;  %v385_v39 = vld [vmem:[%s6422_s25 + $0x1a0] sm:$0xff] }
 0x13a   : > { %6046 = vmatmul.mubr.msk.f32.gmra.mxu0 %vm2155_vm1, %v2456_v50  ;;  %v2107_v55 = vmax.f32 %v2035_v48, 0.0  ;;  %v1958_v56 = vadd.f32 %v1886_v49, %v1377_v47  ;;  %v554_v57 = vpop.permute.xlu1 %553  ;;  %v895_v50 = vld [vmem:[%s6422_s25 + $0x1a9] sm:$0xff] }
 0x13b   : > { %2181 = vst.msk [vmem:[#allocation2 + $0xc8] sm:$0xff] %vm2155_vm1, %v2108_v52  ;;  %v2038_v58 = vadd.f32 %v6787_v36, %v1959_v53  ;;  %v549_v59 = vpop.permute.xlu0 %548  ;;  %1162 = vperm.xlu1 %6246, %v891_v51   ;;  %v799_v22 = vmul.f32 %v6765_v13, %v554_v57 }
 0x13c   : > { %2180 = vst.msk [vmem:[#allocation2 + $0xc0] sm:$0xff] %vm2155_vm1, %v2107_v55  ;;  %v2037_v60 = vadd.f32 %v6787_v36, %v1958_v56  ;;  %1157 = vperm.xlu0 %6245, %v890_v54   ;;  %v798_v25 = vmul.f32 %v6765_v13, %v549_v59  ;;  %v894_v55 = vld [vmem:[%s6422_s25 + $0x1a1] sm:$0xff] }
 0x13d   : > { %v2110_v62 = vmax.f32 %v2038_v58, 0.0 }
 0x13e   : > { %v2109_v0 = vmax.f32 %v2037_v60, 0.0  ;;  %v1063_v1 = vpop.permute.xlu1 %1062 }
 0x13f   : > { %2183 = vst.msk [vmem:[#allocation2 + $0xd8] sm:$0xff] %vm2155_vm1, %v2110_v62  ;;  %v1058_v2 = vpop.permute.xlu0 %1057  ;;  %663 = vperm.xlu1 %6246, %v384_v61   ;;  %v1308_v15 = vmul.f32 %v6757_v32, %v1063_v1  ;;  %v388_v62 = vld [vmem:[%s6422_s25 + $0x1b8] sm:$0xff] }
 0x140   : > { %2182 = vst.msk [vmem:[#allocation2 + $0xd0] sm:$0xff] %vm2155_vm1, %v2109_v0  ;;  %658 = vperm.xlu0 %6245, %v383_v63   ;;  %v1307_v19 = vmul.f32 %v6757_v32, %v1058_v2  ;;  %v387_v0 = vld [vmem:[%s6422_s25 + $0x1b0] sm:$0xff] }
 0x141   : > { %v1380_v27 = vadd.f32 %v1308_v15, %v799_v22 }
 0x142   : > { %v564_v5 = vpop.permute.xlu1 %563  ;;  %v1379_v31 = vadd.f32 %v1307_v19, %v798_v25  ;;  %v1477_v25 = vld [vmem:[%s6422_s25 + $0x1b2] sm:$0xff] }
 0x143   : > { %v559_v6 = vpop.permute.xlu0 %558  ;;  %1172 = vperm.xlu1 %6246, %v893_v3   ;;  %v2253_v7 = vld [vmem:[#allocation2 + $0xc0] ss:$2 sm:$0xff]  ;;  %v2325_v8 = vld [vmem:[#allocation2 + $0xc1] ss:$2 sm:$0xff]  ;;  %v801_v35 = vmul.f32 %v6765_v13, %v564_v5  ;;  %v896_v5 = vld [vmem:[%s6422_s25 + $0x1b1] sm:$0xff] }
 0x144   : > { %1167 = vperm.xlu0 %6245, %v892_v4   ;;  %v2384_v10 = vmax.f32 %v2253_v7, %v2325_v8  ;;  %v800_v40 = vmul.f32 %v6765_v13, %v559_v6  ;;  %v897_v4 = vld [vmem:[%s6422_s25 + $0x1b9] sm:$0xff] }
 0x146   : > { %v1073_v12 = vpop.permute.xlu1 %1072  ;;  %2420 = vst.msk [vmem:[#allocation3 + $0x60] sm:$0xff] %vm2155_vm1, %v2384_v10  ;;  %v1476_v10 = vld [vmem:[%s6422_s25 + $0x1aa] sm:$0xff] }
 0x147   : > { %v1068_v16 = vpop.permute.xlu0 %1067  ;;  %1743 = vperm.xlu1 %6246, %v1472_v9   ;;  %v2255_v17 = vld [vmem:[#allocation2 + $0xd0] ss:$2 sm:$0xff]  ;;  %v2327_v18 = vld [vmem:[#allocation2 + $0xd1] ss:$2 sm:$0xff]  ;;  %v1310_v28 = vmul.f32 %v6757_v32, %v1073_v12  ;;  %v1475_v12 = vld [vmem:[%s6422_s25 + $0x1a2] sm:$0xff] }
 0x148   : > { %1738 = vperm.xlu0 %6245, %v1471_v11   ;;  %v2385_v21 = vmax.f32 %v2255_v17, %v2327_v18  ;;  %v1309_v33 = vmul.f32 %v6757_v32, %v1068_v16 }
 0x149   : > { %v1382_v23 = vadd.f32 %v1310_v28, %v801_v35  ;;  %v390_v35 = vld [vmem:[%s6422_s25 + $0x1c8] sm:$0xff] }
 0x14a   : > { %v1644_v26 = vpop.permute.xlu1 %1643  ;;  %2421 = vst.msk [vmem:[#allocation3 + $0x68] sm:$0xff] %vm2155_vm1, %v2385_v21  ;;  %v1381_v47 = vadd.f32 %v1309_v33, %v800_v40  ;;  %v1478_v21 = vld [vmem:[%s6422_s25 + $0x1ba] sm:$0xff] }
 0x14b   : > { %v1889_v29 = vmul.f32 %v6775_v44, %v1644_v26  ;;  %v1639_v30 = vpop.permute.xlu0 %1638  ;;  %1753 = vperm.xlu1 %6246, %v1474_v20  }
 0x14c   : > { %v1888_v34 = vmul.f32 %v6775_v44, %v1639_v30  ;;  %1748 = vperm.xlu0 %6245, %v1473_v24  }
 0x14d   : > { %v1961_v37 = vadd.f32 %v1889_v29, %v1380_v27  ;;  %v2457_v38 = vld [vmem:[#allocation3 + $0x60] sm:$0xff] }
 0x14e   : > { %v1960_v41 = vadd.f32 %v1888_v34, %v1379_v31  ;;  %6048 = vmatprep.mubr.msk.f32.mxu0 %vm2155_vm1, %v2457_v38  ;;  %v1654_v42 = vpop.permute.xlu1 %1653 }
 0x14f   : > { %v2040_v43 = vadd.f32 %v6787_v36, %v1961_v37  ;;  %v1891_v45 = vmul.f32 %v6775_v44, %v1654_v42  ;;  %v1649_v46 = vpop.permute.xlu0 %1648  ;;  %673 = vperm.xlu1 %6246, %v386_v14  }
 0x150   : > { %v2039_v48 = vadd.f32 %v6787_v36, %v1960_v41  ;;  %v1890_v49 = vmul.f32 %v6775_v44, %v1649_v46  ;;  %668 = vperm.xlu0 %6245, %v385_v39   ;;  %v389_v41 = vld [vmem:[%s6422_s25 + $0x1c0] sm:$0xff] }
 0x151   : > { %v2112_v51 = vmax.f32 %v2040_v43, 0.0  ;;  %v1963_v52 = vadd.f32 %v1891_v45, %v1382_v23  ;;  %v2458_v53 = vld [vmem:[#allocation3 + $0x68] sm:$0xff] }
 0x152   : > { %v2894_v54 = vld [vmem:[#allocation3 + $0x61] sm:$0xff]  ;;  %v2111_v56 = vmax.f32 %v2039_v48, 0.0  ;;  %v1962_v57 = vadd.f32 %v1890_v49, %v1381_v47  ;;  %6049 = vmatmul.mubr.msk.f32.gmra.mxu0 %vm2155_vm1, %v2458_v53  ;;  %v574_v58 = vpop.permute.xlu1 %573 }
 0x153   : > { %6106 = vmatprep.mubr.msk.f32.mxu1 %vm2155_vm1, %v2894_v54  ;;  %2185 = vst.msk [vmem:[#allocation2 + $0xe8] sm:$0xff] %vm2155_vm1, %v2112_v51  ;;  %v2042_v59 = vadd.f32 %v6787_v36, %v1963_v52  ;;  %v569_v60 = vpop.permute.xlu0 %568  ;;  %1182 = vperm.xlu1 %6246, %v895_v50   ;;  %v803_v24 = vmul.f32 %v6765_v13, %v574_v58  ;;  %v899_v52 = vld [vmem:[%s6422_s25 + $0x1c9] sm:$0xff] }
 0x154   : > { %2184 = vst.msk [vmem:[#allocation2 + $0xe0] sm:$0xff] %vm2155_vm1, %v2111_v56  ;;  %v2041_v61 = vadd.f32 %v6787_v36, %v1962_v57  ;;  %1177 = vperm.xlu0 %6245, %v894_v55   ;;  %v802_v26 = vmul.f32 %v6765_v13, %v569_v60  ;;  %v898_v57 = vld [vmem:[%s6422_s25 + $0x1c1] sm:$0xff] }
 0x155   : > { %v2114_v63 = vmax.f32 %v2042_v59, 0.0 }
 0x156   : > { %v2113_v1 = vmax.f32 %v2041_v61, 0.0  ;;  %v1083_v2 = vpop.permute.xlu1 %1082 }
 0x157   : > { %2187 = vst.msk [vmem:[#allocation2 + $0xf8] sm:$0xff] %vm2155_vm1, %v2114_v63  ;;  %v1078_v3 = vpop.permute.xlu0 %1077  ;;  %683 = vperm.xlu1 %6246, %v388_v62   ;;  %v1312_v16 = vmul.f32 %v6757_v32, %v1083_v2  ;;  %v391_v2 = vld [vmem:[%s6422_s25 + $0x1d0] sm:$0xff] }
 0x158   : > { %2186 = vst.msk [vmem:[#allocation2 + $0xf0] sm:$0xff] %vm2155_vm1, %v2113_v1  ;;  %678 = vperm.xlu0 %6245, %v387_v0   ;;  %v1311_v20 = vmul.f32 %v6757_v32, %v1078_v3  ;;  %v392_v0 = vld [vmem:[%s6422_s25 + $0x1d8] sm:$0xff] }
 0x159   : > { %v1384_v28 = vadd.f32 %v1312_v16, %v803_v24  ;;  %v1479_v16 = vld [vmem:[%s6422_s25 + $0x1c2] sm:$0xff]  ;;  %v1482_v24 = vld [vmem:[%s6422_s25 + $0x1da] sm:$0xff] }
 0x15a   : > { %v584_v6 = vpop.permute.xlu1 %583  ;;  %v1383_v33 = vadd.f32 %v1311_v20, %v802_v26 }
 0x15b   : > { %v579_v7 = vpop.permute.xlu0 %578  ;;  %1192 = vperm.xlu1 %6246, %v897_v4   ;;  %v2257_v8 = vld [vmem:[#allocation2 + $0xe0] ss:$2 sm:$0xff]  ;;  %v2329_v9 = vld [vmem:[#allocation2 + $0xe1] ss:$2 sm:$0xff]  ;;  %v805_v37 = vmul.f32 %v6765_v13, %v584_v6 }
 0x15c   : > { %1187 = vperm.xlu0 %6245, %v896_v5   ;;  %v2386_v11 = vmax.f32 %v2257_v8, %v2329_v9  ;;  %v804_v42 = vmul.f32 %v6765_v13, %v579_v7  ;;  %v901_v6 = vld [vmem:[%s6422_s25 + $0x1d9] sm:$0xff]  ;;  %v900_v7 = vld [vmem:[%s6422_s25 + $0x1d1] sm:$0xff] }
 0x15e   : > { %v1093_v15 = vpop.permute.xlu1 %1092  ;;  %2422 = vst.msk [vmem:[#allocation3 + $0x70] sm:$0xff] %vm2155_vm1, %v2386_v11 }
 0x15f   : > { %v1088_v17 = vpop.permute.xlu0 %1087  ;;  %1763 = vperm.xlu1 %6246, %v1476_v10   ;;  %v2259_v18 = vld [vmem:[#allocation2 + $0xf0] ss:$2 sm:$0xff]  ;;  %v2331_v19 = vld [vmem:[#allocation2 + $0xf1] ss:$2 sm:$0xff]  ;;  %v1314_v29 = vmul.f32 %v6757_v32, %v1093_v15 }
 0x160   : > { %1758 = vperm.xlu0 %6245, %v1475_v12   ;;  %v2387_v22 = vmax.f32 %v2259_v18, %v2331_v19  ;;  %v1313_v34 = vmul.f32 %v6757_v32, %v1088_v17  ;;  %v1480_v12 = vld [vmem:[%s6422_s25 + $0x1ca] sm:$0xff] }
 0x161   : > { %v1386_v45 = vadd.f32 %v1314_v29, %v805_v37 }
 0x162   : > { %v1664_v27 = vpop.permute.xlu1 %1663  ;;  %2423 = vst.msk [vmem:[#allocation3 + $0x78] sm:$0xff] %vm2155_vm1, %v2387_v22  ;;  %v1385_v49 = vadd.f32 %v1313_v34, %v804_v42 }
 0x163   : > { %v1893_v30 = vmul.f32 %v6775_v44, %v1664_v27  ;;  %v1659_v31 = vpop.permute.xlu0 %1658  ;;  %1773 = vperm.xlu1 %6246, %v1478_v21   ;;  %v1481_v27 = vld [vmem:[%s6422_s25 + $0x1d2] sm:$0xff] }
 0x164   : > { %v1892_v14 = vmul.f32 %v6775_v44, %v1659_v31  ;;  %1768 = vperm.xlu0 %6245, %v1477_v25  }
 0x165   : > { %v1965_v38 = vadd.f32 %v1893_v30, %v1384_v28  ;;  %v2459_v39 = vld [vmem:[#allocation3 + $0x70] sm:$0xff] }
 0x166   : > { %v2895_v40 = vld [vmem:[#allocation3 + $0x69] sm:$0xff]  ;;  %v1964_v23 = vadd.f32 %v1892_v14, %v1383_v33  ;;  %6051 = vmatprep.mubr.msk.f32.mxu0 %vm2155_vm1, %v2459_v39  ;;  %v1674_v43 = vpop.permute.xlu1 %1673 }
 0x167   : > { %6107 = vmatmul.mubr.msk.f32.vlgmr.msra.gmra.mxu1 %vm2155_vm1, %v2895_v40  ;;  %v2044_v46 = vadd.f32 %v6787_v36, %v1965_v38  ;;  %v1895_v47 = vmul.f32 %v6775_v44, %v1674_v43  ;;  %v1669_v48 = vpop.permute.xlu0 %1668  ;;  %693 = vperm.xlu1 %6246, %v390_v35   ;;  %v394_v38 = vld [vmem:[%s6422_s25 + $0x1e8] sm:$0xff] }
 0x168   : > { %v2043_v50 = vadd.f32 %v6787_v36, %v1964_v23  ;;  %v1894_v51 = vmul.f32 %v6775_v44, %v1669_v48  ;;  %688 = vperm.xlu0 %6245, %v389_v41   ;;  %v393_v23 = vld [vmem:[%s6422_s25 + $0x1e0] sm:$0xff] }
 0x169   : > { %v2116_v53 = vmax.f32 %v2044_v46, 0.0  ;;  %v1967_v54 = vadd.f32 %v1895_v47, %v1386_v45  ;;  %v2460_v55 = vld [vmem:[#allocation3 + $0x78] sm:$0xff] }
 0x16a   : > { %v2896_v56 = vld [vmem:[#allocation3 + $0x71] sm:$0xff]  ;;  %v2115_v58 = vmax.f32 %v2043_v50, 0.0  ;;  %v1966_v59 = vadd.f32 %v1894_v51, %v1385_v49  ;;  %6052 = vmatmul.mubr.msk.f32.gmra.mxu0 %vm2155_vm1, %v2460_v55  ;;  %v594_v60 = vpop.permute.xlu1 %593 }
 0x16b   : > { %6109 = vmatprep.mubr.msk.f32.mxu1 %vm2155_vm1, %v2896_v56  ;;  %2189 = vst.msk [vmem:[#allocation2 + $0x108] sm:$0xff] %vm2155_vm1, %v2116_v53  ;;  %v2046_v61 = vadd.f32 %v6787_v36, %v1967_v54  ;;  %v589_v62 = vpop.permute.xlu0 %588  ;;  %1202 = vperm.xlu1 %6246, %v899_v52   ;;  %v807_v26 = vmul.f32 %v6765_v13, %v594_v60  ;;  %v903_v54 = vld [vmem:[%s6422_s25 + $0x1e9] sm:$0xff] }
 0x16c   : > { %2188 = vst.msk [vmem:[#allocation2 + $0x100] sm:$0xff] %vm2155_vm1, %v2115_v58  ;;  %v2045_v63 = vadd.f32 %v6787_v36, %v1966_v59  ;;  %1197 = vperm.xlu0 %6245, %v898_v57   ;;  %v806_v28 = vmul.f32 %v6765_v13, %v589_v62  ;;  %v902_v59 = vld [vmem:[%s6422_s25 + $0x1e1] sm:$0xff] }
 0x16d   : > { %v2118_v1 = vmax.f32 %v2046_v61, 0.0 }
 0x16e   : > { %v2117_v3 = vmax.f32 %v2045_v63, 0.0  ;;  %v1103_v4 = vpop.permute.xlu1 %1102 }
 0x16f   : > { %2191 = vst.msk [vmem:[#allocation2 + $0x118] sm:$0xff] %vm2155_vm1, %v2118_v1  ;;  %v1098_v5 = vpop.permute.xlu0 %1097  ;;  %703 = vperm.xlu1 %6246, %v392_v0   ;;  %v1316_v18 = vmul.f32 %v6757_v32, %v1103_v4  ;;  %v395_v4 = vld [vmem:[%s6422_s25 + $0x1f0] sm:$0xff] }
 0x170   : > { %2190 = vst.msk [vmem:[#allocation2 + $0x110] sm:$0xff] %vm2155_vm1, %v2117_v3  ;;  %698 = vperm.xlu0 %6245, %v391_v2   ;;  %v1315_v22 = vmul.f32 %v6757_v32, %v1098_v5  ;;  %v396_v2 = vld [vmem:[%s6422_s25 + $0x1f8] sm:$0xff] }
 0x171   : > { %v1388_v30 = vadd.f32 %v1316_v18, %v807_v26  ;;  %v1483_v18 = vld [vmem:[%s6422_s25 + $0x1e2] sm:$0xff]  ;;  %v1486_v26 = vld [vmem:[%s6422_s25 + $0x1fa] sm:$0xff] }
 0x172   : > { %v604_v8 = vpop.permute.xlu1 %603  ;;  %v1387_v14 = vadd.f32 %v1315_v22, %v806_v28 }
 0x173   : > { %v599_v9 = vpop.permute.xlu0 %598  ;;  %1212 = vperm.xlu1 %6246, %v901_v6   ;;  %v2261_v10 = vld [vmem:[#allocation2 + $0x100] ss:$2 sm:$0xff]  ;;  %v2333_v11 = vld [vmem:[#allocation2 + $0x101] ss:$2 sm:$0xff]  ;;  %v809_v39 = vmul.f32 %v6765_v13, %v604_v8 }
 0x174   : > { %1207 = vperm.xlu0 %6245, %v900_v7   ;;  %v2388_v15 = vmax.f32 %v2261_v10, %v2333_v11  ;;  %v808_v43 = vmul.f32 %v6765_v13, %v599_v9  ;;  %v905_v8 = vld [vmem:[%s6422_s25 + $0x1f9] sm:$0xff]  ;;  %v904_v9 = vld [vmem:[%s6422_s25 + $0x1f1] sm:$0xff] }
 0x176   : > { %v1113_v17 = vpop.permute.xlu1 %1112  ;;  %2424 = vst.msk [vmem:[#allocation3 + $0x80] sm:$0xff] %vm2155_vm1, %v2388_v15 }
 0x177   : > { %v1108_v19 = vpop.permute.xlu0 %1107  ;;  %1783 = vperm.xlu1 %6246, %v1480_v12   ;;  %v2263_v20 = vld [vmem:[#allocation2 + $0x110] ss:$2 sm:$0xff]  ;;  %v2335_v21 = vld [vmem:[#allocation2 + $0x111] ss:$2 sm:$0xff]  ;;  %v1318_v31 = vmul.f32 %v6757_v32, %v1113_v17 }
 0x178   : > { %1778 = vperm.xlu0 %6245, %v1479_v16   ;;  %v2389_v25 = vmax.f32 %v2263_v20, %v2335_v21  ;;  %v1317_v35 = vmul.f32 %v6757_v32, %v1108_v19  ;;  %v1484_v16 = vld [vmem:[%s6422_s25 + $0x1ea] sm:$0xff] }
 0x179   : > { %v1390_v47 = vadd.f32 %v1318_v31, %v809_v39 }
 0x17a   : > { %v1684_v29 = vpop.permute.xlu1 %1683  ;;  %2425 = vst.msk [vmem:[#allocation3 + $0x88] sm:$0xff] %vm2155_vm1, %v2389_v25  ;;  %v1389_v51 = vadd.f32 %v1317_v35, %v808_v43 }
 0x17b   : > { %v1897_v33 = vmul.f32 %v6775_v44, %v1684_v29  ;;  %v1679_v34 = vpop.permute.xlu0 %1678  ;;  %1793 = vperm.xlu1 %6246, %v1482_v24   ;;  %v1485_v29 = vld [vmem:[%s6422_s25 + $0x1f2] sm:$0xff] }
 0x17c   : > { %v1896_v37 = vmul.f32 %v6775_v44, %v1679_v34  ;;  %1788 = vperm.xlu0 %6245, %v1481_v27  }
 0x17d   : > { %v1969_v40 = vadd.f32 %v1897_v33, %v1388_v30  ;;  %v2461_v41 = vld [vmem:[#allocation3 + $0x80] sm:$0xff] }
 0x17e   : > { %v2897_v42 = vld [vmem:[#allocation3 + $0x79] sm:$0xff]  ;;  %v1968_v45 = vadd.f32 %v1896_v37, %v1387_v14  ;;  %6054 = vmatprep.mubr.msk.f32.mxu0 %vm2155_vm1, %v2461_v41  ;;  %v1694_v46 = vpop.permute.xlu1 %1693 }
 0x17f   : > { %6110 = vmatmul.mubr.msk.f32.gmra.mxu1 %vm2155_vm1, %v2897_v42  ;;  %v2048_v48 = vadd.f32 %v6787_v36, %v1969_v40  ;;  %v1899_v49 = vmul.f32 %v6775_v44, %v1694_v46  ;;  %v1689_v50 = vpop.permute.xlu0 %1688  ;;  %713 = vperm.xlu1 %6246, %v394_v38   ;;  %v398_v40 = vld [vmem:[%s6422_s25 + $0x208] sm:$0xff] }
 0x180   : > { %v2047_v52 = vadd.f32 %v6787_v36, %v1968_v45  ;;  %v1898_v53 = vmul.f32 %v6775_v44, %v1689_v50  ;;  %708 = vperm.xlu0 %6245, %v393_v23   ;;  %v397_v45 = vld [vmem:[%s6422_s25 + $0x200] sm:$0xff] }
 0x181   : > { %v2120_v55 = vmax.f32 %v2048_v48, 0.0  ;;  %v1971_v56 = vadd.f32 %v1899_v49, %v1390_v47  ;;  %v2462_v57 = vld [vmem:[#allocation3 + $0x88] sm:$0xff] }
 0x182   : > { %v2898_v58 = vld [vmem:[#allocation3 + $0x81] sm:$0xff]  ;;  %v2119_v60 = vmax.f32 %v2047_v52, 0.0  ;;  %v1970_v61 = vadd.f32 %v1898_v53, %v1389_v51  ;;  %6055 = vmatmul.mubr.msk.f32.gmra.mxu0 %vm2155_vm1, %v2462_v57  ;;  %v614_v62 = vpop.permute.xlu1 %613 }
 0x183   : > { %6112 = vmatprep.mubr.msk.f32.mxu1 %vm2155_vm1, %v2898_v58  ;;  %2193 = vst.msk [vmem:[#allocation2 + $0x128] sm:$0xff] %vm2155_vm1, %v2120_v55  ;;  %v2050_v63 = vadd.f32 %v6787_v36, %v1971_v56  ;;  %v609_v0 = vpop.permute.xlu0 %608  ;;  %1222 = vperm.xlu1 %6246, %v903_v54   ;;  %v811_v28 = vmul.f32 %v6765_v13, %v614_v62  ;;  %v907_v56 = vld [vmem:[%s6422_s25 + $0x209] sm:$0xff] }
 0x184   : > { %2192 = vst.msk [vmem:[#allocation2 + $0x120] sm:$0xff] %vm2155_vm1, %v2119_v60  ;;  %v2049_v1 = vadd.f32 %v6787_v36, %v1970_v61  ;;  %1217 = vperm.xlu0 %6245, %v902_v59   ;;  %v810_v30 = vmul.f32 %v6765_v13, %v609_v0  ;;  %v906_v61 = vld [vmem:[%s6422_s25 + $0x201] sm:$0xff] }
 0x185   : > { %v2122_v3 = vmax.f32 %v2050_v63, 0.0 }
 0x186   : > { %v2121_v5 = vmax.f32 %v2049_v1, 0.0  ;;  %v1123_v6 = vpop.permute.xlu1 %1122 }
 0x187   : > { %2195 = vst.msk [vmem:[#allocation2 + $0x138] sm:$0xff] %vm2155_vm1, %v2122_v3  ;;  %v1118_v7 = vpop.permute.xlu0 %1117  ;;  %723 = vperm.xlu1 %6246, %v396_v2   ;;  %v1320_v20 = vmul.f32 %v6757_v32, %v1123_v6  ;;  %v399_v6 = vld [vmem:[%s6422_s25 + $0x210] sm:$0xff] }
 0x188   : > { %2194 = vst.msk [vmem:[#allocation2 + $0x130] sm:$0xff] %vm2155_vm1, %v2121_v5  ;;  %718 = vperm.xlu0 %6245, %v395_v4   ;;  %v1319_v25 = vmul.f32 %v6757_v32, %v1118_v7  ;;  %v400_v4 = vld [vmem:[%s6422_s25 + $0x218] sm:$0xff] }
 0x189   : > { %v1392_v33 = vadd.f32 %v1320_v20, %v811_v28  ;;  %v1487_v20 = vld [vmem:[%s6422_s25 + $0x202] sm:$0xff]  ;;  %v1490_v28 = vld [vmem:[%s6422_s25 + $0x21a] sm:$0xff] }
 0x18a   : > { %v624_v10 = vpop.permute.xlu1 %623  ;;  %v1391_v37 = vadd.f32 %v1319_v25, %v810_v30 }
 0x18b   : > { %v619_v11 = vpop.permute.xlu0 %618  ;;  %1232 = vperm.xlu1 %6246, %v905_v8   ;;  %v2265_v12 = vld [vmem:[#allocation2 + $0x120] ss:$2 sm:$0xff]  ;;  %v2337_v15 = vld [vmem:[#allocation2 + $0x121] ss:$2 sm:$0xff]  ;;  %v813_v41 = vmul.f32 %v6765_v13, %v624_v10 }
 0x18c   : > { %1227 = vperm.xlu0 %6245, %v904_v9   ;;  %v2390_v17 = vmax.f32 %v2265_v12, %v2337_v15  ;;  %v812_v46 = vmul.f32 %v6765_v13, %v619_v11  ;;  %v909_v10 = vld [vmem:[%s6422_s25 + $0x219] sm:$0xff]  ;;  %v908_v11 = vld [vmem:[%s6422_s25 + $0x211] sm:$0xff] }
 0x18e   : > { %v1133_v19 = vpop.permute.xlu1 %1132  ;;  %2426 = vst.msk [vmem:[#allocation3 + $0x90] sm:$0xff] %vm2155_vm1, %v2390_v17 }
 0x18f   : > { %v1128_v21 = vpop.permute.xlu0 %1127  ;;  %1803 = vperm.xlu1 %6246, %v1484_v16   ;;  %v2267_v22 = vld [vmem:[#allocation2 + $0x130] ss:$2 sm:$0xff]  ;;  %v2339_v24 = vld [vmem:[#allocation2 + $0x131] ss:$2 sm:$0xff]  ;;  %v1322_v34 = vmul.f32 %v6757_v32, %v1133_v19 }
 0x190   : > { %1798 = vperm.xlu0 %6245, %v1483_v18   ;;  %v2391_v27 = vmax.f32 %v2267_v22, %v2339_v24  ;;  %v1321_v38 = vmul.f32 %v6757_v32, %v1128_v21  ;;  %v1488_v18 = vld [vmem:[%s6422_s25 + $0x20a] sm:$0xff] }
 0x191   : > { %v1394_v49 = vadd.f32 %v1322_v34, %v813_v41 }
 0x192   : > { %v1704_v31 = vpop.permute.xlu1 %1703  ;;  %2427 = vst.msk [vmem:[#allocation3 + $0x98] sm:$0xff] %vm2155_vm1, %v2391_v27  ;;  %v1393_v53 = vadd.f32 %v1321_v38, %v812_v46 }
 0x193   : > { %v1901_v14 = vmul.f32 %v6775_v44, %v1704_v31  ;;  %v1699_v35 = vpop.permute.xlu0 %1698  ;;  %1813 = vperm.xlu1 %6246, %v1486_v26   ;;  %v1489_v31 = vld [vmem:[%s6422_s25 + $0x212] sm:$0xff] }
 0x194   : > { %v1900_v39 = vmul.f32 %v6775_v44, %v1699_v35  ;;  %1808 = vperm.xlu0 %6245, %v1485_v29  }
 0x195   : > { %v1973_v42 = vadd.f32 %v1901_v14, %v1392_v33  ;;  %v2463_v23 = vld [vmem:[#allocation3 + $0x90] sm:$0xff] }
 0x196   : > { %v2899_v43 = vld [vmem:[#allocation3 + $0x89] sm:$0xff]  ;;  %v1972_v47 = vadd.f32 %v1900_v39, %v1391_v37  ;;  %6057 = vmatprep.mubr.msk.f32.mxu0 %vm2155_vm1, %v2463_v23  ;;  %v1714_v48 = vpop.permute.xlu1 %1713 }
 0x197   : > { %6113 = vmatmul.mubr.msk.f32.gmra.mxu1 %vm2155_vm1, %v2899_v43  ;;  %v2052_v50 = vadd.f32 %v6787_v36, %v1973_v42  ;;  %v1903_v51 = vmul.f32 %v6775_v44, %v1714_v48  ;;  %v1709_v52 = vpop.permute.xlu0 %1708  ;;  %733 = vperm.xlu1 %6246, %v398_v40   ;;  %v402_v42 = vld [vmem:[%s6422_s25 + $0x228] sm:$0xff] }
 0x198   : > { %v2051_v54 = vadd.f32 %v6787_v36, %v1972_v47  ;;  %v1902_v55 = vmul.f32 %v6775_v44, %v1709_v52  ;;  %728 = vperm.xlu0 %6245, %v397_v45   ;;  %v401_v47 = vld [vmem:[%s6422_s25 + $0x220] sm:$0xff] }
 0x199   : > { %v2124_v57 = vmax.f32 %v2052_v50, 0.0  ;;  %v1975_v58 = vadd.f32 %v1903_v51, %v1394_v49  ;;  %v2464_v59 = vld [vmem:[#allocation3 + $0x98] sm:$0xff] }
 0x19a   : > { %v2900_v60 = vld [vmem:[#allocation3 + $0x91] sm:$0xff]  ;;  %v2123_v62 = vmax.f32 %v2051_v54, 0.0  ;;  %v1974_v63 = vadd.f32 %v1902_v55, %v1393_v53  ;;  %6058 = vmatmul.mubr.msk.f32.gmra.mxu0 %vm2155_vm1, %v2464_v59  ;;  %v634_v0 = vpop.permute.xlu1 %633 }
 0x19b   : > { %6115 = vmatprep.mubr.msk.f32.mxu1 %vm2155_vm1, %v2900_v60  ;;  %2197 = vst.msk [vmem:[#allocation2 + $0x148] sm:$0xff] %vm2155_vm1, %v2124_v57  ;;  %v2054_v1 = vadd.f32 %v6787_v36, %v1975_v58  ;;  %v629_v2 = vpop.permute.xlu0 %628  ;;  %1242 = vperm.xlu1 %6246, %v907_v56   ;;  %v815_v30 = vmul.f32 %v6765_v13, %v634_v0  ;;  %v911_v58 = vld [vmem:[%s6422_s25 + $0x229] sm:$0xff] }
 0x19c   : > { %2196 = vst.msk [vmem:[#allocation2 + $0x140] sm:$0xff] %vm2155_vm1, %v2123_v62  ;;  %v2053_v3 = vadd.f32 %v6787_v36, %v1974_v63  ;;  %1237 = vperm.xlu0 %6245, %v906_v61   ;;  %v814_v33 = vmul.f32 %v6765_v13, %v629_v2  ;;  %v910_v63 = vld [vmem:[%s6422_s25 + $0x221] sm:$0xff] }
 0x19d   : > { %v2126_v5 = vmax.f32 %v2054_v1, 0.0 }
 0x19e   : > { %v2125_v7 = vmax.f32 %v2053_v3, 0.0  ;;  %v1143_v8 = vpop.permute.xlu1 %1142 }
 0x19f   : > { %2199 = vst.msk [vmem:[#allocation2 + $0x158] sm:$0xff] %vm2155_vm1, %v2126_v5  ;;  %v1138_v9 = vpop.permute.xlu0 %1137  ;;  %743 = vperm.xlu1 %6246, %v400_v4   ;;  %v1324_v22 = vmul.f32 %v6757_v32, %v1143_v8  ;;  %v403_v8 = vld [vmem:[%s6422_s25 + $0x230] sm:$0xff] }
 0x1a0   : > { %2198 = vst.msk [vmem:[#allocation2 + $0x150] sm:$0xff] %vm2155_vm1, %v2125_v7  ;;  %738 = vperm.xlu0 %6245, %v399_v6   ;;  %v1323_v27 = vmul.f32 %v6757_v32, %v1138_v9  ;;  %v404_v6 = vld [vmem:[%s6422_s25 + $0x238] sm:$0x3f] }
 0x1a1   : > { %v1396_v14 = vadd.f32 %v1324_v22, %v815_v30  ;;  %v1491_v22 = vld [vmem:[%s6422_s25 + $0x222] sm:$0xff]  ;;  %v1494_v30 = vld [vmem:[%s6422_s25 + $0x23a] sm:$0x3f] }
 0x1a2   : > { %v644_v12 = vpop.permute.xlu1 %643  ;;  %v1395_v39 = vadd.f32 %v1323_v27, %v814_v33 }
 0x1a3   : > { %v639_v15 = vpop.permute.xlu0 %638  ;;  %1252 = vperm.xlu1 %6246, %v909_v10   ;;  %v2269_v16 = vld [vmem:[#allocation2 + $0x140] ss:$2 sm:$0xff]  ;;  %v2341_v17 = vld [vmem:[#allocation2 + $0x141] ss:$2 sm:$0xff]  ;;  %v817_v23 = vmul.f32 %v6765_v13, %v644_v12  ;;  %v913_v12 = vld [vmem:[%s6422_s25 + $0x239] sm:$0x3f] }
 0x1a4   : > { %1247 = vperm.xlu0 %6245, %v908_v11   ;;  %v2392_v19 = vmax.f32 %v2269_v16, %v2341_v17  ;;  %v816_v48 = vmul.f32 %v6765_v13, %v639_v15  ;;  %v912_v15 = vld [vmem:[%s6422_s25 + $0x231] sm:$0xff] }
 0x1a6   : > { %v1153_v21 = vpop.permute.xlu1 %1152  ;;  %2428 = vst.msk [vmem:[#allocation3 + $0xa0] sm:$0xff] %vm2155_vm1, %v2392_v19 }
 0x1a7   : > { %v1148_v24 = vpop.permute.xlu0 %1147  ;;  %1823 = vperm.xlu1 %6246, %v1488_v18   ;;  %v2271_v25 = vld [vmem:[#allocation2 + $0x150] ss:$2 sm:$0xff]  ;;  %v2343_v26 = vld [vmem:[#allocation2 + $0x151] ss:$2 sm:$0xff]  ;;  %v1326_v35 = vmul.f32 %v6757_v32, %v1153_v21 }
 0x1a8   : > { %1818 = vperm.xlu0 %6245, %v1487_v20   ;;  %v2393_v29 = vmax.f32 %v2271_v25, %v2343_v26  ;;  %v1325_v40 = vmul.f32 %v6757_v32, %v1148_v24  ;;  %v1492_v20 = vld [vmem:[%s6422_s25 + $0x22a] sm:$0xff] }
 0x1a9   : > { %v1398_v51 = vadd.f32 %v1326_v35, %v817_v23 }
 0x1aa   : > { %v1724_v34 = vpop.permute.xlu1 %1723  ;;  %2429 = vst.msk [vmem:[#allocation3 + $0xa8] sm:$0xff] %vm2155_vm1, %v2393_v29  ;;  %v1397_v55 = vadd.f32 %v1325_v40, %v816_v48 }
 0x1ab   : > { %v1905_v37 = vmul.f32 %v6775_v44, %v1724_v34  ;;  %v1719_v38 = vpop.permute.xlu0 %1718  ;;  %1833 = vperm.xlu1 %6246, %v1490_v28   ;;  %v1493_v34 = vld [vmem:[%s6422_s25 + $0x232] sm:$0xff]  ;;  %s5909_s25 = sshll.u32 %s6391_s13, 7  ;;  %s6259_s13 = sshll.u32 %s6319_s26, 4  ;;  %s6260_s13 = int_to_ptr.vmem [resolvable:$false] %s6259_s13 }
 0x1ac   : > { %v1904_v41 = vmul.f32 %v6775_v44, %v1719_v38  ;;  %1828 = vperm.xlu0 %6245, %v1489_v31   ;;  %s8066_s17 = scalar_lea.hbm %s8110_s9, %s5909_s25  ;;  %s6261_s24 = scalar_lea.vmem %s6260_s13, 256 }
 0x1ad   : > { %v1977_v43 = vadd.f32 %v1905_v37, %v1396_v14  ;;  %v2465_v45 = vld [vmem:[#allocation3 + $0xa0] sm:$0xff]  ;;  %p6262_p0 = scmp.lt.s32.totalorder %s5554_s29, %s6260_s13  ;;  %p6263_p1 = scmp.lt.s32.totalorder %s6261_s24, %s6255_s22 }
 0x1ae   : > { %v2901_v46 = vld [vmem:[#allocation3 + $0x99] sm:$0xff]  ;;  %v1976_v49 = vadd.f32 %v1904_v41, %v1395_v39  ;;  %6060 = vmatprep.mubr.msk.f32.mxu0 %vm2155_vm1, %v2465_v45  ;;  %v1734_v50 = vpop.permute.xlu1 %1733 }
 0x1af   : > { %6116 = vmatmul.mubr.msk.f32.gmra.mxu1 %vm2155_vm1, %v2901_v46  ;;  %v2056_v52 = vadd.f32 %v6787_v36, %v1977_v43  ;;  %v1907_v53 = vmul.f32 %v6775_v44, %v1734_v50  ;;  %v1729_v54 = vpop.permute.xlu0 %1728  ;;  %753 = vperm.xlu1 %6246, %v402_v42   ;;  %p6264_p2 = por %p6263_p1, %p6262_p0 }
 0x1b0   : > { %v2055_v56 = vadd.f32 %v6787_v36, %v1976_v49  ;;  %v1906_v57 = vmul.f32 %v6775_v44, %v1729_v54  ;;  %748 = vperm.xlu0 %6245, %v401_v47  }
 0x1b1   : > { %v2128_v59 = vmax.f32 %v2056_v52, 0.0  ;;  %v1979_v60 = vadd.f32 %v1907_v53, %v1398_v51  ;;  %v2466_v61 = vld [vmem:[#allocation3 + $0xa8] sm:$0xff]  ;;  %p6265_p3 = pnand %p6264_p2, %p6258_p13 }
 0x1b2   : > { %v2902_v62 = vld [vmem:[#allocation3 + $0xa1] sm:$0xff]  ;;  %v2127_v0 = vmax.f32 %v2055_v56, 0.0  ;;  %v1978_v1 = vadd.f32 %v1906_v57, %v1397_v55  ;;  %6061 = vmatmul.mubr.msk.f32.gmra.mxu0 %vm2155_vm1, %v2466_v61  ;;  %v654_v2 = vpop.permute.xlu1 %653 }
 0x1b3   : > { %6118 = vmatprep.mubr.msk.f32.mxu1 %vm2155_vm1, %v2902_v62  ;;  %2201 = vst.msk [vmem:[#allocation2 + $0x168] sm:$0xff] %vm2155_vm1, %v2128_v59  ;;  %v2058_v3 = vadd.f32 %v6787_v36, %v1979_v60  ;;  %v649_v4 = vpop.permute.xlu0 %648  ;;  %1262 = vperm.xlu1 %6246, %v911_v58   ;;  %v819_v33 = vmul.f32 %v6765_v13, %v654_v2 }
 0x1b4   : > { %2200 = vst.msk [vmem:[#allocation2 + $0x160] sm:$0xff] %vm2155_vm1, %v2127_v0  ;;  %v2057_v5 = vadd.f32 %v6787_v36, %v1978_v1  ;;  %1257 = vperm.xlu0 %6245, %v910_v63   ;;  %v818_v14 = vmul.f32 %v6765_v13, %v649_v4 }
 0x1b5   : > { %v2130_v7 = vmax.f32 %v2058_v3, 0.0 }
 0x1b6   : > { %v2129_v9 = vmax.f32 %v2057_v5, 0.0  ;;  %v1163_v10 = vpop.permute.xlu1 %1162 }
 0x1b7   : > { %2203 = vst.msk [vmem:[#allocation2 + $0x178] sm:$0xff] %vm2155_vm1, %v2130_v7  ;;  %v1158_v11 = vpop.permute.xlu0 %1157  ;;  %763 = vperm.xlu1 %6246, %v404_v6   ;;  %v1328_v25 = vmul.f32 %v6757_v32, %v1163_v10 }
 0x1b8   : > { %2202 = vst.msk [vmem:[#allocation2 + $0x170] sm:$0xff] %vm2155_vm1, %v2129_v9  ;;  %758 = vperm.xlu0 %6245, %v403_v8   ;;  %v1327_v29 = vmul.f32 %v6757_v32, %v1158_v11 }
 0x1b9   : > { %v1400_v37 = vadd.f32 %v1328_v25, %v819_v33 }
 0x1ba   : > { %v664_v16 = vpop.permute.xlu1 %663  ;;  %v1399_v41 = vadd.f32 %v1327_v29, %v818_v14 }
 0x1bb   : > { %v659_v17 = vpop.permute.xlu0 %658  ;;  %1272 = vperm.xlu1 %6246, %v913_v12   ;;  %v2273_v18 = vld [vmem:[#allocation2 + $0x160] ss:$2 sm:$0xff]  ;;  %v2345_v19 = vld [vmem:[#allocation2 + $0x161] ss:$2 sm:$0xff]  ;;  %v821_v43 = vmul.f32 %v6765_v13, %v664_v16 }
 0x1bc   : > { %1267 = vperm.xlu0 %6245, %v912_v15   ;;  %v2394_v21 = vmax.f32 %v2273_v18, %v2345_v19  ;;  %v820_v48 = vmul.f32 %v6765_v13, %v659_v17  ;;  %v7028_v19 = vld [vmem:[%s8102_s1] ss:$0 sm:$0xff] }
 0x1be   : > { %v1173_v24 = vpop.permute.xlu1 %1172  ;;  %2430 = vst.msk [vmem:[#allocation3 + $0xb0] sm:$0xff] %vm2155_vm1, %v2394_v21 }
 0x1bf   : > { %v1168_v26 = vpop.permute.xlu0 %1167  ;;  %1843 = vperm.xlu1 %6246, %v1492_v20   ;;  %v2275_v27 = vld [vmem:[#allocation2 + $0x170] ss:$2 sm:$0xff]  ;;  %v2347_v28 = vld [vmem:[#allocation2 + $0x171] ss:$2 sm:$0xff]  ;;  %v1330_v38 = vmul.f32 %v6757_v32, %v1173_v24 }
 0x1c0   : > { %1838 = vperm.xlu0 %6245, %v1491_v22   ;;  %v2395_v31 = vmax.f32 %v2275_v27, %v2347_v28  ;;  %v1329_v42 = vmul.f32 %v6757_v32, %v1168_v26  ;;  %v7037_v26 = vld [vmem:[%s8102_s1 + $0x2] ss:$0 sm:$0xff] }
 0x1c1   : > { %v1402_v51 = vadd.f32 %v1330_v38, %v821_v43 }
 0x1c2   : > { %v1744_v35 = vpop.permute.xlu1 %1743  ;;  %2431 = vst.msk [vmem:[#allocation3 + $0xb8] sm:$0xff] %vm2155_vm1, %v2395_v31  ;;  %v1401_v54 = vadd.f32 %v1329_v42, %v820_v48  ;;  %v7054_v42 = vld [vmem:[%s8103_s2] ss:$0 sm:$0xff] }
 0x1c3   : > { %v1909_v39 = vmul.f32 %v6775_v44, %v1744_v35  ;;  %v1739_v40 = vpop.permute.xlu0 %1738  ;;  %1853 = vperm.xlu1 %6246, %v1494_v30  }
 0x1c4   : > { %v1908_v23 = vmul.f32 %v6775_v44, %v1739_v40  ;;  %1848 = vperm.xlu0 %6245, %v1493_v34  }
 0x1c5   : > { %v1981_v45 = vadd.f32 %v1909_v39, %v1400_v37  ;;  %v2467_v46 = vld [vmem:[#allocation3 + $0xb0] sm:$0xff]  ;;  %v7046_v37 = vld [vmem:[%s8104_s3 + $0x28] sm:$0x7f] }
 0x1c6   : > { %v2903_v47 = vld [vmem:[#allocation3 + $0xa9] sm:$0xff]  ;;  %v1980_v49 = vadd.f32 %v1908_v23, %v1399_v41  ;;  %6063 = vmatprep.mubr.msk.f32.mxu0 %vm2155_vm1, %v2467_v46  ;;  %v1754_v50 = vpop.permute.xlu1 %1753  ;;  %6142 = vmatprep.subr.msk.mxu0 %vm2591_vm0, %v7046_v37 }
 0x1c7   : > { %6119 = vmatmul.mubr.msk.f32.gmra.mxu1 %vm2155_vm1, %v2903_v47  ;;  %v2060_v52 = vadd.f32 %v6787_v36, %v1981_v45  ;;  %v1911_v32 = vmul.f32 %v6775_v44, %v1754_v50  ;;  %v1749_v53 = vpop.permute.xlu0 %1748 }
 0x1c8   : > { %v2059_v55 = vadd.f32 %v6787_v36, %v1980_v49  ;;  %v1910_v56 = vmul.f32 %v6775_v44, %v1749_v53 }
 0x1c9   : > { %v2132_v57 = vmax.f32 %v2060_v52, 0.0  ;;  %v1983_v58 = vadd.f32 %v1911_v32, %v1402_v51  ;;  %v2468_v13 = vld [vmem:[#allocation3 + $0xb8] sm:$0xff] }
 0x1ca   : > { %v2904_v59 = vld [vmem:[#allocation3 + $0xb1] sm:$0xff]  ;;  %v2131_v60 = vmax.f32 %v2059_v55, 0.0  ;;  %v1982_v61 = vadd.f32 %v1910_v56, %v1401_v54  ;;  %6064 = vmatmul.mubr.msk.f32.gmra.mxu0 %vm2155_vm1, %v2468_v13  ;;  %v674_v62 = vpop.permute.xlu1 %673 }
 0x1cb   : > { %6121 = vmatprep.mubr.msk.f32.mxu1 %vm2155_vm1, %v2904_v59  ;;  %2205 = vst.msk [vmem:[#allocation2 + $0x188] sm:$0xff] %vm2155_vm1, %v2132_v57  ;;  %v2062_v63 = vadd.f32 %v6787_v36, %v1983_v58  ;;  %v669_v0 = vpop.permute.xlu0 %668  ;;  %v823_v20 = vmul.f32 %v7028_v19, %v674_v62 }
 0x1cc   : > { %2204 = vst.msk [vmem:[#allocation2 + $0x180] sm:$0xff] %vm2155_vm1, %v2131_v60  ;;  %v2061_v44 = vadd.f32 %v6787_v36, %v1982_v61  ;;  %v7021_v36 = vld [vmem:[%s8102_s1 + $0x1] ss:$0 sm:$0xff]  ;;  %v822_v21 = vmul.f32 %v7028_v19, %v669_v0 }
 0x1cd   : > { %v2134_v1 = vmax.f32 %v2062_v63, 0.0 }
 0x1ce   : > { %v2133_v2 = vmax.f32 %v2061_v44, 0.0  ;;  %v1183_v3 = vpop.permute.xlu1 %1182 }
 0x1cf   : > { %2207 = vst.msk [vmem:[#allocation2 + $0x198] sm:$0xff] %vm2155_vm1, %v2134_v1  ;;  %v1178_v4 = vpop.permute.xlu0 %1177  ;;  %v1332_v11 = vmul.f32 %v7021_v36, %v1183_v3 }
 0x1d0   : > { %2206 = vst.msk [vmem:[#allocation2 + $0x190] sm:$0xff] %vm2155_vm1, %v2133_v2  ;;  %v1331_v17 = vmul.f32 %v7021_v36, %v1178_v4 }
 0x1d1   : > { %v1404_v24 = vadd.f32 %v1332_v11, %v823_v20 }
 0x1d2   : > { %v684_v5 = vpop.permute.xlu1 %683  ;;  %v1403_v29 = vadd.f32 %v1331_v17, %v822_v21 }
 0x1d3   : > { %v679_v6 = vpop.permute.xlu0 %678  ;;  %v2277_v7 = vld [vmem:[#allocation2 + $0x180] ss:$2 sm:$0xff]  ;;  %v2349_v8 = vld [vmem:[#allocation2 + $0x181] ss:$2 sm:$0xff]  ;;  %v825_v33 = vmul.f32 %v7028_v19, %v684_v5 }
 0x1d4   : > { %v2396_v9 = vmax.f32 %v2277_v7, %v2349_v8  ;;  %v824_v38 = vmul.f32 %v7028_v19, %v679_v6 }
 0x1d6   : > { %v1193_v10 = vpop.permute.xlu1 %1192  ;;  %2432 = vst.msk [vmem:[#allocation3 + $0xc0] sm:$0xff] %vm2155_vm1, %v2396_v9 }
 0x1d7   : > { %v1188_v12 = vpop.permute.xlu0 %1187  ;;  %v2279_v15 = vld [vmem:[#allocation2 + $0x190] ss:$2 sm:$0xff]  ;;  %v2351_v16 = vld [vmem:[#allocation2 + $0x191] ss:$2 sm:$0xff]  ;;  %v1334_v25 = vmul.f32 %v7021_v36, %v1193_v10 }
 0x1d8   : > { %v2397_v18 = vmax.f32 %v2279_v15, %v2351_v16  ;;  %v1333_v30 = vmul.f32 %v7021_v36, %v1188_v12 }
 0x1d9   : > { %v1406_v41 = vadd.f32 %v1334_v25, %v825_v33 }
 0x1da   : > { %v1764_v22 = vpop.permute.xlu1 %1763  ;;  %2433 = vst.msk [vmem:[#allocation3 + $0xc8] sm:$0xff] %vm2155_vm1, %v2397_v18  ;;  %v1405_v46 = vadd.f32 %v1333_v30, %v824_v38 }
 0x1db   : > { %v1913_v27 = vmul.f32 %v7037_v26, %v1764_v22  ;;  %v1759_v28 = vpop.permute.xlu0 %1758 }
 0x1dc   : > { %v1912_v31 = vmul.f32 %v7037_v26, %v1759_v28 }
 0x1dd   : > { %v1985_v34 = vadd.f32 %v1913_v27, %v1404_v24  ;;  %v2469_v14 = vld [vmem:[#allocation3 + $0xc0] sm:$0xff] }
 0x1de   : > { %v2905_v35 = vld [vmem:[#allocation3 + $0xb9] sm:$0xff]  ;;  %v1984_v39 = vadd.f32 %v1912_v31, %v1403_v29  ;;  %6066 = vmatprep.mubr.msk.f32.mxu0 %vm2155_vm1, %v2469_v14  ;;  %v1774_v40 = vpop.permute.xlu1 %1773 }
 0x1df   : > { %6122 = vmatmul.mubr.msk.f32.gmra.mxu1 %vm2155_vm1, %v2905_v35  ;;  %v2064_v23 = vadd.f32 %v7054_v42, %v1985_v34  ;;  %v1915_v43 = vmul.f32 %v7037_v26, %v1774_v40  ;;  %v1769_v45 = vpop.permute.xlu0 %1768 }
 0x1e0   : > { %v2063_v47 = vadd.f32 %v7054_v42, %v1984_v39  ;;  %v1914_v48 = vmul.f32 %v7037_v26, %v1769_v45 }
 0x1e1   : > { %v2136_v49 = vmax.f32 %v2064_v23, 0.0  ;;  %v1987_v50 = vadd.f32 %v1915_v43, %v1406_v41  ;;  %v2470_v51 = vld [vmem:[#allocation3 + $0xc8] sm:$0xff] }
 0x1e2   : > { %v2906_v52 = vld [vmem:[#allocation3 + $0xc1] sm:$0xff]  ;;  %v2135_v32 = vmax.f32 %v2063_v47, 0.0  ;;  %v1986_v53 = vadd.f32 %v1914_v48, %v1405_v46  ;;  %6067 = vmatmul.mubr.msk.f32.gmra.mxu0 %vm2155_vm1, %v2470_v51  ;;  %v694_v54 = vpop.permute.xlu1 %693 }
 0x1e3   : > { %6124 = vmatprep.mubr.msk.f32.mxu1 %vm2155_vm1, %v2906_v52  ;;  %2209 = vst.msk [vmem:[#allocation2 + $0x1a8] sm:$0xff] %vm2155_vm1, %v2136_v49  ;;  %v2066_v55 = vadd.f32 %v7054_v42, %v1987_v50  ;;  %v689_v56 = vpop.permute.xlu0 %688  ;;  %v827_v8 = vmul.f32 %v7028_v19, %v694_v54 }
 0x1e4   : > { %2208 = vst.msk [vmem:[#allocation2 + $0x1a0] sm:$0xff] %vm2155_vm1, %v2135_v32  ;;  %v2065_v57 = vadd.f32 %v7054_v42, %v1986_v53  ;;  %v826_v9 = vmul.f32 %v7028_v19, %v689_v56 }
 0x1e5   : > { %v2138_v58 = vmax.f32 %v2066_v55, 0.0 }
 0x1e6   : > { %v2137_v13 = vmax.f32 %v2065_v57, 0.0  ;;  %v1203_v59 = vpop.permute.xlu1 %1202 }
 0x1e7   : > { %2211 = vst.msk [vmem:[#allocation2 + $0x1b8] sm:$0xff] %vm2155_vm1, %v2138_v58  ;;  %v1198_v60 = vpop.permute.xlu0 %1197  ;;  %v1336_v2 = vmul.f32 %v7021_v36, %v1203_v59 }
 0x1e8   : > { %2210 = vst.msk [vmem:[#allocation2 + $0x1b0] sm:$0xff] %vm2155_vm1, %v2137_v13  ;;  %v1335_v6 = vmul.f32 %v7021_v36, %v1198_v60 }
 0x1e9   : > { %v1408_v11 = vadd.f32 %v1336_v2, %v827_v8 }
 0x1ea   : > { %v704_v61 = vpop.permute.xlu1 %703  ;;  %v1407_v17 = vadd.f32 %v1335_v6, %v826_v9 }
 0x1eb   : > { %v699_v62 = vpop.permute.xlu0 %698  ;;  %v2281_v63 = vld [vmem:[#allocation2 + $0x1a0] ss:$2 sm:$0xff]  ;;  %v2353_v0 = vld [vmem:[#allocation2 + $0x1a1] ss:$2 sm:$0xff]  ;;  %v829_v21 = vmul.f32 %v7028_v19, %v704_v61 }
 0x1ec   : > { %v2398_v44 = vmax.f32 %v2281_v63, %v2353_v0  ;;  %v828_v27 = vmul.f32 %v7028_v19, %v699_v62 }
 0x1ee   : > { %v1213_v1 = vpop.permute.xlu1 %1212  ;;  %2434 = vst.msk [vmem:[#allocation3 + $0xd0] sm:$0xff] %vm2155_vm1, %v2398_v44 }
 0x1ef   : > { %v1208_v3 = vpop.permute.xlu0 %1207  ;;  %v2283_v4 = vld [vmem:[#allocation2 + $0x1b0] ss:$2 sm:$0xff]  ;;  %v2355_v5 = vld [vmem:[#allocation2 + $0x1b1] ss:$2 sm:$0xff]  ;;  %v1338_v12 = vmul.f32 %v7021_v36, %v1213_v1 }
 0x1f0   : > { %v2399_v7 = vmax.f32 %v2283_v4, %v2355_v5  ;;  %v1337_v18 = vmul.f32 %v7021_v36, %v1208_v3 }
 0x1f1   : > { %v1410_v30 = vadd.f32 %v1338_v12, %v829_v21 }
 0x1f2   : > { %v1784_v10 = vpop.permute.xlu1 %1783  ;;  %2435 = vst.msk [vmem:[#allocation3 + $0xd8] sm:$0xff] %vm2155_vm1, %v2399_v7  ;;  %v1409_v14 = vadd.f32 %v1337_v18, %v828_v27 }
 0x1f3   : > { %v1917_v15 = vmul.f32 %v7037_v26, %v1784_v10  ;;  %v1779_v16 = vpop.permute.xlu0 %1778 }
 0x1f4   : > { %v1916_v20 = vmul.f32 %v7037_v26, %v1779_v16 }
 0x1f5   : > { %v1989_v22 = vadd.f32 %v1917_v15, %v1408_v11  ;;  %v2471_v24 = vld [vmem:[#allocation3 + $0xd0] sm:$0xff] }
 0x1f6   : > { %v2907_v25 = vld [vmem:[#allocation3 + $0xc9] sm:$0xff]  ;;  %v1988_v28 = vadd.f32 %v1916_v20, %v1407_v17  ;;  %6069 = vmatprep.mubr.msk.f32.mxu0 %vm2155_vm1, %v2471_v24  ;;  %v1794_v29 = vpop.permute.xlu1 %1793 }
 0x1f7   : > { %6125 = vmatmul.mubr.msk.f32.gmra.mxu1 %vm2155_vm1, %v2907_v25  ;;  %v2068_v31 = vadd.f32 %v7054_v42, %v1989_v22  ;;  %v1919_v33 = vmul.f32 %v7037_v26, %v1794_v29  ;;  %v1789_v34 = vpop.permute.xlu0 %1788 }
 0x1f8   : > { %v2067_v35 = vadd.f32 %v7054_v42, %v1988_v28  ;;  %v1918_v38 = vmul.f32 %v7037_v26, %v1789_v34 }
 0x1f9   : > { %v2140_v39 = vmax.f32 %v2068_v31, 0.0  ;;  %v1991_v40 = vadd.f32 %v1919_v33, %v1410_v30  ;;  %v2472_v41 = vld [vmem:[#allocation3 + $0xd8] sm:$0xff] }
 0x1fa   : > { %v2908_v23 = vld [vmem:[#allocation3 + $0xd1] sm:$0xff]  ;;  %v2139_v43 = vmax.f32 %v2067_v35, 0.0  ;;  %v1990_v45 = vadd.f32 %v1918_v38, %v1409_v14  ;;  %6070 = vmatmul.mubr.msk.f32.gmra.mxu0 %vm2155_vm1, %v2472_v41  ;;  %v714_v46 = vpop.permute.xlu1 %713 }
 0x1fb   : > { %6127 = vmatprep.mubr.msk.f32.mxu1 %vm2155_vm1, %v2908_v23  ;;  %2213 = vst.msk [vmem:[#allocation2 + $0x1c8] sm:$0xff] %vm2155_vm1, %v2140_v39  ;;  %v2070_v47 = vadd.f32 %v7054_v42, %v1991_v40  ;;  %v709_v48 = vpop.permute.xlu0 %708  ;;  %v831_v0 = vmul.f32 %v7028_v19, %v714_v46 }
 0x1fc   : > { %2212 = vst.msk [vmem:[#allocation2 + $0x1c0] sm:$0xff] %vm2155_vm1, %v2139_v43  ;;  %v2069_v49 = vadd.f32 %v7054_v42, %v1990_v45  ;;  %v830_v44 = vmul.f32 %v7028_v19, %v709_v48 }
 0x1fd   : > { %v2142_v50 = vmax.f32 %v2070_v47, 0.0 }
 0x1fe   : > { %v2141_v51 = vmax.f32 %v2069_v49, 0.0  ;;  %v1223_v52 = vpop.permute.xlu1 %1222 }
 0x1ff   : > { %2215 = vst.msk [vmem:[#allocation2 + $0x1d8] sm:$0xff] %vm2155_vm1, %v2142_v50  ;;  %v1218_v32 = vpop.permute.xlu0 %1217  ;;  %v1340_v13 = vmul.f32 %v7021_v36, %v1223_v52 }
 0x200   : > { %2214 = vst.msk [vmem:[#allocation2 + $0x1d0] sm:$0xff] %vm2155_vm1, %v2141_v51  ;;  %v1339_v62 = vmul.f32 %v7021_v36, %v1218_v32 }
 0x201   : > { %v1412_v2 = vadd.f32 %v1340_v13, %v831_v0 }
 0x202   : > { %v724_v53 = vpop.permute.xlu1 %723  ;;  %v1411_v6 = vadd.f32 %v1339_v62, %v830_v44 }
 0x203   : > { %v719_v54 = vpop.permute.xlu0 %718  ;;  %v2285_v55 = vld [vmem:[#allocation2 + $0x1c0] ss:$2 sm:$0xff]  ;;  %v2357_v56 = vld [vmem:[#allocation2 + $0x1c1] ss:$2 sm:$0xff]  ;;  %v833_v9 = vmul.f32 %v7028_v19, %v724_v53 }
 0x204   : > { %v2400_v57 = vmax.f32 %v2285_v55, %v2357_v56  ;;  %v832_v15 = vmul.f32 %v7028_v19, %v719_v54 }
 0x206   : > { %v1233_v58 = vpop.permute.xlu1 %1232  ;;  %2436 = vst.msk [vmem:[#allocation3 + $0xe0] sm:$0xff] %vm2155_vm1, %v2400_v57 }
 0x207   : > { %v1228_v59 = vpop.permute.xlu0 %1227  ;;  %v2287_v60 = vld [vmem:[#allocation2 + $0x1d0] ss:$2 sm:$0xff]  ;;  %v2359_v61 = vld [vmem:[#allocation2 + $0x1d1] ss:$2 sm:$0xff]  ;;  %v1342_v3 = vmul.f32 %v7021_v36, %v1233_v58 }
 0x208   : > { %v2401_v63 = vmax.f32 %v2287_v60, %v2359_v61  ;;  %v1341_v7 = vmul.f32 %v7021_v36, %v1228_v59 }
 0x209   : > { %v1414_v18 = vadd.f32 %v1342_v3, %v833_v9 }
 0x20a   : > { %v1804_v1 = vpop.permute.xlu1 %1803  ;;  %2437 = vst.msk [vmem:[#allocation3 + $0xe8] sm:$0xff] %vm2155_vm1, %v2401_v63  ;;  %v1413_v24 = vadd.f32 %v1341_v7, %v832_v15 }
 0x20b   : > { %v1921_v4 = vmul.f32 %v7037_v26, %v1804_v1  ;;  %v1799_v5 = vpop.permute.xlu0 %1798 }
 0x20c   : > { %v1920_v8 = vmul.f32 %v7037_v26, %v1799_v5 }
 0x20d   : > { %v1993_v10 = vadd.f32 %v1921_v4, %v1412_v2  ;;  %v2473_v11 = vld [vmem:[#allocation3 + $0xe0] sm:$0xff] }
 0x20e   : > { %v2909_v12 = vld [vmem:[#allocation3 + $0xd9] sm:$0xff]  ;;  %v1992_v16 = vadd.f32 %v1920_v8, %v1411_v6  ;;  %6072 = vmatprep.mubr.msk.f32.mxu0 %vm2155_vm1, %v2473_v11  ;;  %v1814_v17 = vpop.permute.xlu1 %1813 }
 0x20f   : > { %6128 = vmatmul.mubr.msk.f32.gmra.mxu1 %vm2155_vm1, %v2909_v12  ;;  %v2072_v20 = vadd.f32 %v7054_v42, %v1993_v10  ;;  %v1923_v21 = vmul.f32 %v7037_v26, %v1814_v17  ;;  %v1809_v22 = vpop.permute.xlu0 %1808 }
 0x210   : > { %v2071_v25 = vadd.f32 %v7054_v42, %v1992_v16  ;;  %v1922_v27 = vmul.f32 %v7037_v26, %v1809_v22 }
 0x211   : > { %v2144_v28 = vmax.f32 %v2072_v20, 0.0  ;;  %v1995_v29 = vadd.f32 %v1923_v21, %v1414_v18  ;;  %v2474_v30 = vld [vmem:[#allocation3 + $0xe8] sm:$0xff] }
 0x212   : > { %v2910_v31 = vld [vmem:[#allocation3 + $0xe1] sm:$0xff]  ;;  %v2143_v33 = vmax.f32 %v2071_v25, 0.0  ;;  %v1994_v34 = vadd.f32 %v1922_v27, %v1413_v24  ;;  %6073 = vmatmul.mubr.msk.f32.gmra.mxu0 %vm2155_vm1, %v2474_v30  ;;  %v734_v14 = vpop.permute.xlu1 %733 }
 0x213   : > { %6130 = vmatprep.mubr.msk.f32.mxu1 %vm2155_vm1, %v2910_v31  ;;  %2217 = vst.msk [vmem:[#allocation2 + $0x1e8] sm:$0xff] %vm2155_vm1, %v2144_v28  ;;  %v2074_v35 = vadd.f32 %v7054_v42, %v1995_v29  ;;  %v729_v38 = vpop.permute.xlu0 %728  ;;  %v835_v56 = vmul.f32 %v7028_v19, %v734_v14 }
 0x214   : > { %2216 = vst.msk [vmem:[#allocation2 + $0x1e0] sm:$0xff] %vm2155_vm1, %v2143_v33  ;;  %v2073_v39 = vadd.f32 %v7054_v42, %v1994_v34  ;;  %v834_v57 = vmul.f32 %v7028_v19, %v729_v38 }
 0x215   : > { %v2146_v40 = vmax.f32 %v2074_v35, 0.0 }
 0x216   : > { %v2145_v41 = vmax.f32 %v2073_v39, 0.0  ;;  %v1243_v23 = vpop.permute.xlu1 %1242 }
 0x217   : > { %2219 = vst.msk [vmem:[#allocation2 + $0x1f8] sm:$0xff] %vm2155_vm1, %v2146_v40  ;;  %v1238_v43 = vpop.permute.xlu0 %1237  ;;  %v1344_v51 = vmul.f32 %v7021_v36, %v1243_v23 }
 0x218   : > { %2218 = vst.msk [vmem:[#allocation2 + $0x1f0] sm:$0xff] %vm2155_vm1, %v2145_v41  ;;  %v1343_v54 = vmul.f32 %v7021_v36, %v1238_v43 }
 0x219   : > { %v1416_v13 = vadd.f32 %v1344_v51, %v835_v56 }
 0x21a   : > { %v744_v45 = vpop.permute.xlu1 %743  ;;  %v1415_v62 = vadd.f32 %v1343_v54, %v834_v57 }
 0x21b   : > { %v739_v46 = vpop.permute.xlu0 %738  ;;  %v2289_v47 = vld [vmem:[#allocation2 + $0x1e0] ss:$2 sm:$0xff]  ;;  %v2361_v48 = vld [vmem:[#allocation2 + $0x1e1] ss:$2 sm:$0xff]  ;;  %v837_v44 = vmul.f32 %v7028_v19, %v744_v45 }
 0x21c   : > { %v2402_v49 = vmax.f32 %v2289_v47, %v2361_v48  ;;  %v836_v4 = vmul.f32 %v7028_v19, %v739_v46 }
 0x21e   : > { %v1253_v50 = vpop.permute.xlu1 %1252  ;;  %2438 = vst.msk [vmem:[#allocation3 + $0xf0] sm:$0xff] %vm2155_vm1, %v2402_v49 }
 0x21f   : > { %v1248_v52 = vpop.permute.xlu0 %1247  ;;  %v2291_v32 = vld [vmem:[#allocation2 + $0x1f0] ss:$2 sm:$0xff]  ;;  %v2363_v53 = vld [vmem:[#allocation2 + $0x1f1] ss:$2 sm:$0xff]  ;;  %v1346_v59 = vmul.f32 %v7021_v36, %v1253_v50 }
 0x220   : > { %v2403_v55 = vmax.f32 %v2291_v32, %v2363_v53  ;;  %v1345_v63 = vmul.f32 %v7021_v36, %v1248_v52 }
 0x221   : > { %v1418_v7 = vadd.f32 %v1346_v59, %v837_v44 }
 0x222   : > { %v1824_v58 = vpop.permute.xlu1 %1823  ;;  %2439 = vst.msk [vmem:[#allocation3 + $0xf8] sm:$0xff] %vm2155_vm1, %v2403_v55  ;;  %v1417_v11 = vadd.f32 %v1345_v63, %v836_v4 }
 0x223   : > { %v1925_v60 = vmul.f32 %v7037_v26, %v1824_v58  ;;  %v1819_v61 = vpop.permute.xlu0 %1818 }
 0x224   : > { %v1924_v0 = vmul.f32 %v7037_v26, %v1819_v61 }
 0x225   : > { %v1997_v1 = vadd.f32 %v1925_v60, %v1416_v13  ;;  %v2475_v2 = vld [vmem:[#allocation3 + $0xf0] sm:$0xff] }
 0x226   : > { %v2911_v3 = vld [vmem:[#allocation3 + $0xe9] sm:$0xff]  ;;  %v1996_v5 = vadd.f32 %v1924_v0, %v1415_v62  ;;  %6075 = vmatprep.mubr.msk.f32.mxu0 %vm2155_vm1, %v2475_v2  ;;  %v1834_v6 = vpop.permute.xlu1 %1833 }
 0x227   : > { %6131 = vmatmul.mubr.msk.f32.gmra.mxu1 %vm2155_vm1, %v2911_v3  ;;  %v2076_v8 = vadd.f32 %v7054_v42, %v1997_v1  ;;  %v1927_v9 = vmul.f32 %v7037_v26, %v1834_v6  ;;  %v1829_v10 = vpop.permute.xlu0 %1828 }
 0x228   : > { %v2075_v12 = vadd.f32 %v7054_v42, %v1996_v5  ;;  %v1926_v15 = vmul.f32 %v7037_v26, %v1829_v10 }
 0x229   : > { %v2148_v16 = vmax.f32 %v2076_v8, 0.0  ;;  %v1999_v17 = vadd.f32 %v1927_v9, %v1418_v7  ;;  %v2476_v18 = vld [vmem:[#allocation3 + $0xf8] sm:$0xff] }
 0x22a   : > { %v2912_v20 = vld [vmem:[#allocation3 + $0xf1] sm:$0xff]  ;;  %v2147_v21 = vmax.f32 %v2075_v12, 0.0  ;;  %v1998_v22 = vadd.f32 %v1926_v15, %v1417_v11  ;;  %6076 = vmatmul.mubr.msk.f32.gmra.mxu0 %vm2155_vm1, %v2476_v18  ;;  %v754_v24 = vpop.permute.xlu1 %753 }
 0x22b   : > { %6133 = vmatprep.mubr.msk.f32.mxu1 %vm2155_vm1, %v2912_v20  ;;  %2221 = vst.msk [vmem:[#allocation2 + $0x208] sm:$0xff] %vm2155_vm1, %v2148_v16  ;;  %v2078_v25 = vadd.f32 %v7054_v42, %v1999_v17  ;;  %v749_v27 = vpop.permute.xlu0 %748  ;;  %v839_v48 = vmul.f32 %v7028_v19, %v754_v24 }
 0x22c   : > { %2220 = vst.msk [vmem:[#allocation2 + $0x200] sm:$0xff] %vm2155_vm1, %v2147_v21  ;;  %v2077_v28 = vadd.f32 %v7054_v42, %v1998_v22  ;;  %v838_v49 = vmul.f32 %v7028_v19, %v749_v27  ;;  %v2882_v27 = vld [vmem:[#allocation3 + $0x1] sm:$0xff] }
 0x22d   : > { %v2150_v29 = vmax.f32 %v2078_v25, 0.0 }
 0x22e   : > { %v2149_v30 = vmax.f32 %v2077_v28, 0.0  ;;  %v1263_v31 = vpop.permute.xlu1 %1262  ;;  %v2883_v28 = vld [vmem:[#allocation3 + $0x9] sm:$0xff] }
 0x22f   : > { %2223 = vst.msk [vmem:[#allocation2 + $0x218] sm:$0xff] %vm2155_vm1, %v2150_v29  ;;  %v1258_v33 = vpop.permute.xlu0 %1257  ;;  %v1348_v41 = vmul.f32 %v7021_v36, %v1263_v31  ;;  %v5699_v29 = vld [vmem:[%s8104_s3 + $0x20] sm:$0xff] }
 0x230   : > { %2222 = vst.msk [vmem:[#allocation2 + $0x210] sm:$0xff] %vm2155_vm1, %v2149_v30  ;;  %v1347_v46 = vmul.f32 %v7021_v36, %v1258_v33  ;;  %v2884_v30 = vld [vmem:[#allocation3 + $0x11] sm:$0xff]  ;;  %v2885_v31 = vld [vmem:[#allocation3 + $0x19] sm:$0xff]  ;;  %v2886_v33 = vld [vmem:[#allocation3 + $0x21] sm:$0xff] }
 0x231   : > { %v1420_v51 = vadd.f32 %v1348_v41, %v839_v48  ;;  %v3313_v41 = vld [vmem:[#allocation3 + $0x2] sm:$0xff]  ;;  %v3319_v48 = vld [vmem:[#allocation3 + $0x32] sm:$0xff] }
 0x232   : > { %v764_v34 = vpop.permute.xlu1 %763  ;;  %v1419_v54 = vadd.f32 %v1347_v46, %v838_v49  ;;  %v3317_v46 = vld [vmem:[#allocation3 + $0x22] sm:$0xff]  ;;  %v3320_v49 = vld [vmem:[#allocation3 + $0x3a] sm:$0xff] }
 0x233   : > { %v759_v14 = vpop.permute.xlu0 %758  ;;  %v2293_v35 = vld [vmem:[#allocation2 + $0x200] ss:$2 sm:$0xff]  ;;  %v2365_v38 = vld [vmem:[#allocation2 + $0x201] ss:$2 sm:$0xff]  ;;  %v841_v57 = vmul.f32 %v7028_v19, %v764_v34 }
 0x234   : > { %v2404_v39 = vmax.f32 %v2293_v35, %v2365_v38  ;;  %v840_v60 = vmul.f32 %v7028_v19, %v759_v14  ;;  %v2887_v34 = vld [vmem:[#allocation3 + $0x29] sm:$0xff]  ;;  %v2888_v14 = vld [vmem:[#allocation3 + $0x31] sm:$0xff]  ;;  %v2889_v35 = vld [vmem:[#allocation3 + $0x39] sm:$0xff] }
 0x235   : > { %v2891_v38 = vld [vmem:[#allocation3 + $0x49] sm:$0xff] }
 0x236   : > { %v1273_v40 = vpop.permute.xlu1 %1272  ;;  %2440 = vst.msk [vmem:[#allocation3 + $0x100] sm:$0xff] %vm2155_vm1, %v2404_v39  ;;  %v2892_v39 = vld [vmem:[#allocation3 + $0x51] sm:$0xff] }
 0x237   : > { %v1268_v23 = vpop.permute.xlu0 %1267  ;;  %v2295_v43 = vld [vmem:[#allocation2 + $0x210] ss:$2 sm:$0xff]  ;;  %v2367_v45 = vld [vmem:[#allocation2 + $0x211] ss:$2 sm:$0xff]  ;;  %v1350_v52 = vmul.f32 %v7021_v36, %v1273_v40 }
 0x238   : > { %v2405_v47 = vmax.f32 %v2295_v43, %v2367_v45  ;;  %v1349_v55 = vmul.f32 %v7021_v36, %v1268_v23  ;;  %v2893_v40 = vld [vmem:[#allocation3 + $0x59] sm:$0xff]  ;;  %v3314_v23 = vld [vmem:[#allocation3 + $0xa] sm:$0xff] }
 0x239   : > { %v1422_v63 = vadd.f32 %v1350_v52, %v841_v57  ;;  %v3315_v43 = vld [vmem:[#allocation3 + $0x12] sm:$0xff]  ;;  %v3316_v45 = vld [vmem:[#allocation3 + $0x1a] sm:$0xff]  ;;  %v3329_v57 = vld [vmem:[#allocation3 + $0x82] sm:$0xff] }
 0x23a   : > { %v1844_v50 = vpop.permute.xlu1 %1843  ;;  %2441 = vst.msk [vmem:[#allocation3 + $0x108] sm:$0xff] %vm2155_vm1, %v2405_v47  ;;  %v1421_v1 = vadd.f32 %v1349_v55, %v840_v60  ;;  %v3318_v47 = vld [vmem:[#allocation3 + $0x2a] sm:$0xff]  ;;  %v3323_v52 = vld [vmem:[#allocation3 + $0x52] sm:$0xff]  ;;  %v3333_v60 = vld [vmem:[#allocation3 + $0xa2] sm:$0xff] }
 0x23b   : > { %v1929_v32 = vmul.f32 %v7037_v26, %v1844_v50  ;;  %v1839_v53 = vpop.permute.xlu0 %1838  ;;  %v3321_v50 = vld [vmem:[#allocation3 + $0x42] sm:$0xff]  ;;  %v3327_v55 = vld [vmem:[#allocation3 + $0x72] sm:$0xff] }
 0x23c   : > { %v1928_v56 = vmul.f32 %v7037_v26, %v1839_v53  ;;  %v3325_v53 = vld [vmem:[#allocation3 + $0x62] sm:$0xff] }
 0x23d   : > { %v2001_v58 = vadd.f32 %v1929_v32, %v1420_v51  ;;  %v2477_v13 = vld [vmem:[#allocation3 + $0x100] sm:$0xff]  ;;  %v3322_v51 = vld [vmem:[#allocation3 + $0x4a] sm:$0xff] }
 0x23e   : > { %v2913_v59 = vld [vmem:[#allocation3 + $0xf9] sm:$0xff]  ;;  %v2000_v61 = vadd.f32 %v1928_v56, %v1419_v54  ;;  %6078 = vmatprep.mubr.msk.f32.mxu0 %vm2155_vm1, %v2477_v13  ;;  %v1854_v62 = vpop.permute.xlu1 %1853  ;;  %v3326_v54 = vld [vmem:[#allocation3 + $0x6a] sm:$0xff] }
 0x23f   : > { %6134 = vmatmul.mubr.msk.f32.gmra.mxu1 %vm2155_vm1, %v2913_v59  ;;  %v2080_v0 = vadd.f32 %v7054_v42, %v2001_v58  ;;  %v1931_v36 = vmul.f32 %v7037_v26, %v1854_v62  ;;  %v1849_v44 = vpop.permute.xlu0 %1848  ;;  %v3324_v32 = vld [vmem:[#allocation3 + $0x5a] sm:$0xff]  ;;  %v3330_v58 = vld [vmem:[#allocation3 + $0x8a] sm:$0xff]  ;;  %v3331_v13 = vld [vmem:[#allocation3 + $0x92] sm:$0xff] }
 0x240   : > { %v2079_v2 = vadd.f32 %v7054_v42, %v2000_v61  ;;  %v1930_v3 = vmul.f32 %v7037_v26, %v1849_v44  ;;  %v3328_v56 = vld [vmem:[#allocation3 + $0x7a] sm:$0xff]  ;;  %v3334_v61 = vld [vmem:[#allocation3 + $0xaa] sm:$0xff]  ;;  %v3335_v62 = vld [vmem:[#allocation3 + $0xb2] sm:$0xff] }
 0x241   : > { %v2152_v4 = vmax.f32 %v2080_v0, 0.0  ;;  %v2003_v5 = vadd.f32 %v1931_v36, %v1422_v63  ;;  %v2478_v19 = vld [vmem:[#allocation3 + $0x108] sm:$0xff]  ;;  %v3332_v59 = vld [vmem:[#allocation3 + $0x9a] sm:$0xff]  ;;  %v3339_v44 = vld [vmem:[#allocation3 + $0xd2] sm:$0xff] }
 0x242   : > { %v2914_v6 = vld [vmem:[#allocation3 + $0x101] sm:$0xff]  ;;  %v2151_v7 = vmax.f32 %v2079_v2, 0.0  ;;  %v2002_v8 = vadd.f32 %v1930_v3, %v1421_v1  ;;  %6079 = vmatmul.mubr.msk.f32.gmra.mxu0 %vm2155_vm1, %v2478_v19  ;;  %v3338_v36 = vld [vmem:[#allocation3 + $0xca] sm:$0xff] }
 0x243   : > { %6136 = vmatprep.mubr.msk.f32.mxu1 %vm2155_vm1, %v2914_v6  ;;  %2225 = vst.msk [vmem:[#allocation2 + $0x228] sm:$0xff] %vm2155_vm1, %v2152_v4  ;;  %v2082_v9 = vadd.f32 %v7054_v42, %v2003_v5  ;;  %v3336_v63 = vld [vmem:[#allocation3 + $0xba] sm:$0xff]  ;;  %v3337_v0 = vld [vmem:[#allocation3 + $0xc2] sm:$0xff]  ;;  %v3342_v3 = vld [vmem:[#allocation3 + $0xea] sm:$0xff]  ;;  %v7229_v6 = vpop.f32.mrf.mxu0 }
 0x244   : > { %2224 = vst.msk [vmem:[#allocation2 + $0x220] sm:$0xff] %vm2155_vm1, %v2151_v7  ;;  %v2081_v10 = vadd.f32 %v7054_v42, %v2002_v8  ;;  %v3340_v1 = vld [vmem:[#allocation3 + $0xda] sm:$0xff]  ;;  %v3341_v2 = vld [vmem:[#allocation3 + $0xe2] sm:$0xff]  ;;  %v3343_v4 = vld [vmem:[#allocation3 + $0xf2] sm:$0xff] }
 0x245   : > { %v2154_v26 = vmax.f32 %v2082_v9, 0.0  ;;  %v3344_v5 = vld [vmem:[#allocation3 + $0xfa] sm:$0xff]  ;;  %v3345_v19 = vld [vmem:[#allocation3 + $0x102] sm:$0xff]  ;;  %v7233_v9 = vpop.f32.mrf.mxu0 }
 0x246   : > { %v2153_v11 = vmax.f32 %v2081_v10, 0.0 }
 0x247   : > { %2228 = vst.msk [vmem:[#allocation2 + $0x238] sm:$0x3f] %vm2227_vm2, %v2154_v26  ;;  %v7235_v26 = vpop.f32.mrf.mxu0 }
 0x248   : > { %2226 = vst.msk [vmem:[#allocation2 + $0x230] sm:$0xff] %vm2155_vm1, %v2153_v11 }
 0x249   : > { %v7238_v11 = vpop.f32.mrf.mxu0 }
 0x24b   : > { %v2297_v12 = vld [vmem:[#allocation2 + $0x220] ss:$2 sm:$0xff]  ;;  %v2369_v15 = vld [vmem:[#allocation2 + $0x221] ss:$2 sm:$0xff] }
 0x24c   : > { %v2406_v16 = vmax.f32 %v2297_v12, %v2369_v15  ;;  %v7240_v12 = vpop.f32.mrf.mxu0 }
 0x24e   : > { %2442 = vst.msk [vmem:[#allocation3 + $0x110] sm:$0xff] %vm2155_vm1, %v2406_v16  ;;  %v7242_v15 = vpop.f32.mrf.mxu0 }
 0x24f   : > { %v2299_v17 = vld [vmem:[#allocation2 + $0x230] ss:$2 sm:$0x3f]  ;;  %v2371_v18 = vld [vmem:[#allocation2 + $0x231] ss:$2 sm:$0x3f] }
 0x250   : > { %v2407_v20 = vmax.f32 %v2299_v17, %v2371_v18  ;;  %v7244_v16 = vpop.f32.mrf.mxu0 }
 0x252   : > { %2443 = vst.msk [vmem:[#allocation3 + $0x118] sm:$0x3f] %vm2227_vm2, %v2407_v20  ;;  %v7246_v17 = vpop.f32.mrf.mxu0 }
 0x254   : > { %v7248_v18 = vpop.f32.mrf.mxu0 }
 0x255   : > { %v2479_v21 = vld [vmem:[#allocation3 + $0x110] sm:$0xff] }
 0x256   : > { %v2915_v22 = vld [vmem:[#allocation3 + $0x109] sm:$0xff]  ;;  %6081 = vmatprep.mubr.msk.f32.mxu0 %vm2155_vm1, %v2479_v21  ;;  %v7250_v20 = vpop.f32.mrf.mxu0 }
 0x257   : > { %6137 = vmatmul.mubr.msk.f32.gmra.mxu1 %vm2155_vm1, %v2915_v22  ;;  %v3346_v7 = vld [vmem:[#allocation3 + $0x10a] sm:$0xff] }
 0x258   : > { %v7252_v21 = vpop.f32.mrf.mxu0 }
 0x259   : > { %v2480_v42 = vld [vmem:[#allocation3 + $0x118] sm:$0xf] }
 0x25a   : > { %v2916_v24 = vld [vmem:[#allocation3 + $0x111] sm:$0xff]  ;;  %v2917_v25 = vld [vmem:[#allocation3 + $0x119] sm:$0xf]  ;;  %6082 = vmatmul.mubr.msk.f32.gmra.mxu0 %vm2155_vm1, %v2480_v42  ;;  %v7254_v22 = vpop.f32.mrf.mxu0 }
 0x25b   : > { %6139 = vmatprep.mubr.msk.f32.mxu1 %vm2155_vm1, %v2916_v24  ;;  %6088 = vmatprep.mubr.msk.f32.mxu0 %vm2155_vm1, %v2882_v27  ;;  %v3347_v8 = vld [vmem:[#allocation3 + $0x112] sm:$0xff]  ;;  %v3348_v10 = vld [vmem:[#allocation3 + $0x11a] sm:$0xf] }
 0x25c   : > { %6140 = vmatmul.mubr.msk.f32.gmra.mxu1 %vm2155_vm1, %v2917_v25  ;;  %v7256_v42 = vpop.f32.mrf.mxu0 }
 0x25e   : > { %6089 = vmatmul.mubr.msk.f32.vlgmr.msra.gmra.mxu0 %vm2155_vm1, %v2883_v28  ;;  %v7258_v24 = vpop.f32.mrf.mxu0 }
 0x25f   : > { %6143 = vmatpush3.msk.msra.mxu0 %vm2591_vm0, %v7046_v37  ;;  %6091 = vmatprep.mubr.msk.f32.mxu0 %vm2155_vm1, %v2884_v30  ;;  %v2890_v37 = vld [vmem:[#allocation3 + $0x41] sm:$0xff]  ;;  %v3934_v30 = vld [vmem:[%s8106_s5 + $0x30] sm:$0x3f] }
 0x260   : > { %6144 = vmatprep.subr.mxu0 %v5699_v29  ;;  %v7260_v25 = vpop.f32.mrf.mxu0 }
 0x261   : > { %6145 = vmatpush3.msra.mxu0 %v5699_v29  ;;  %v3935_v29 = vld [vmem:[%s8106_s5 + $0x38] sm:$0x3f] }
 0x262   : > { %6092 = vmatmul.mubr.msk.f32.gmra.mxu0 %vm2155_vm1, %v2885_v31  ;;  %v7262_v27 = vpop.f32.mrf.mxu0  ;;  %5738 = vmatprep.subr.msk.mxu1 %vm3939_vm3, %v3935_v29  ;;  %v7369_v29 = vld [vmem:[%s8105_s4] ss:$0 sm:$0xff] }
 0x263   : > { %6094 = vmatprep.mubr.msk.f32.mxu0 %vm2155_vm1, %v2886_v33  ;;  %5739 = vmatpush1.msk.msra.mxu1 %vm3939_vm3, %v3934_v30  ;;  %v7371_v30 = vpop.f32.mrf.mxu1 }
 0x264   : > { %v7264_v28 = vpop.f32.mrf.mxu0 }
 0x266   : > { %6095 = vmatmul.mubr.msk.f32.gmra.mxu0 %vm2155_vm1, %v2887_v34  ;;  %v7272_v31 = vpop.f32.mrf.mxu0 }
 0x267   : > { %6097 = vmatprep.mubr.msk.f32.mxu0 %vm2155_vm1, %v2888_v14 }
 0x268   : > { %v7276_v33 = vpop.f32.mrf.mxu0 }
 0x26a   : > { %6098 = vmatmul.mubr.msk.f32.gmra.mxu0 %vm2155_vm1, %v2889_v35  ;;  %v7278_v34 = vpop.f32.mrf.mxu0  ;;  %v3933_v35 = vld [vmem:[%s8106_s5 + $0x28] sm:$0xff] }
 0x26b   : > { %6100 = vmatprep.mubr.msk.f32.mxu0 %vm2155_vm1, %v2890_v37  ;;  %v3932_v37 = vld [vmem:[%s8106_s5 + $0x20] sm:$0xff]  ;;  %3972 = vmatprep.subr.mxu1 %v3933_v35 }
 0x26c   : > { %3973 = vmatpush1.msra.mxu1 %v3932_v37 }
 0x26e   : > { %6101 = vmatmul.mubr.msk.f32.gmra.mxu0 %vm2155_vm1, %v2891_v38 }
 0x26f   : > { %6103 = vmatprep.mubr.msk.f32.mxu0 %vm2155_vm1, %v2892_v39 }
 0x272   : > { %6104 = vmatmul.mubr.msk.f32.gmra.mxu0 %vm2155_vm1, %v2893_v40  ;;  %v7280_v14 = vpop.f32.mrf.mxu0 }
 0x273   : > { %6146 = vmatprep.mubr.msk.f32.mxu0 %vm2155_vm1, %v3313_v41 }
 0x274   : > { %v7288_v38 = vpop.f32.mrf.mxu0 }
 0x276   : > { %6147 = vmatmul.mubr.msk.f32.vlgmr.msra.gmra.mxu0 %vm2155_vm1, %v3314_v23  ;;  %v3931_v23 = vld [vmem:[%s8106_s5 + $0x18] sm:$0xff] }
 0x277   : > { %6149 = vmatprep.mubr.msk.f32.mxu0 %vm2155_vm1, %v3315_v43  ;;  %v3930_v43 = vld [vmem:[%s8106_s5 + $0x10] sm:$0xff]  ;;  %3974 = vmatprep.subr.mxu1 %v3931_v23  ;;  %v2847_v23 = vadd.f32 %v7229_v6, %v7369_v29  ;;  %v2848_v6 = vadd.f32 %v7369_v29, %v7238_v11  ;;  %v2850_v11 = vadd.f32 %v7369_v29, %v7242_v15 }
 0x278   : > { %3975 = vmatpush1.msra.mxu1 %v3930_v43  ;;  %v7379_v43 = vpop.f32.mrf.mxu1  ;;  %v2852_v15 = vadd.f32 %v7369_v29, %v7246_v17 }
 0x27a   : > { %6150 = vmatmul.mubr.msk.f32.gmra.mxu0 %vm2155_vm1, %v3316_v45 }
 0x27b   : > { %6152 = vmatprep.mubr.msk.f32.mxu0 %vm2155_vm1, %v3317_v46 }
 0x27e   : > { %6153 = vmatmul.mubr.msk.f32.gmra.mxu0 %vm2155_vm1, %v3318_v47 }
 0x27f   : > { %6155 = vmatprep.mubr.msk.f32.mxu0 %vm2155_vm1, %v3319_v48  ;;  %v5836_v48 = vld [vmem:[%s8106_s5 + $0x278] sm:$0x3f] }
 0x280   : > { %5837 = vmatprep.subr.msk.mxu0 %vm3939_vm3, %v5836_v48 }
 0x282   : > { %6156 = vmatmul.mubr.msk.f32.gmra.mxu0 %vm2155_vm1, %v3320_v49  ;;  %v5835_v49 = vld [vmem:[%s8106_s5 + $0x270] sm:$0x3f] }
 0x283   : > { %6158 = vmatprep.mubr.msk.f32.mxu0 %vm2155_vm1, %v3321_v50  ;;  %5838 = vmatpush1.msk.msra.mxu0 %vm3939_vm3, %v5835_v49  ;;  %v2846_v49 = vadd.f32 %v7369_v29, %v7233_v9 }
 0x286   : > { %6159 = vmatmul.mubr.msk.f32.gmra.mxu0 %vm2155_vm1, %v3322_v51  ;;  %v3929_v51 = vld [vmem:[%s8106_s5 + $0x8] sm:$0xff] }
 0x287   : > { %6161 = vmatprep.mubr.msk.f32.mxu0 %vm2155_vm1, %v3323_v52  ;;  %v5834_v52 = vld [vmem:[%s8106_s5 + $0x268] sm:$0xff]  ;;  %3976 = vmatprep.subr.mxu1 %v3929_v51 }
 0x288   : > { %4820 = vmatprep.subr.mxu0 %v5834_v52  ;;  %v7385_v52 = vpop.f32.mrf.mxu1 }
 0x28a   : > { %6162 = vmatmul.mubr.msk.f32.gmra.mxu0 %vm2155_vm1, %v3324_v32  ;;  %v7290_v39 = vpop.f32.mrf.mxu0  ;;  %v3928_v32 = vld [vmem:[%s8106_s5] sm:$0xff] }
 0x28b   : > { %6164 = vmatprep.mubr.msk.f32.mxu0 %vm2155_vm1, %v3325_v53  ;;  %v5833_v53 = vld [vmem:[%s8106_s5 + $0x260] sm:$0xff]  ;;  %3977 = vmatpush1.msra.mxu1 %v3928_v32 }
 0x28c   : > { %v7292_v40 = vpop.f32.mrf.mxu0  ;;  %4821 = vmatpush1.msra.mxu0 %v5833_v53  ;;  %v2849_v53 = vadd.f32 %v7235_v26, %v7369_v29 }
 0x28e   : > { %6165 = vmatmul.mubr.msk.f32.gmra.mxu0 %vm2155_vm1, %v3326_v54  ;;  %v5748_v54 = vld [vmem:[%s8106_s5 + $0x78] sm:$0x3f] }
 0x28f   : > { %6167 = vmatprep.mubr.msk.f32.mxu0 %vm2155_vm1, %v3327_v55  ;;  %v5832_v55 = vld [vmem:[%s8106_s5 + $0x258] sm:$0xff]  ;;  %5749 = vmatprep.subr.msk.mxu1 %vm3939_vm3, %v5748_v54 }
 0x290   : > { %4822 = vmatprep.subr.mxu0 %v5832_v55 }
 0x292   : > { %6168 = vmatmul.mubr.msk.f32.gmra.mxu0 %vm2155_vm1, %v3328_v56  ;;  %v8111_v56 = vmov 0.0  }
 0x293   : > { %6170 = vmatprep.mubr.msk.f32.mxu0 %vm2155_vm1, %v3329_v57  ;;  %4010 = vmatprep.mubr.f32.mxu1 %v8111_v56  ;;  %v5831_v57 = vld [vmem:[%s8106_s5 + $0x250] sm:$0xff] }
 0x294   : > { %4823 = vmatpush1.msra.mxu0 %v5831_v57 }
 0x296   : > { %6171 = vmatmul.mubr.msk.f32.gmra.mxu0 %vm2155_vm1, %v3330_v58 }
 0x297   : > { %6173 = vmatprep.mubr.msk.f32.mxu0 %vm2155_vm1, %v3331_v13  ;;  %v5830_v13 = vld [vmem:[%s8106_s5 + $0x248] sm:$0xff] }
 0x298   : > { %4824 = vmatprep.subr.mxu0 %v5830_v13 }
 0x29a   : > { %6174 = vmatmul.mubr.msk.f32.gmra.mxu0 %vm2155_vm1, %v3332_v59  ;;  %v5829_v59 = vld [vmem:[%s8106_s5 + $0x240] sm:$0xff] }
 0x29b   : > { %6176 = vmatprep.mubr.msk.f32.mxu0 %vm2155_vm1, %v3333_v60  ;;  %4825 = vmatpush1.msra.mxu0 %v5829_v59 }
 0x29e   : > { %6177 = vmatmul.mubr.msk.f32.gmra.mxu0 %vm2155_vm1, %v3334_v61  ;;  %v5858_v61 = vld [vmem:[%s8106_s5 + $0x2f8] sm:$0x3f] }
 0x29f   : > { %6179 = vmatprep.mubr.msk.f32.mxu0 %vm2155_vm1, %v3335_v62  ;;  %5859 = vmatprep.subr.msk.mxu0 %vm3939_vm3, %v5858_v61 }
 0x2a2   : > { %6180 = vmatmul.mubr.msk.f32.gmra.mxu0 %vm2155_vm1, %v3336_v63  ;;  %v7294_v41 = vpop.f32.mrf.mxu0 }
 0x2a3   : > { %6182 = vmatprep.mubr.msk.f32.mxu0 %vm2155_vm1, %v3337_v0 }
 0x2a4   : > { %v7302_v45 = vpop.f32.mrf.mxu0 }
 0x2a6   : > { %6183 = vmatmul.mubr.msk.f32.gmra.mxu0 %vm2155_vm1, %v3338_v36 }
 0x2a7   : > { %6185 = vmatprep.mubr.msk.f32.mxu0 %vm2155_vm1, %v3339_v44 }
 0x2aa   : > { %6186 = vmatmul.mubr.msk.f32.gmra.mxu0 %vm2155_vm1, %v3340_v1 }
 0x2ab   : > { %6188 = vmatprep.mubr.msk.f32.mxu0 %vm2155_vm1, %v3341_v2 }
 0x2ae   : > { %6189 = vmatmul.mubr.msk.f32.gmra.mxu0 %vm2155_vm1, %v3342_v3 }
 0x2af   : > { %6191 = vmatprep.mubr.msk.f32.mxu0 %vm2155_vm1, %v3343_v4 }
 0x2b2   : > { %6192 = vmatmul.mubr.msk.f32.gmra.mxu0 %vm2155_vm1, %v3344_v5 }
 0x2b3   : > { %6194 = vmatprep.mubr.msk.f32.mxu0 %vm2155_vm1, %v3345_v19 }
 0x2b6   : > { %6195 = vmatmul.mubr.msk.f32.gmra.mxu0 %vm2155_vm1, %v3346_v7 }
 0x2b7   : > { %6197 = vmatprep.mubr.msk.f32.mxu0 %vm2155_vm1, %v3347_v8 }
 0x2ba   : > { %6198 = vmatmul.mubr.msk.f32.gmra.mxu0 %vm2155_vm1, %v3348_v10  ;;  %v7304_v46 = vpop.f32.mrf.mxu0 }
 0x2bb   : > { %4858 = vmatprep.mubr.f32.mxu0 %v8111_v56  ;;  %v7391_v56 = vpop.f32.mrf.mxu1 }
 0x2bc   : > { %v7306_v47 = vpop.f32.mrf.mxu0 }
 0x2d2   : > { %v7315_v50 = vpop.f32.mrf.mxu0 }
 0x2d4   : > { %v7341_v58 = vpop.f32.mrf.mxu0 }
 0x2ea   : > { %v7350_v60 = vpop.f32.mrf.mxu0 }
 0x2ec   : > { %v7356_v62 = vpop.f32.mrf.mxu0 }
 0x302   : > { %v7358_v63 = vpop.f32.mrf.mxu0 }
 0x304   : > { %v7360_v0 = vpop.f32.mrf.mxu0 }
 0x31a   : > { %v7362_v36 = vpop.f32.mrf.mxu0 }
 0x31c   : > { %v7364_v44 = vpop.f32.mrf.mxu0 }
 0x31e   : > { %v6090_v1 = vpop.f32.mrf.mxu0 }
 0x31f   : > { %v3278_v51 = vadd.f32 %v6090_v1, %v2847_v23  ;;  %v2851_v1 = vadd.f32 %v7240_v12, %v7369_v29  ;;  %v2853_v12 = vadd.f32 %v7244_v16, %v7369_v29  ;;  %v2855_v16 = vadd.f32 %v7248_v18, %v7369_v29 }
 0x320   : > { %v3098_v2 = vpop.f32.mrf.mxu0 }
 0x321   : > { %v3277_v54 = vadd.f32 %v3098_v2, %v2846_v49  ;;  %v7396_v49 = vpop.f32.mrf.mxu1 }
 0x322   : > { %v6093_v3 = vpop.f32.mrf.mxu0 }
 0x323   : > { %v3280_v13 = vadd.f32 %v6093_v3, %v2849_v53 }
 0x324   : > { %v3108_v4 = vpop.f32.mrf.mxu0 }
 0x325   : > { %v3279_v23 = vadd.f32 %v3108_v4, %v2848_v6  ;;  %v7404_v6 = vpop.f32.mrf.mxu1 }
 0x326   : > { %v6096_v5 = vpop.f32.mrf.mxu0 }
 0x327   : > { %v3282_v3 = vadd.f32 %v6096_v5, %v2851_v1 }
 0x328   : > { %v3118_v19 = vpop.f32.mrf.mxu0 }
 0x329   : > { %v3281_v4 = vadd.f32 %v3118_v19, %v2850_v11 }
 0x32a   : > { %v6099_v7 = vpop.f32.mrf.mxu0 }
 0x32b   : > { %v3284_v5 = vadd.f32 %v6099_v7, %v2853_v12 }
 0x32c   : > { %v3128_v8 = vpop.f32.mrf.mxu0 }
 0x32d   : > { %v3283_v19 = vadd.f32 %v3128_v8, %v2852_v15  ;;  %v2857_v8 = vadd.f32 %v7252_v21, %v7369_v29 }
 0x32e   : > { %v6102_v10 = vpop.f32.mrf.mxu0 }
 0x32f   : > { %v3286_v11 = vadd.f32 %v6102_v10, %v2855_v16  ;;  %v2856_v10 = vadd.f32 %v7369_v29, %v7254_v22 }
 0x330   : > { %v7373_v35 = vpop.f32.mrf.mxu0 }
 0x332   : > { %v7375_v37 = vpop.f32.mrf.mxu0 }
 0x334   : > { %v7381_v48 = vpop.f32.mrf.mxu0 }
 0x335   : > { %v3287_v16 = vadd.f32 %v7381_v48, %v2856_v10 }
 0x336   : > { %v6148_v32 = vpop.f32.mrf.mxu0 }
 0x337   : > { %v3709_v55 = vadd.f32 %v6148_v32, %v3278_v51 }
 0x338   : > { %v3529_v57 = vpop.f32.mrf.mxu0 }
 0x339   : > { %v3745_v59 = vmax.f32 %v3709_v55, 0.0  ;;  %v3708_v61 = vadd.f32 %v3529_v57, %v3277_v54 }
 0x33a   : > { %v6151_v9 = vpop.f32.mrf.mxu0 }
 0x33b   : > { %3782 = vst.msk [vmem:[#allocation4 + $0x8] sm:$0xff] %vm3780_vm4, %v3745_v59  ;;  %v3744_v26 = vmax.f32 %v3708_v61, 0.0  ;;  %v3711_v2 = vadd.f32 %v6151_v9, %v3280_v13  ;;  %v7409_v9 = vpop.f32.mrf.mxu1 }
 0x33c   : > { %v3539_v51 = vpop.f32.mrf.mxu0 }
 0x33d   : > { %3781 = vst.msk [vmem:[#allocation4] sm:$0xff] %vm3780_vm4, %v3744_v26  ;;  %v3747_v32 = vmax.f32 %v3711_v2, 0.0  ;;  %v3710_v53 = vadd.f32 %v3539_v51, %v3279_v23  ;;  %v2854_v2 = vadd.f32 %v7369_v29, %v7250_v20 }
 0x33e   : > { %v6154_v54 = vpop.f32.mrf.mxu0 }
 0x33f   : > { %3784 = vst.msk [vmem:[#allocation4 + $0x18] sm:$0xff] %vm3780_vm4, %v3747_v32  ;;  %v3746_v55 = vmax.f32 %v3710_v53, 0.0  ;;  %v3713_v57 = vadd.f32 %v6154_v54, %v3282_v3  ;;  %v7417_v54 = vpop.f32.mrf.mxu1  ;;  %v3285_v12 = vadd.f32 %v7373_v35, %v2854_v2 }
 0x340   : > { %v3549_v13 = vpop.f32.mrf.mxu0 }
 0x341   : > { %3783 = vst.msk [vmem:[#allocation4 + $0x10] sm:$0xff] %vm3780_vm4, %v3746_v55  ;;  %v3749_v59 = vmax.f32 %v3713_v57, 0.0  ;;  %v3712_v61 = vadd.f32 %v3549_v13, %v3281_v4  ;;  %v7426_v55 = vpop.f32.mrf.mxu1 }
 0x342   : > { %v6157_v1 = vpop.f32.mrf.mxu0 }
 0x343   : > { %3786 = vst.msk [vmem:[#allocation4 + $0x28] sm:$0xff] %vm3780_vm4, %v3749_v59  ;;  %v3748_v23 = vmax.f32 %v3712_v61, 0.0  ;;  %v3715_v26 = vadd.f32 %v6157_v1, %v3284_v5  ;;  %v3288_v5 = vadd.f32 %v7375_v37, %v2857_v8  ;;  %v2859_v1 = vadd.f32 %v7256_v42, %v7369_v29 }
 0x344   : > { %v3818_v17 = vld [vmem:[#allocation4] ss:$2 sm:$0xff]  ;;  %v3854_v7 = vld [vmem:[#allocation4 + $0x1] ss:$2 sm:$0xff]  ;;  %v3559_v51 = vpop.f32.mrf.mxu0  ;;  %v2858_v37 = vadd.f32 %v7369_v29, %v7258_v24  ;;  %v2861_v24 = vadd.f32 %v7260_v25, %v7369_v29 }
 0x345   : > { %v3889_v3 = vmax.f32 %v3818_v17, %v3854_v7  ;;  %3785 = vst.msk [vmem:[#allocation4 + $0x20] sm:$0xff] %vm3780_vm4, %v3748_v23  ;;  %v3751_v32 = vmax.f32 %v3715_v26, 0.0  ;;  %v3714_v53 = vadd.f32 %v3559_v51, %v3283_v19  ;;  %v7437_v23 = vpop.f32.mrf.mxu1  ;;  %v3290_v7 = vadd.f32 %v7371_v30, %v2859_v1 }
 0x346   : > { %v6160_v18 = vpop.f32.mrf.mxu0  ;;  %v2860_v30 = vadd.f32 %v7369_v29, %v7262_v27 }
 0x347   : > { %3907 = vst.msk [vmem:[#allocation5] sm:$0xff] %vm3780_vm4, %v3889_v3  ;;  %3788 = vst.msk [vmem:[#allocation4 + $0x38] sm:$0xff] %vm3780_vm4, %v3751_v32  ;;  %v3750_v20 = vmax.f32 %v3714_v53, 0.0  ;;  %v3717_v4 = vadd.f32 %v6160_v18, %v3286_v11  ;;  %v7441_v11 = vpop.f32.mrf.mxu1  ;;  %v3289_v32 = vadd.f32 %v7379_v43, %v2858_v37 }
 0x348   : > { %v3820_v57 = vld [vmem:[#allocation4 + $0x10] ss:$2 sm:$0xff]  ;;  %v3856_v13 = vld [vmem:[#allocation4 + $0x11] ss:$2 sm:$0xff]  ;;  %v3569_v15 = vpop.f32.mrf.mxu0 }
 0x349   : > { %v3890_v59 = vmax.f32 %v3820_v57, %v3856_v13  ;;  %3787 = vst.msk [vmem:[#allocation4 + $0x30] sm:$0xff] %vm3780_vm4, %v3750_v20  ;;  %v3753_v21 = vmax.f32 %v3717_v4, 0.0  ;;  %v3716_v35 = vadd.f32 %v3569_v15, %v3285_v12  ;;  %v3292_v4 = vadd.f32 %v7385_v52, %v2861_v24  ;;  %v7452_v25 = vpop.f32.mrf.mxu1 }
 0x34a   : > { %v6163_v61 = vpop.f32.mrf.mxu0  ;;  %v3291_v15 = vadd.f32 %v7391_v56, %v2860_v30  ;;  %v2862_v52 = vadd.f32 %v7369_v29, %v7272_v31 }
 0x34b   : > { %3908 = vst.msk [vmem:[#allocation5 + $0x8] sm:$0xff] %vm3780_vm4, %v3890_v59  ;;  %3790 = vst.msk [vmem:[#allocation4 + $0x48] sm:$0xff] %vm3780_vm4, %v3753_v21  ;;  %v3752_v22 = vmax.f32 %v3716_v35, 0.0  ;;  %v3719_v19 = vadd.f32 %v6163_v61, %v3288_v5  ;;  %v2863_v5 = vadd.f32 %v7264_v28, %v7369_v29  ;;  %v7461_v21 = vpop.f32.mrf.mxu1 }
 0x34c   : > { %v3822_v26 = vld [vmem:[#allocation4 + $0x20] ss:$2 sm:$0xff]  ;;  %v3858_v2 = vld [vmem:[#allocation4 + $0x21] ss:$2 sm:$0xff]  ;;  %v3579_v17 = vpop.f32.mrf.mxu0  ;;  %v3293_v37 = vadd.f32 %v7404_v6, %v2862_v52 }
 0x34d   : > { %v3891_v51 = vmax.f32 %v3822_v26, %v3858_v2  ;;  %3789 = vst.msk [vmem:[#allocation4 + $0x40] sm:$0xff] %vm3780_vm4, %v3752_v22  ;;  %v3755_v42 = vmax.f32 %v3719_v19, 0.0  ;;  %v3718_v48 = vadd.f32 %v3579_v17, %v3287_v16  ;;  %v3294_v16 = vadd.f32 %v7396_v49, %v2863_v5  ;;  %v7472_v17 = vpop.f32.mrf.mxu1 }
 0x34e   : > { %v6166_v3 = vpop.f32.mrf.mxu0  ;;  %v2865_v26 = vadd.f32 %v7276_v33, %v7369_v29  ;;  %v2864_v49 = vadd.f32 %v7369_v29, %v7278_v34  ;;  %v2867_v34 = vadd.f32 %v7280_v14, %v7369_v29 }
 0x34f   : > { %3909 = vst.msk [vmem:[#allocation5 + $0x10] sm:$0xff] %vm3780_vm4, %v3891_v51  ;;  %3792 = vst.msk [vmem:[#allocation4 + $0x58] sm:$0xff] %vm3780_vm4, %v3755_v42  ;;  %v3754_v53 = vmax.f32 %v3718_v48, 0.0  ;;  %v3721_v18 = vadd.f32 %v6166_v3, %v3290_v7 }
 0x350   : > { %v3824_v8 = vld [vmem:[#allocation4 + $0x30] ss:$2 sm:$0xff]  ;;  %v3860_v12 = vld [vmem:[#allocation4 + $0x31] ss:$2 sm:$0xff]  ;;  %v3589_v20 = vpop.f32.mrf.mxu0  ;;  %v3296_v48 = vadd.f32 %v7409_v9, %v2865_v26  ;;  %v2866_v9 = vadd.f32 %v7369_v29, %v7288_v38 }
 0x351   : > { %v3892_v10 = vmax.f32 %v3824_v8, %v3860_v12  ;;  %3791 = vst.msk [vmem:[#allocation4 + $0x50] sm:$0xff] %vm3780_vm4, %v3754_v53  ;;  %v3757_v43 = vmax.f32 %v3721_v18, 0.0  ;;  %v3720_v57 = vadd.f32 %v3589_v20, %v3289_v32  ;;  %v7476_v32 = vpop.f32.mrf.mxu1  ;;  %v3295_v53 = vadd.f32 %v7417_v54, %v2864_v49 }
 0x352   : > { %v6169_v13 = vpop.f32.mrf.mxu0 }
 0x353   : > { %3910 = vst.msk [vmem:[#allocation5 + $0x18] sm:$0xff] %vm3780_vm4, %v3892_v10  ;;  %3794 = vst.msk [vmem:[#allocation4 + $0x68] sm:$0xff] %vm3780_vm4, %v3757_v43  ;;  %v3756_v27 = vmax.f32 %v3720_v57, 0.0  ;;  %v3723_v59 = vadd.f32 %v6169_v13, %v3292_v4  ;;  %v3298_v4 = vadd.f32 %v7426_v55, %v2867_v34  ;;  %v3228_v14 = vpop.f32.mrf.mxu1  ;;  %v3297_v13 = vadd.f32 %v7437_v23, %v2866_v9 }
 0x354   : > { %v3826_v35 = vld [vmem:[#allocation4 + $0x40] ss:$2 sm:$0xff]  ;;  %v3862_v61 = vld [vmem:[#allocation4 + $0x41] ss:$2 sm:$0xff]  ;;  %v3599_v1 = vpop.f32.mrf.mxu0  ;;  %v2868_v55 = vadd.f32 %v7369_v29, %v7292_v40 }
 0x355   : > { %v3893_v56 = vmax.f32 %v3826_v35, %v3862_v61  ;;  %3793 = vst.msk [vmem:[#allocation4 + $0x60] sm:$0xff] %vm3780_vm4, %v3756_v27  ;;  %v3759_v28 = vmax.f32 %v3723_v59, 0.0  ;;  %v3722_v22 = vadd.f32 %v3599_v1, %v3291_v15  ;;  %v2869_v15 = vadd.f32 %v7290_v39, %v7369_v29  ;;  %v6132_v27 = vpop.f32.mrf.mxu1 }
 0x356   : > { %v6172_v19 = vpop.f32.mrf.mxu0 }
 0x357   : > { %3911 = vst.msk [vmem:[#allocation5 + $0x20] sm:$0xff] %vm3780_vm4, %v3893_v56  ;;  %3796 = vst.msk [vmem:[#allocation4 + $0x78] sm:$0xff] %vm3780_vm4, %v3759_v28  ;;  %v3758_v31 = vmax.f32 %v3722_v22, 0.0  ;;  %v3725_v2 = vadd.f32 %v6172_v19, %v3294_v16  ;;  %v3300_v61 = vadd.f32 %v7441_v11, %v2869_v15  ;;  %v3299_v56 = vadd.f32 %v7452_v25, %v2868_v55  ;;  %v3238_v19 = vpop.f32.mrf.mxu1 }
 0x358   : > { %v3828_v7 = vld [vmem:[#allocation4 + $0x50] ss:$2 sm:$0xff]  ;;  %v3864_v51 = vld [vmem:[#allocation4 + $0x51] ss:$2 sm:$0xff]  ;;  %v3609_v42 = vpop.f32.mrf.mxu0  ;;  %v2871_v28 = vadd.f32 %v7294_v41, %v7369_v29  ;;  %v2870_v11 = vadd.f32 %v7369_v29, %v7302_v45  ;;  %v2876_v55 = vadd.f32 %v7369_v29, %v7356_v62 }
 0x359   : > { %v3894_v6 = vmax.f32 %v3828_v7, %v3864_v51  ;;  %3795 = vst.msk [vmem:[#allocation4 + $0x70] sm:$0xff] %vm3780_vm4, %v3758_v31  ;;  %v3761_v33 = vmax.f32 %v3725_v2, 0.0  ;;  %v3724_v3 = vadd.f32 %v3609_v42, %v3293_v37  ;;  %v6135_v7 = vpop.f32.mrf.mxu1 }
 0x35a   : > { %v6175_v24 = vpop.f32.mrf.mxu0  ;;  %v3302_v2 = vadd.f32 %v7461_v21, %v2871_v28  ;;  %v3301_v42 = vadd.f32 %v7472_v17, %v2870_v11  ;;  %v2872_v21 = vadd.f32 %v7369_v29, %v7306_v47 }
 0x35b   : > { %3912 = vst.msk [vmem:[#allocation5 + $0x28] sm:$0xff] %vm3780_vm4, %v3894_v6  ;;  %3798 = vst.msk [vmem:[#allocation4 + $0x88] sm:$0xff] %vm3780_vm4, %v3761_v33  ;;  %v3760_v18 = vmax.f32 %v3724_v3, 0.0  ;;  %v3727_v30 = vadd.f32 %v6175_v24, %v3296_v48  ;;  %v2873_v48 = vadd.f32 %v7304_v46, %v7369_v29  ;;  %v3248_v46 = vpop.f32.mrf.mxu1 }
 0x35c   : > { %v3830_v8 = vld [vmem:[#allocation4 + $0x60] ss:$2 sm:$0xff]  ;;  %v3866_v12 = vld [vmem:[#allocation4 + $0x61] ss:$2 sm:$0xff]  ;;  %v3619_v20 = vpop.f32.mrf.mxu0  ;;  %v3303_v9 = vadd.f32 %v3228_v14, %v2872_v21 }
 0x35d   : > { %v3895_v10 = vmax.f32 %v3830_v8, %v3866_v12  ;;  %3797 = vst.msk [vmem:[#allocation4 + $0x80] sm:$0xff] %vm3780_vm4, %v3760_v18  ;;  %v3763_v54 = vmax.f32 %v3727_v30, 0.0  ;;  %v3726_v43 = vadd.f32 %v3619_v20, %v3295_v53  ;;  %v3304_v53 = vadd.f32 %v7476_v32, %v2873_v48  ;;  %v6138_v20 = vpop.f32.mrf.mxu1 }
 0x35e   : > { %v6178_v57 = vpop.f32.mrf.mxu0  ;;  %v2875_v8 = vadd.f32 %v7315_v50, %v7369_v29  ;;  %v2874_v32 = vadd.f32 %v7369_v29, %v7341_v58 }
 0x35f   : > { %3913 = vst.msk [vmem:[#allocation5 + $0x30] sm:$0xff] %vm3780_vm4, %v3895_v10  ;;  %3800 = vst.msk [vmem:[#allocation4 + $0x98] sm:$0xff] %vm3780_vm4, %v3763_v54  ;;  %v3762_v38 = vmax.f32 %v3726_v43, 0.0  ;;  %v3729_v5 = vadd.f32 %v6178_v57, %v3298_v4 }
 0x360   : > { %v3832_v59 = vld [vmem:[#allocation4 + $0x70] ss:$2 sm:$0xff]  ;;  %v3868_v52 = vld [vmem:[#allocation4 + $0x71] ss:$2 sm:$0xff]  ;;  %v3629_v35 = vpop.f32.mrf.mxu0  ;;  %v3306_v43 = vadd.f32 %v6132_v27, %v2875_v8  ;;  %v3305_v15 = vadd.f32 %v3238_v19, %v2874_v32  ;;  %v3258_v27 = vpop.f32.mrf.mxu1 }
 0x361   : > { %v3896_v1 = vmax.f32 %v3832_v59, %v3868_v52  ;;  %3799 = vst.msk [vmem:[#allocation4 + $0x90] sm:$0xff] %vm3780_vm4, %v3762_v38  ;;  %v3765_v23 = vmax.f32 %v3729_v5, 0.0  ;;  %v3728_v39 = vadd.f32 %v3629_v35, %v3297_v13  ;;  %v2877_v38 = vadd.f32 %v7350_v60, %v7369_v29 }
 0x362   : > { %v6181_v16 = vpop.f32.mrf.mxu0  ;;  %v2879_v60 = vadd.f32 %v7358_v63, %v7369_v29  ;;  %v6141_v11 = vpop.f32.mrf.mxu1 }
 0x363   : > { %3914 = vst.msk [vmem:[#allocation5 + $0x38] sm:$0xff] %vm3780_vm4, %v3896_v1  ;;  %3802 = vst.msk [vmem:[#allocation4 + $0xa8] sm:$0xff] %vm3780_vm4, %v3765_v23  ;;  %v3764_v40 = vmax.f32 %v3728_v39, 0.0  ;;  %v3731_v22 = vadd.f32 %v6181_v16, %v3300_v61  ;;  %v3308_v61 = vadd.f32 %v6135_v7, %v2877_v38  ;;  %v2880_v7 = vadd.f32 %v7369_v29, %v7364_v44  ;;  %v5744_v38 = vld [vmem:[%s8106_s5 + $0x58] sm:$0xff] }
 0x364   : > { %v3834_v37 = vld [vmem:[#allocation4 + $0x80] ss:$2 sm:$0xff]  ;;  %v3870_v26 = vld [vmem:[#allocation4 + $0x81] ss:$2 sm:$0xff]  ;;  %v3639_v31 = vpop.f32.mrf.mxu0 }
 0x365   : > { %v3897_v49 = vmax.f32 %v3834_v37, %v3870_v26  ;;  %3801 = vst.msk [vmem:[#allocation4 + $0xa0] sm:$0xff] %vm3780_vm4, %v3764_v40  ;;  %v3767_v25 = vmax.f32 %v3731_v22, 0.0  ;;  %v3730_v41 = vadd.f32 %v3639_v31, %v3299_v56  ;;  %v3307_v56 = vadd.f32 %v3248_v46, %v2876_v55  ;;  %v5857_v55 = vld [vmem:[%s8106_s5 + $0x2f0] sm:$0x3f] }
 0x366   : > { %v6184_v51 = vpop.f32.mrf.mxu0  ;;  %v2878_v40 = vadd.f32 %v7369_v29, %v7360_v0  ;;  %v3310_v22 = vadd.f32 %v6138_v20, %v2879_v60  ;;  %v2881_v31 = vadd.f32 %v7362_v36, %v7369_v29 }
 0x367   : > { %3915 = vst.msk [vmem:[#allocation5 + $0x40] sm:$0xff] %vm3780_vm4, %v3897_v49  ;;  %3804 = vst.msk [vmem:[#allocation4 + $0xb8] sm:$0xff] %vm3780_vm4, %v3767_v25  ;;  %v3766_v45 = vmax.f32 %v3730_v41, 0.0  ;;  %v3733_v6 = vadd.f32 %v6184_v51, %v3302_v2 }
 0x368   : > { %v3836_v33 = vld [vmem:[#allocation4 + $0x90] ss:$2 sm:$0xff]  ;;  %v3872_v3 = vld [vmem:[#allocation4 + $0x91] ss:$2 sm:$0xff]  ;;  %v3649_v24 = vpop.f32.mrf.mxu0  ;;  %v3309_v41 = vadd.f32 %v3258_v27, %v2878_v40  ;;  %v5851_v40 = vld [vmem:[%s8106_s5 + $0x2c0] sm:$0xff] }
 0x369   : > { %v3898_v34 = vmax.f32 %v3836_v33, %v3872_v3  ;;  %3803 = vst.msk [vmem:[#allocation4 + $0xb0] sm:$0xff] %vm3780_vm4, %v3766_v45  ;;  %v3769_v17 = vmax.f32 %v3733_v6, 0.0  ;;  %v3732_v18 = vadd.f32 %v3649_v24, %v3301_v42  ;;  %v3268_v42 = vpop.f32.mrf.mxu1  ;;  %v3312_v6 = vadd.f32 %v6141_v11, %v2881_v31  ;;  %v5880_v11 = vld [vmem:[%s8106_s5 + $0x378] sm:$0x3f]  ;;  %v5753_v31 = vld [vmem:[%s8106_s5 + $0x88] sm:$0xff] }
 0x36a   : > { %v6187_v30 = vpop.f32.mrf.mxu0 }
 0x36b   : > { %3916 = vst.msk [vmem:[#allocation5 + $0x48] sm:$0xff] %vm3780_vm4, %v3898_v34  ;;  %3806 = vst.msk [vmem:[#allocation4 + $0xc8] sm:$0xff] %vm3780_vm4, %v3769_v17  ;;  %v3768_v47 = vmax.f32 %v3732_v18, 0.0  ;;  %v3735_v12 = vadd.f32 %v6187_v30, %v3304_v53  ;;  %v3311_v53 = vadd.f32 %v3268_v42, %v2880_v7  ;;  %v5769_v7 = vld [vmem:[%s8106_s5 + $0xf0] sm:$0x3f]  ;;  %v5768_v42 = vld [vmem:[%s8106_s5 + $0xe8] sm:$0xff] }
 0x36c   : > { %v3838_v4 = vld [vmem:[#allocation4 + $0xa0] ss:$2 sm:$0xff]  ;;  %v3874_v10 = vld [vmem:[#allocation4 + $0xa1] ss:$2 sm:$0xff]  ;;  %v3659_v54 = vpop.f32.mrf.mxu0 }
 0x36d   : > { %v3899_v57 = vmax.f32 %v3838_v4, %v3874_v10  ;;  %3805 = vst.msk [vmem:[#allocation4 + $0xc0] sm:$0xff] %vm3780_vm4, %v3768_v47  ;;  %v3771_v14 = vmax.f32 %v3735_v12, 0.0  ;;  %v3734_v13 = vadd.f32 %v3659_v54, %v3303_v9 }
 0x36e   : > { %v6190_v50 = vpop.f32.mrf.mxu0 }
 0x36f   : > { %3917 = vst.msk [vmem:[#allocation5 + $0x50] sm:$0xff] %vm3780_vm4, %v3899_v57  ;;  %3808 = vst.msk [vmem:[#allocation4 + $0xd8] sm:$0xff] %vm3780_vm4, %v3771_v14  ;;  %v3770_v58 = vmax.f32 %v3734_v13, 0.0  ;;  %v3737_v5 = vadd.f32 %v6190_v50, %v3306_v43  ;;  %v5747_v14 = vld [vmem:[%s8106_s5 + $0x70] sm:$0x3f]  ;;  %v5746_v50 = vld [vmem:[%s8106_s5 + $0x68] sm:$0xff] }
 0x370   : > { %v3840_v59 = vld [vmem:[#allocation4 + $0xb0] ss:$2 sm:$0xff]  ;;  %v3876_v52 = vld [vmem:[#allocation4 + $0xb1] ss:$2 sm:$0xff]  ;;  %v3669_v35 = vpop.f32.mrf.mxu0 }
 0x371   : > { %v3900_v1 = vmax.f32 %v3840_v59, %v3876_v52  ;;  %3807 = vst.msk [vmem:[#allocation4 + $0xd0] sm:$0xff] %vm3780_vm4, %v3770_v58  ;;  %v3773_v23 = vmax.f32 %v3737_v5, 0.0  ;;  %v3736_v39 = vadd.f32 %v3669_v35, %v3305_v15  ;;  %v5745_v15 = vld [vmem:[%s8106_s5 + $0x60] sm:$0xff]  ;;  %v8115_v58 = vmov 0.0   ;;  %v5743_v5 = vld [vmem:[%s8106_s5 + $0x50] sm:$0xff]  ;;  %v5742_v59 = vld [vmem:[%s8106_s5 + $0x48] sm:$0xff] }
 0x372   : > { %v6193_v16 = vpop.f32.mrf.mxu0  ;;  %v5856_v52 = vld [vmem:[%s8106_s5 + $0x2e8] sm:$0xff]  ;;  %v5741_v35 = vld [vmem:[%s8106_s5 + $0x40] sm:$0xff] }
 0x373   : > { %3918 = vst.msk [vmem:[#allocation5 + $0x58] sm:$0xff] %vm3780_vm4, %v3900_v1  ;;  %3810 = vst.msk [vmem:[#allocation4 + $0xe8] sm:$0xff] %vm3780_vm4, %v3773_v23  ;;  %v3772_v62 = vmax.f32 %v3736_v39, 0.0  ;;  %v3739_v28 = vadd.f32 %v6193_v16, %v3308_v61  ;;  %v5855_v61 = vld [vmem:[%s8106_s5 + $0x2e0] sm:$0xff]  ;;  %v5759_v1 = vld [vmem:[%s8106_s5 + $0xb8] sm:$0x3f] }
 0x374   : > { %v3842_v19 = vld [vmem:[#allocation4 + $0xc0] ss:$2 sm:$0xff]  ;;  %v3878_v37 = vld [vmem:[#allocation4 + $0xc1] ss:$2 sm:$0xff]  ;;  %v3679_v26 = vpop.f32.mrf.mxu0  ;;  %v5854_v23 = vld [vmem:[%s8106_s5 + $0x2d8] sm:$0xff] }
 0x375   : > { %v3901_v63 = vmax.f32 %v3842_v19, %v3878_v37  ;;  %3809 = vst.msk [vmem:[#allocation4 + $0xe0] sm:$0xff] %vm3780_vm4, %v3772_v62  ;;  %v3775_v2 = vmax.f32 %v3739_v28, 0.0  ;;  %v3738_v49 = vadd.f32 %v3679_v26, %v3307_v56  ;;  %v5758_v39 = vld [vmem:[%s8106_s5 + $0xb0] sm:$0x3f]  ;;  %v5757_v56 = vld [vmem:[%s8106_s5 + $0xa8] sm:$0xff]  ;;  %v5756_v28 = vld [vmem:[%s8106_s5 + $0xa0] sm:$0xff] }
 0x376   : > { %v6196_v25 = vpop.f32.mrf.mxu0  ;;  %v5853_v16 = vld [vmem:[%s8106_s5 + $0x2d0] sm:$0xff]  ;;  %v5852_v62 = vld [vmem:[%s8106_s5 + $0x2c8] sm:$0xff] }
 0x377   : > { %3919 = vst.msk [vmem:[#allocation5 + $0x60] sm:$0xff] %vm3780_vm4, %v3901_v63  ;;  %3812 = vst.msk [vmem:[#allocation4 + $0xf8] sm:$0xff] %vm3780_vm4, %v3775_v2  ;;  %v3774_v0 = vmax.f32 %v3738_v49, 0.0  ;;  %v3741_v51 = vadd.f32 %v6196_v25, %v3310_v22  ;;  %v5755_v22 = vld [vmem:[%s8106_s5 + $0x98] sm:$0xff]  ;;  %v5754_v19 = vld [vmem:[%s8106_s5 + $0x90] sm:$0xff] }
 0x378   : > { %v3844_v48 = vld [vmem:[#allocation4 + $0xd0] ss:$2 sm:$0xff]  ;;  %v3880_v45 = vld [vmem:[#allocation4 + $0xd1] ss:$2 sm:$0xff]  ;;  %v3689_v36 = vpop.f32.mrf.mxu0  ;;  %v5878_v63 = vld [vmem:[%s8106_s5 + $0x368] sm:$0xff] }
 0x379   : > { %v3902_v21 = vmax.f32 %v3844_v48, %v3880_v45  ;;  %3811 = vst.msk [vmem:[#allocation4 + $0xf0] sm:$0xff] %vm3780_vm4, %v3774_v0  ;;  %v3777_v33 = vmax.f32 %v3741_v51, 0.0  ;;  %v3740_v3 = vadd.f32 %v3689_v36, %v3309_v41  ;;  %v5879_v26 = vld [vmem:[%s8106_s5 + $0x370] sm:$0x3f]  ;;  %v5752_v2 = vld [vmem:[%s8106_s5 + $0x80] sm:$0xff]  ;;  %v5876_v41 = vld [vmem:[%s8106_s5 + $0x358] sm:$0xff] }
 0x37a   : > { %v6199_v24 = vpop.f32.mrf.mxu0  ;;  %v5877_v49 = vld [vmem:[%s8106_s5 + $0x360] sm:$0xff]  ;;  %v5770_v25 = vld [vmem:[%s8106_s5 + $0xf8] sm:$0x3f]  ;;  %v5875_v51 = vld [vmem:[%s8106_s5 + $0x350] sm:$0xff] }
 0x37b   : > { %3920 = vst.msk [vmem:[#allocation5 + $0x68] sm:$0xff] %vm3780_vm4, %v3902_v21  ;;  %3814 = vst.msk [vmem:[#allocation4 + $0x108] sm:$0xff] %vm3780_vm4, %v3777_v33  ;;  %v3776_v44 = vmax.f32 %v3740_v3, 0.0  ;;  %v3743_v29 = vadd.f32 %v6199_v24, %v3312_v6  ;;  %v5874_v48 = vld [vmem:[%s8106_s5 + $0x348] sm:$0xff]  ;;  %v5767_v45 = vld [vmem:[%s8106_s5 + $0xe0] sm:$0xff] }
 0x37c   : > { %v3846_v34 = vld [vmem:[#allocation4 + $0xe0] ss:$2 sm:$0xff]  ;;  %v3882_v17 = vld [vmem:[#allocation4 + $0xe1] ss:$2 sm:$0xff]  ;;  %v3699_v18 = vpop.f32.mrf.mxu0  ;;  %v5766_v6 = vld [vmem:[%s8106_s5 + $0xd8] sm:$0xff] }
 0x37d   : > { %v3903_v46 = vmax.f32 %v3846_v34, %v3882_v17  ;;  %3813 = vst.msk [vmem:[#allocation4 + $0x100] sm:$0xff] %vm3780_vm4, %v3776_v44  ;;  %v3779_v30 = vmax.f32 %v3743_v29, 0.0  ;;  %v3742_v9 = vadd.f32 %v3699_v18, %v3311_v53  ;;  %v5873_v36 = vld [vmem:[%s8106_s5 + $0x340] sm:$0xff]  ;;  %v5902_v21 = vld [vmem:[%s8106_s5 + $0x3f8] sm:$0x3f]  ;;  %v5765_v33 = vld [vmem:[%s8106_s5 + $0xd0] sm:$0xff] }
 0x37e   : > { %v5901_v24 = vld [vmem:[%s8106_s5 + $0x3f0] sm:$0x3f]  ;;  %v5764_v53 = vld [vmem:[%s8106_s5 + $0xc8] sm:$0xff]  ;;  %v5763_v29 = vld [vmem:[%s8106_s5 + $0xc0] sm:$0xff] }
 0x37f   : > { %3921 = vst.msk [vmem:[#allocation5 + $0x70] sm:$0xff] %vm3780_vm4, %v3903_v46  ;;  %v3778_v8 = vmax.f32 %v3742_v9, 0.0  ;;  %v5900_v44 = vld [vmem:[%s8106_s5 + $0x3e8] sm:$0xff]  ;;  %v5899_v34 = vld [vmem:[%s8106_s5 + $0x3e0] sm:$0xff]  ;;  %v5781_v17 = vld [vmem:[%s8106_s5 + $0x138] sm:$0x3f] }
 0x380   : > { %3817 = vst.msk [vmem:[#allocation4 + $0x118] sm:$0xf] %vm3816_vm5, %v3779_v30  ;;  %v3848_v47 = vld [vmem:[#allocation4 + $0xf0] ss:$2 sm:$0xff]  ;;  %v3884_v12 = vld [vmem:[#allocation4 + $0xf1] ss:$2 sm:$0xff] }
 0x381   : > { %v3904_v32 = vmax.f32 %v3848_v47, %v3884_v12  ;;  %3815 = vst.msk [vmem:[#allocation4 + $0x110] sm:$0xff] %vm3780_vm4, %v3778_v8  ;;  %v5898_v18 = vld [vmem:[%s8106_s5 + $0x3d8] sm:$0xff]  ;;  %v5780_v46 = vld [vmem:[%s8106_s5 + $0x130] sm:$0x3f]  ;;  %v5779_v8 = vld [vmem:[%s8106_s5 + $0x128] sm:$0xff] }
 0x382   : > { %v5897_v9 = vld [vmem:[%s8106_s5 + $0x3d0] sm:$0xff]  ;;  %v5896_v47 = vld [vmem:[%s8106_s5 + $0x3c8] sm:$0xff]  ;;  %v5778_v12 = vld [vmem:[%s8106_s5 + $0x120] sm:$0xff] }
 0x383   : > { %3922 = vst.msk [vmem:[#allocation5 + $0x78] sm:$0xff] %vm3780_vm4, %v3904_v32  ;;  %v5895_v32 = vld [vmem:[%s8106_s5 + $0x3c0] sm:$0xff] }
 0x384   : > { %v3850_v20 = vld [vmem:[#allocation4 + $0x100] ss:$2 sm:$0xff]  ;;  %v3886_v4 = vld [vmem:[#allocation4 + $0x101] ss:$2 sm:$0xff] }
 0x385   : > { %v3905_v10 = vmax.f32 %v3850_v20, %v3886_v4  ;;  %v5777_v20 = vld [vmem:[%s8106_s5 + $0x118] sm:$0xff]  ;;  %v5776_v4 = vld [vmem:[%s8106_s5 + $0x110] sm:$0xff] }
 0x387   : > { %3923 = vst.msk [vmem:[#allocation5 + $0x80] sm:$0xff] %vm3780_vm4, %v3905_v10 }
 0x388   : > { %v3852_v54 = vld [vmem:[#allocation4 + $0x110] ss:$2 sm:$0x3f]  ;;  %v3888_v43 = vld [vmem:[#allocation4 + $0x111] ss:$2 sm:$0x3f] }
 0x389   : > { %v3906_v57 = vmax.f32 %v3852_v54, %v3888_v43  ;;  %v5775_v54 = vld [vmem:[%s8106_s5 + $0x108] sm:$0xff]  ;;  %v5774_v43 = vld [vmem:[%s8106_s5 + $0x100] sm:$0xff] }
 0x38a   : > { %v3927_v13 = vld [vmem:[#allocation5] ss:$18 sm:$0xff]  ;;  %v4031_v60 = vld [vmem:[#allocation5 + $0x1] ss:$18 sm:$0xff] }
 0x38b   : > { %5740 = vmatmul.mubr.msk.f32.vlgmr.msra.gmra.mxu1 %vm3780_vm4, %v3927_v13  ;;  %3925 = vst.msk [vmem:[#allocation5 + $0x88] sm:$0x3f] %vm3924_vm6, %v3906_v57  ;;  %v5792_v57 = vld [vmem:[%s8106_s5 + $0x178] sm:$0x3f] }
 0x38c   : > { %5750 = vmatpush1.msk.msra.mxu1 %vm3939_vm3, %v5747_v14  ;;  %4114 = vmatprep.mubr.f32.mxu1 %v8115_v58  ;;  %v5791_v14 = vld [vmem:[%s8106_s5 + $0x170] sm:$0x3f] }
 0x38d   : > { %4076 = vmatprep.subr.mxu1 %v5746_v50  ;;  %v5790_v50 = vld [vmem:[%s8106_s5 + $0x168] sm:$0xff] }
 0x38e   : > { %4077 = vmatpush1.msra.mxu1 %v5745_v15  ;;  %v4775_v27 = vld [vmem:[#allocation5 + $0x9] ss:$18 sm:$0xff]  ;;  %v4124_v0 = vld [vmem:[#allocation5 + $0x2] ss:$18 sm:$0xff] }
 0x38f   : > { %4078 = vmatprep.subr.mxu1 %v5744_v38  ;;  %5839 = vmatmul.mubr.msk.f32.vlgmr.msra.gmra.mxu0 %vm3780_vm4, %v4775_v27  ;;  %v4217_v30 = vld [vmem:[#allocation5 + $0x3] ss:$18 sm:$0xff]  ;;  %v4310_v13 = vld [vmem:[#allocation5 + $0x4] ss:$18 sm:$0xff] }
 0x390   : > { %4079 = vmatpush1.msra.mxu1 %v5743_v5  ;;  %5860 = vmatpush1.msk.msra.mxu0 %vm3939_vm3, %v5857_v55  ;;  %v5789_v15 = vld [vmem:[%s8106_s5 + $0x160] sm:$0xff]  ;;  %v5788_v38 = vld [vmem:[%s8106_s5 + $0x158] sm:$0xff]  ;;  %v5787_v5 = vld [vmem:[%s8106_s5 + $0x150] sm:$0xff] }
 0x391   : > { %4080 = vmatprep.subr.mxu1 %v5742_v59  ;;  %5006 = vmatprep.subr.mxu0 %v5856_v52  ;;  %v5786_v55 = vld [vmem:[%s8106_s5 + $0x148] sm:$0xff]  ;;  %v5785_v27 = vld [vmem:[%s8106_s5 + $0x140] sm:$0xff]  ;;  %v5803_v59 = vld [vmem:[%s8106_s5 + $0x1b8] sm:$0x3f] }
 0x392   : > { %4081 = vmatpush1.msra.mxu1 %v5741_v35  ;;  %5007 = vmatpush1.msra.mxu0 %v5855_v61  ;;  %v4961_v37 = vld [vmem:[#allocation5 + $0xb] ss:$18 sm:$0xff] }
 0x393   : > { %5751 = vmatmul.mubr.msk.f32.vlgmr.msra.gmra.mxu1 %vm3780_vm4, %v4031_v60  ;;  %5760 = vmatprep.subr.msk.mxu1 %vm3939_vm3, %v5759_v1  ;;  %v5147_v3 = vld [vmem:[#allocation5 + $0xd] ss:$18 sm:$0xff] }
 0x394   : > { %5008 = vmatprep.subr.mxu0 %v5854_v23  ;;  %5761 = vmatpush1.msk.msra.mxu1 %vm3939_vm3, %v5758_v39  ;;  %v5333_v10 = vld [vmem:[#allocation5 + $0xf] ss:$18 sm:$0xff] }
 0x395   : > { %5009 = vmatpush1.msra.mxu0 %v5853_v16  ;;  %4169 = vmatprep.subr.mxu1 %v5757_v56  ;;  %v5802_v52 = vld [vmem:[%s8106_s5 + $0x1b0] sm:$0x3f]  ;;  %v5801_v61 = vld [vmem:[%s8106_s5 + $0x1a8] sm:$0xff]  ;;  %v5800_v1 = vld [vmem:[%s8106_s5 + $0x1a0] sm:$0xff] }
 0x396   : > { %5010 = vmatprep.subr.mxu0 %v5852_v62  ;;  %4170 = vmatpush1.msra.mxu1 %v5756_v28  ;;  %v4403_v35 = vld [vmem:[#allocation5 + $0x5] ss:$18 sm:$0xff]  ;;  %v4496_v28 = vld [vmem:[#allocation5 + $0x6] ss:$18 sm:$0xff] }
 0x397   : > { %5011 = vmatpush1.msra.mxu0 %v5851_v40  ;;  %5044 = vmatprep.mubr.f32.mxu0 %v8115_v58  ;;  %v5799_v23 = vld [vmem:[%s8106_s5 + $0x198] sm:$0xff]  ;;  %v5798_v39 = vld [vmem:[%s8106_s5 + $0x190] sm:$0xff]  ;;  %v5797_v60 = vld [vmem:[%s8106_s5 + $0x188] sm:$0xff] }
 0x398   : > { %4171 = vmatprep.subr.mxu1 %v5755_v22  ;;  %5861 = vmatmul.mubr.msk.f32.vlgmr.msra.gmra.mxu0 %vm3780_vm4, %v4961_v37  ;;  %v5796_v16 = vld [vmem:[%s8106_s5 + $0x180] sm:$0xff]  ;;  %v5814_v56 = vld [vmem:[%s8106_s5 + $0x1f8] sm:$0x3f]  ;;  %v5813_v62 = vld [vmem:[%s8106_s5 + $0x1f0] sm:$0x3f] }
 0x399   : > { %5881 = vmatprep.subr.msk.mxu0 %vm3939_vm3, %v5880_v11  ;;  %4172 = vmatpush1.msra.mxu1 %v5754_v19  ;;  %v5812_v40 = vld [vmem:[%s8106_s5 + $0x1e8] sm:$0xff]  ;;  %v5811_v22 = vld [vmem:[%s8106_s5 + $0x1e0] sm:$0xff]  ;;  %v5810_v11 = vld [vmem:[%s8106_s5 + $0x1d8] sm:$0xff] }
 0x39a   : > { %5882 = vmatpush1.msk.msra.mxu0 %vm3939_vm3, %v5879_v26  ;;  %4173 = vmatprep.subr.mxu1 %v5753_v31  ;;  %v5809_v19 = vld [vmem:[%s8106_s5 + $0x1d0] sm:$0xff]  ;;  %v5808_v37 = vld [vmem:[%s8106_s5 + $0x1c8] sm:$0xff]  ;;  %v5807_v26 = vld [vmem:[%s8106_s5 + $0x1c0] sm:$0xff] }
 0x39b   : > { %5192 = vmatprep.subr.mxu0 %v5878_v63  ;;  %4174 = vmatpush1.msra.mxu1 %v5752_v2  ;;  %v5825_v31 = vld [vmem:[%s8106_s5 + $0x238] sm:$0x3f]  ;;  %v5824_v63 = vld [vmem:[%s8106_s5 + $0x230] sm:$0x3f] }
 0x39c   : > { %4207 = vmatprep.mubr.f32.mxu1 %v8115_v58  ;;  %5193 = vmatpush1.msra.mxu0 %v5877_v49  ;;  %v4589_v2 = vld [vmem:[#allocation5 + $0x7] ss:$18 sm:$0xff] }
 0x39d   : > { %5762 = vmatmul.mubr.msk.f32.vlgmr.msra.gmra.mxu1 %vm3780_vm4, %v4124_v0  ;;  %5771 = vmatprep.subr.msk.mxu1 %vm3939_vm3, %v5770_v25  ;;  %v5823_v49 = vld [vmem:[%s8106_s5 + $0x228] sm:$0xff]  ;;  %v5822_v25 = vld [vmem:[%s8106_s5 + $0x220] sm:$0xff] }
 0x39e   : > { %5194 = vmatprep.subr.mxu0 %v5876_v41  ;;  %5772 = vmatpush1.msk.msra.mxu1 %vm3939_vm3, %v5769_v7  ;;  %v5821_v41 = vld [vmem:[%s8106_s5 + $0x218] sm:$0xff]  ;;  %v5820_v7 = vld [vmem:[%s8106_s5 + $0x210] sm:$0xff]  ;;  %v5819_v0 = vld [vmem:[%s8106_s5 + $0x208] sm:$0xff] }
 0x39f   : > { %5195 = vmatpush1.msra.mxu0 %v5875_v51  ;;  %4262 = vmatprep.subr.mxu1 %v5768_v42  ;;  %v5818_v51 = vld [vmem:[%s8106_s5 + $0x200] sm:$0xff]  ;;  %v5847_v42 = vld [vmem:[%s8106_s5 + $0x2b8] sm:$0x3f] }
 0x3a0   : > { %5196 = vmatprep.subr.mxu0 %v5874_v48  ;;  %4263 = vmatpush1.msra.mxu1 %v5767_v45  ;;  %v5846_v48 = vld [vmem:[%s8106_s5 + $0x2b0] sm:$0x3f] }
 0x3a1   : > { %5197 = vmatpush1.msra.mxu0 %v5873_v36  ;;  %5230 = vmatprep.mubr.f32.mxu0 %v8115_v58  ;;  %v4682_v45 = vld [vmem:[#allocation5 + $0x8] ss:$18 sm:$0xff] }
 0x3a2   : > { %4264 = vmatprep.subr.mxu1 %v5766_v6  ;;  %5883 = vmatmul.mubr.msk.f32.vlgmr.msra.gmra.mxu0 %vm3780_vm4, %v5147_v3  ;;  %v5845_v36 = vld [vmem:[%s8106_s5 + $0x2a8] sm:$0xff]  ;;  %v5844_v6 = vld [vmem:[%s8106_s5 + $0x2a0] sm:$0xff] }
 0x3a3   : > { %5903 = vmatprep.subr.msk.mxu0 %vm3939_vm3, %v5902_v21  ;;  %4265 = vmatpush1.msra.mxu1 %v5765_v33  ;;  %v5843_v21 = vld [vmem:[%s8106_s5 + $0x298] sm:$0xff]  ;;  %v5842_v33 = vld [vmem:[%s8106_s5 + $0x290] sm:$0xff]  ;;  %v5841_v3 = vld [vmem:[%s8106_s5 + $0x288] sm:$0xff] }
 0x3a4   : > { %5904 = vmatpush1.msk.msra.mxu0 %vm3939_vm3, %v5901_v24  ;;  %4266 = vmatprep.subr.mxu1 %v5764_v53  ;;  %v5840_v24 = vld [vmem:[%s8106_s5 + $0x280] sm:$0xff]  ;;  %v5869_v53 = vld [vmem:[%s8106_s5 + $0x338] sm:$0x3f] }
 0x3a5   : > { %5378 = vmatprep.subr.mxu0 %v5900_v44  ;;  %4267 = vmatpush1.msra.mxu1 %v5763_v29  ;;  %v5868_v44 = vld [vmem:[%s8106_s5 + $0x330] sm:$0x3f] }
 0x3a6   : > { %4300 = vmatprep.mubr.f32.mxu1 %v8115_v58  ;;  %5379 = vmatpush1.msra.mxu0 %v5899_v34  ;;  %v4868_v29 = vld [vmem:[#allocation5 + $0xa] ss:$18 sm:$0xff] }
 0x3a7   : > { %5773 = vmatmul.mubr.msk.f32.vlgmr.msra.gmra.mxu1 %vm3780_vm4, %v4217_v30  ;;  %5782 = vmatprep.subr.msk.mxu1 %vm3939_vm3, %v5781_v17  ;;  %v5867_v34 = vld [vmem:[%s8106_s5 + $0x328] sm:$0xff]  ;;  %v5866_v17 = vld [vmem:[%s8106_s5 + $0x320] sm:$0xff] }
 0x3a8   : > { %5380 = vmatprep.subr.mxu0 %v5898_v18  ;;  %5783 = vmatpush1.msk.msra.mxu1 %vm3939_vm3, %v5780_v46  ;;  %v5865_v18 = vld [vmem:[%s8106_s5 + $0x318] sm:$0xff]  ;;  %v5864_v46 = vld [vmem:[%s8106_s5 + $0x310] sm:$0xff]  ;;  %v5863_v30 = vld [vmem:[%s8106_s5 + $0x308] sm:$0xff] }
 0x3a9   : > { %5381 = vmatpush1.msra.mxu0 %v5897_v9  ;;  %4355 = vmatprep.subr.mxu1 %v5779_v8  ;;  %v5862_v9 = vld [vmem:[%s8106_s5 + $0x300] sm:$0xff]  ;;  %v5891_v8 = vld [vmem:[%s8106_s5 + $0x3b8] sm:$0x3f] }
 0x3aa   : > { %5382 = vmatprep.subr.mxu0 %v5896_v47  ;;  %4356 = vmatpush1.msra.mxu1 %v5778_v12  ;;  %v5890_v47 = vld [vmem:[%s8106_s5 + $0x3b0] sm:$0x3f] }
 0x3ab   : > { %5383 = vmatpush1.msra.mxu0 %v5895_v32  ;;  %5416 = vmatprep.mubr.f32.mxu0 %v8115_v58  ;;  %v5054_v12 = vld [vmem:[#allocation5 + $0xc] ss:$18 sm:$0xff] }
 0x3ac   : > { %4357 = vmatprep.subr.mxu1 %v5777_v20  ;;  %5905 = vmatmul.mubr.msk.f32.vlgmr.msra.gmra.mxu0 %vm3780_vm4, %v5333_v10  ;;  %v5889_v32 = vld [vmem:[%s8106_s5 + $0x3a8] sm:$0xff]  ;;  %v5888_v20 = vld [vmem:[%s8106_s5 + $0x3a0] sm:$0xff]  ;;  %v5886_v10 = vld [vmem:[%s8106_s5 + $0x390] sm:$0xff] }
 0x3ad   : > { %4358 = vmatpush1.msra.mxu1 %v5776_v4  ;;  %4393 = vmatprep.mubr.f32.mxu1 %v8115_v58  ;;  %v5887_v4 = vld [vmem:[%s8106_s5 + $0x398] sm:$0xff] }
 0x3ae   : > { %4359 = vmatprep.subr.mxu1 %v5775_v54  ;;  %v5885_v54 = vld [vmem:[%s8106_s5 + $0x388] sm:$0xff] }
 0x3af   : > { %4360 = vmatpush1.msra.mxu1 %v5774_v43  ;;  %v5884_v43 = vld [vmem:[%s8106_s5 + $0x380] sm:$0xff] }
 0x3b0   : > { %5784 = vmatmul.mubr.msk.f32.vlgmr.msra.gmra.mxu1 %vm3780_vm4, %v4310_v13  ;;  %5793 = vmatprep.subr.msk.mxu1 %vm3939_vm3, %v5792_v57  ;;  %v5240_v57 = vld [vmem:[#allocation5 + $0xe] ss:$18 sm:$0xff] }
 0x3b1   : > { %5794 = vmatpush1.msk.msra.mxu1 %vm3939_vm3, %v5791_v14  ;;  %4486 = vmatprep.mubr.f32.mxu1 %v8115_v58  ;;  %v5442_v14 = vld [vmem:[%s8108_s7 + $0x78] sm:$0xff]  ;;  %v5441_v13 = vld [vmem:[%s8108_s7 + $0x70] sm:$0xff] }
 0x3b2   : > { %4448 = vmatprep.subr.mxu1 %v5790_v50  ;;  %v5440_v50 = vld [vmem:[%s8108_s7 + $0x68] sm:$0xff] }
 0x3b3   : > { %4449 = vmatpush1.msra.mxu1 %v5789_v15  ;;  %v5439_v15 = vld [vmem:[%s8108_s7 + $0x60] sm:$0xff] }
 0x3b4   : > { %4450 = vmatprep.subr.mxu1 %v5788_v38  ;;  %v5438_v38 = vld [vmem:[%s8108_s7 + $0x58] sm:$0xff] }
 0x3b5   : > { %4451 = vmatpush1.msra.mxu1 %v5787_v5  ;;  %v5437_v5 = vld [vmem:[%s8108_s7 + $0x50] sm:$0xff] }
 0x3b6   : > { %4452 = vmatprep.subr.mxu1 %v5786_v55  ;;  %v5436_v55 = vld [vmem:[%s8108_s7 + $0x48] sm:$0xff] }
 0x3b7   : > { %4453 = vmatpush1.msra.mxu1 %v5785_v27  ;;  %v5435_v27 = vld [vmem:[%s8108_s7 + $0x40] sm:$0xff] }
 0x3b8   : > { %5795 = vmatmul.mubr.msk.f32.vlgmr.msra.gmra.mxu1 %vm3780_vm4, %v4403_v35  ;;  %5804 = vmatprep.subr.msk.mxu1 %vm3939_vm3, %v5803_v59  ;;  %v5434_v59 = vld [vmem:[%s8108_s7 + $0x38] sm:$0xff]  ;;  %v5432_v35 = vld [vmem:[%s8108_s7 + $0x28] sm:$0xff] }
 0x3b9   : > { %5805 = vmatpush1.msk.msra.mxu1 %vm3939_vm3, %v5802_v52  ;;  %4579 = vmatprep.mubr.f32.mxu1 %v8115_v58  ;;  %v5433_v52 = vld [vmem:[%s8108_s7 + $0x30] sm:$0xff] }
 0x3ba   : > { %4541 = vmatprep.subr.mxu1 %v5801_v61  ;;  %v5431_v61 = vld [vmem:[%s8108_s7 + $0x20] sm:$0xff] }
 0x3bb   : > { %4542 = vmatpush1.msra.mxu1 %v5800_v1  ;;  %v5430_v1 = vld [vmem:[%s8108_s7 + $0x18] sm:$0xff] }
 0x3bc   : > { %4543 = vmatprep.subr.mxu1 %v5799_v23  ;;  %v5429_v23 = vld [vmem:[%s8108_s7 + $0x10] sm:$0xff] }
 0x3bd   : > { %4544 = vmatpush1.msra.mxu1 %v5798_v39  ;;  %v5428_v39 = vld [vmem:[%s8108_s7 + $0x8] sm:$0xff] }
 0x3be   : > { %4545 = vmatprep.subr.mxu1 %v5797_v60  ;;  %v5427_v60 = vld [vmem:[%s8108_s7] sm:$0xff] }
 0x3bf   : > { %4546 = vmatpush1.msra.mxu1 %v5796_v16  ;;  %v5456_v16 = vld [vmem:[%s8108_s7 + $0xe8] sm:$0xff] }
 0x3c0   : > { %5806 = vmatmul.mubr.msk.f32.vlgmr.msra.gmra.mxu1 %vm3780_vm4, %v4496_v28  ;;  %5815 = vmatprep.subr.msk.mxu1 %vm3939_vm3, %v5814_v56  ;;  %v5455_v56 = vld [vmem:[%s8108_s7 + $0xe0] sm:$0xff]  ;;  %v5453_v28 = vld [vmem:[%s8108_s7 + $0xd0] sm:$0xff] }
 0x3c1   : > { %5816 = vmatpush1.msk.msra.mxu1 %vm3939_vm3, %v5813_v62  ;;  %4672 = vmatprep.mubr.f32.mxu1 %v8115_v58  ;;  %v5454_v62 = vld [vmem:[%s8108_s7 + $0xd8] sm:$0xff] }
 0x3c2   : > { %4634 = vmatprep.subr.mxu1 %v5812_v40  ;;  %v5452_v40 = vld [vmem:[%s8108_s7 + $0xc8] sm:$0xff] }
 0x3c3   : > { %4635 = vmatpush1.msra.mxu1 %v5811_v22  ;;  %v5451_v22 = vld [vmem:[%s8108_s7 + $0xc0] sm:$0xff] }
 0x3c4   : > { %4636 = vmatprep.subr.mxu1 %v5810_v11  ;;  %v5450_v11 = vld [vmem:[%s8108_s7 + $0xb8] sm:$0xff] }
 0x3c5   : > { %4637 = vmatpush1.msra.mxu1 %v5809_v19  ;;  %v5449_v19 = vld [vmem:[%s8108_s7 + $0xb0] sm:$0xff] }
 0x3c6   : > { %4638 = vmatprep.subr.mxu1 %v5808_v37  ;;  %v5448_v37 = vld [vmem:[%s8108_s7 + $0xa8] sm:$0xff] }
 0x3c7   : > { %4639 = vmatpush1.msra.mxu1 %v5807_v26  ;;  %v5447_v26 = vld [vmem:[%s8108_s7 + $0xa0] sm:$0xff] }
 0x3c8   : > { %5817 = vmatmul.mubr.msk.f32.vlgmr.msra.gmra.mxu1 %vm3780_vm4, %v4589_v2  ;;  %5826 = vmatprep.subr.msk.mxu1 %vm3939_vm3, %v5825_v31  ;;  %v5446_v31 = vld [vmem:[%s8108_s7 + $0x98] sm:$0xff]  ;;  %v5444_v2 = vld [vmem:[%s8108_s7 + $0x88] sm:$0xff] }
 0x3c9   : > { %5827 = vmatpush1.msk.msra.mxu1 %vm3939_vm3, %v5824_v63  ;;  %4765 = vmatprep.mubr.f32.mxu1 %v8115_v58  ;;  %v5445_v63 = vld [vmem:[%s8108_s7 + $0x90] sm:$0xff] }
 0x3ca   : > { %4727 = vmatprep.subr.mxu1 %v5823_v49  ;;  %v5443_v49 = vld [vmem:[%s8108_s7 + $0x80] sm:$0xff] }
 0x3cb   : > { %4728 = vmatpush1.msra.mxu1 %v5822_v25 }
 0x3cc   : > { %4729 = vmatprep.subr.mxu1 %v5821_v41 }
 0x3cd   : > { %4730 = vmatpush1.msra.mxu1 %v5820_v7 }
 0x3ce   : > { %4731 = vmatprep.subr.mxu1 %v5819_v0 }
 0x3cf   : > { %4732 = vmatpush1.msra.mxu1 %v5818_v51 }
 0x3d0   : > { %5828 = vmatmul.mubr.msk.f32.vlgmr.msra.gmra.mxu1 %vm3780_vm4, %v4682_v45  ;;  %5848 = vmatprep.subr.msk.mxu1 %vm3939_vm3, %v5847_v42  ;;  %v4018_v45 = vlaneseq }
 0x3d1   : > { %5849 = vmatpush1.msk.msra.mxu1 %vm3939_vm3, %v5846_v48  ;;  %4951 = vmatprep.mubr.f32.mxu1 %v8115_v58 }
 0x3d2   : > { %4913 = vmatprep.subr.mxu1 %v5845_v36 }
 0x3d3   : > { %4914 = vmatpush1.msra.mxu1 %v5844_v6 }
 0x3d4   : > { %4915 = vmatprep.subr.mxu1 %v5843_v21  ;;  %v4019_v21 = vshrl.u32 %v4018_v45, 7 }
 0x3d5   : > { %4916 = vmatpush1.msra.mxu1 %v5842_v33 }
 0x3d6   : > { %4917 = vmatprep.subr.mxu1 %v5841_v3  ;;  %v4020_v3 = vsub.s32 0, %v4019_v21 }
 0x3d7   : > { %4918 = vmatpush1.msra.mxu1 %v5840_v24  ;;  %v3926_v24 = vld [vmem:[%s8107_s6] sm:$0x3] }
 0x3d8   : > { %5850 = vmatmul.mubr.msk.f32.vlgmr.msra.gmra.mxu1 %vm3780_vm4, %v4868_v29  ;;  %5870 = vmatprep.subr.msk.mxu1 %vm3939_vm3, %v5869_v53 }
 0x3d9   : > { %5871 = vmatpush1.msk.msra.mxu1 %vm3939_vm3, %v5868_v44  ;;  %5137 = vmatprep.mubr.f32.mxu1 %v8115_v58  ;;  %v4021_v44 = vrot.slane %v3926_v24, %v4020_v3 }
 0x3da   : > { %5099 = vmatprep.subr.mxu1 %v5867_v34 }
 0x3db   : > { %5100 = vmatpush1.msra.mxu1 %v5866_v17 }
 0x3dc   : > { %5101 = vmatprep.subr.mxu1 %v5865_v18 }
 0x3dd   : > { %5102 = vmatpush1.msra.mxu1 %v5864_v46 }
 0x3de   : > { %5103 = vmatprep.subr.mxu1 %v5863_v30 }
 0x3df   : > { %5104 = vmatpush1.msra.mxu1 %v5862_v9 }
 0x3e0   : > { %5872 = vmatmul.mubr.msk.f32.vlgmr.msra.gmra.mxu1 %vm3780_vm4, %v5054_v12  ;;  %5892 = vmatprep.subr.msk.mxu1 %vm3939_vm3, %v5891_v8 }
 0x3e1   : > { %5893 = vmatpush1.msk.msra.mxu1 %vm3939_vm3, %v5890_v47  ;;  %5323 = vmatprep.mubr.f32.mxu1 %v8115_v58 }
 0x3e2   : > { %5285 = vmatprep.subr.mxu1 %v5889_v32 }
 0x3e3   : > { %5286 = vmatpush1.msra.mxu1 %v5888_v20 }
 0x3e4   : > { %5287 = vmatprep.subr.mxu1 %v5887_v4 }
 0x3e5   : > { %5288 = vmatpush1.msra.mxu1 %v5886_v10 }
 0x3e6   : > { %5289 = vmatprep.subr.mxu1 %v5885_v54 }
 0x3e7   : > { %5290 = vmatpush1.msra.mxu1 %v5884_v43 }
 0x3e8   : > { %5894 = vmatmul.mubr.msk.f32.vlgmr.msra.gmra.mxu1 %vm3780_vm4, %v5240_v57  ;;  %5468 = vmatprep.subr.mxu1 %v8115_v58 }
 0x3e9   : > { %5469 = vmatpush1.msra.mxu1 %v5442_v14 }
 0x3ea   : > { %5470 = vmatprep.subr.mxu1 %v8115_v58 }
 0x3eb   : > { %5471 = vmatpush1.msra.mxu1 %v5441_v13 }
 0x3ec   : > { %5472 = vmatprep.subr.mxu1 %v8115_v58 }
 0x3ed   : > { %5473 = vmatpush1.msra.mxu1 %v5440_v50 }
 0x3ee   : > { %5474 = vmatprep.subr.mxu1 %v8115_v58 }
 0x3ef   : > { %5475 = vmatpush1.msra.mxu1 %v5439_v15 }
 0x3f0   : > { %5476 = vmatprep.subr.mxu1 %v8115_v58 }
 0x3f1   : > { %5477 = vmatpush1.msra.mxu1 %v5438_v38 }
 0x3f2   : > { %5478 = vmatprep.subr.mxu1 %v8115_v58 }
 0x3f3   : > { %5479 = vmatpush1.msra.mxu1 %v5437_v5 }
 0x3f4   : > { %5480 = vmatprep.subr.mxu1 %v8115_v58 }
 0x3f5   : > { %5481 = vmatpush1.msra.mxu1 %v5436_v55 }
 0x3f6   : > { %5482 = vmatprep.subr.mxu1 %v8115_v58 }
 0x3f7   : > { %5483 = vmatpush1.msra.mxu1 %v5435_v27 }
 0x3f8   : > { %5484 = vmatprep.subr.mxu1 %v8115_v58 }
 0x3f9   : > { %5485 = vmatpush1.msra.mxu1 %v5434_v59 }
 0x3fa   : > { %5486 = vmatprep.subr.mxu1 %v8115_v58 }
 0x3fb   : > { %5487 = vmatpush1.msra.mxu1 %v5433_v52 }
 0x3fc   : > { %5488 = vmatprep.subr.mxu1 %v8115_v58 }
 0x3fd   : > { %5489 = vmatpush1.msra.mxu1 %v5432_v35 }
 0x3fe   : > { %5490 = vmatprep.subr.mxu1 %v8115_v58 }
 0x3ff   : > { %5491 = vmatpush1.msra.mxu1 %v5431_v61 }
 0x400   : > { %5492 = vmatprep.subr.mxu1 %v8115_v58 }
 0x401   : > { %5493 = vmatpush1.msra.mxu1 %v5430_v1 }
 0x402   : > { %5494 = vmatprep.subr.mxu1 %v8115_v58 }
 0x403   : > { %5495 = vmatpush1.msra.mxu1 %v5429_v23 }
 0x404   : > { %5496 = vmatprep.subr.mxu1 %v8115_v58 }
 0x405   : > { %5497 = vmatpush1.msra.mxu1 %v5428_v39 }
 0x406   : > { %5498 = vmatprep.subr.mxu1 %v8115_v58 }
 0x407   : > { %5499 = vmatpush1.msra.mxu1 %v5427_v60 }
 0x408   : > { %5504 = vmatprep.subr.mxu1 %v8115_v58 }
 0x409   : > { %5505 = vmatpush2.msra.mxu1 %v5456_v16 }
 0x40a   : > { %5506 = vmatprep.subr.mxu1 %v8115_v58 }
 0x40b   : > { %5507 = vmatpush2.msra.mxu1 %v5455_v56 }
 0x40c   : > { %5508 = vmatprep.subr.mxu1 %v8115_v58 }
 0x40d   : > { %5509 = vmatpush2.msra.mxu1 %v5454_v62 }
 0x40e   : > { %5510 = vmatprep.subr.mxu1 %v8115_v58 }
 0x40f   : > { %5511 = vmatpush2.msra.mxu1 %v5453_v28 }
 0x410   : > { %5512 = vmatprep.subr.mxu1 %v8115_v58 }
 0x411   : > { %5513 = vmatpush2.msra.mxu1 %v5452_v40 }
 0x412   : > { %5514 = vmatprep.subr.mxu1 %v8115_v58 }
 0x413   : > { %5515 = vmatpush2.msra.mxu1 %v5451_v22 }
 0x414   : > { %5516 = vmatprep.subr.mxu1 %v8115_v58 }
 0x415   : > { %5517 = vmatpush2.msra.mxu1 %v5450_v11 }
 0x416   : > { %5518 = vmatprep.subr.mxu1 %v8115_v58 }
 0x417   : > { %5519 = vmatpush2.msra.mxu1 %v5449_v19 }
 0x418   : > { %5520 = vmatprep.subr.mxu1 %v8115_v58 }
 0x419   : > { %5521 = vmatpush2.msra.mxu1 %v5448_v37 }
 0x41a   : > { %5522 = vmatprep.subr.mxu1 %v8115_v58 }
 0x41b   : > { %5523 = vmatpush2.msra.mxu1 %v5447_v26 }
 0x41c   : > { %5524 = vmatprep.subr.mxu1 %v8115_v58 }
 0x41d   : > { %5525 = vmatpush2.msra.mxu1 %v5446_v31 }
 0x41e   : > { %5526 = vmatprep.subr.mxu1 %v8115_v58 }
 0x41f   : > { %5527 = vmatpush2.msra.mxu1 %v5445_v63 }
 0x420   : > { %5528 = vmatprep.subr.mxu1 %v8115_v58 }
 0x421   : > { %5529 = vmatpush2.msra.mxu1 %v5444_v2 }
 0x422   : > { %5530 = vmatprep.subr.mxu1 %v8115_v58  ;;  %v4024_v58 = vsub.s32 1, %v4019_v21 }
 0x423   : > { %5531 = vmatpush2.msra.mxu1 %v5443_v49 }
 0x424   : > { %v4025_v34 = vrot.slane %v3926_v24, %v4024_v58 }
 0x44b   : > { %v4012_v25 = vpop.f32.mrf.mxu1 }
 0x44c   : > { %v4028_v18 = vadd.f32 %v4021_v44, %v4012_v25 }
 0x44d   : > { %v4014_v41 = vpop.f32.mrf.mxu1 }
 0x44e   : > { %v4029_v46 = vadd.f32 %v4025_v34, %v4014_v41 }
 0x44f   : > { %v4860_v5 = vpop.f32.mrf.mxu0 }
 0x451   : > { %v4862_v61 = vpop.f32.mrf.mxu0 }
 0x453   : > { %v4116_v7 = vpop.f32.mrf.mxu1 }
 0x454   : > { %v4121_v30 = vadd.f32 %v4116_v7, %v4028_v18 }
 0x455   : > { %v4118_v0 = vpop.f32.mrf.mxu1 }
 0x456   : > { %v4122_v8 = vadd.f32 %v4118_v0, %v4029_v46 }
 0x458   : > { %v5046_v23 = vpop.f32.mrf.mxu0 }
 0x45a   : > { %v5048_v62 = vpop.f32.mrf.mxu0 }
 0x45d   : > { %v4209_v51 = vpop.f32.mrf.mxu1 }
 0x45e   : > { %v4214_v47 = vadd.f32 %v4209_v51, %v4121_v30 }
 0x45f   : > { %v4211_v42 = vpop.f32.mrf.mxu1 }
 0x460   : > { %v4215_v32 = vadd.f32 %v4211_v42, %v4122_v8 }
 0x462   : > { %v5232_v22 = vpop.f32.mrf.mxu0 }
 0x464   : > { %v5234_v31 = vpop.f32.mrf.mxu0 }
 0x467   : > { %v4302_v48 = vpop.f32.mrf.mxu1 }
 0x468   : > { %v4307_v20 = vadd.f32 %v4302_v48, %v4214_v47 }
 0x469   : > { %v4304_v36 = vpop.f32.mrf.mxu1 }
 0x46a   : > { %v4308_v4 = vadd.f32 %v4304_v36, %v4215_v32 }
 0x46c   : > { %v5418_v2 = vpop.f32.mrf.mxu0 }
 0x46e   : > { %v5420_v51 = vpop.f32.mrf.mxu0 }
 0x470   : > { %v4395_v6 = vpop.f32.mrf.mxu1 }
 0x471   : > { %v4400_v10 = vadd.f32 %v4395_v6, %v4307_v20  ;;  %v5906_v6 = vld [vmem:[%s8109_s8] ss:$0 sm:$0xff] }
 0x472   : > { %v4397_v33 = vpop.f32.mrf.mxu1 }
 0x473   : > { %v4401_v43 = vadd.f32 %v4397_v33, %v4308_v4 }
 0x478   : > { %v4488_v53 = vpop.f32.mrf.mxu1 }
 0x479   : > { %v4493_v57 = vadd.f32 %v4488_v53, %v4400_v10 }
 0x47a   : > { %v4490_v29 = vpop.f32.mrf.mxu1 }
 0x47b   : > { %v4494_v13 = vadd.f32 %v4490_v29, %v4401_v43 }
 0x480   : > { %v4581_v17 = vpop.f32.mrf.mxu1 }
 0x481   : > { %v4586_v50 = vadd.f32 %v4581_v17, %v4493_v57 }
 0x482   : > { %v4583_v9 = vpop.f32.mrf.mxu1 }
 0x483   : > { %v4587_v15 = vadd.f32 %v4583_v9, %v4494_v13 }
 0x488   : > { %v4674_v12 = vpop.f32.mrf.mxu1 }
 0x489   : > { %v4679_v38 = vadd.f32 %v4674_v12, %v4586_v50 }
 0x48a   : > { %v4676_v54 = vpop.f32.mrf.mxu1 }
 0x48b   : > { %v4680_v27 = vadd.f32 %v4676_v54, %v4587_v15 }
 0x490   : > { %v4767_v14 = vpop.f32.mrf.mxu1 }
 0x491   : > { %v4772_v59 = vadd.f32 %v4767_v14, %v4679_v38 }
 0x492   : > { %v4769_v55 = vpop.f32.mrf.mxu1 }
 0x493   : > { %v4773_v35 = vadd.f32 %v4769_v55, %v4680_v27  ;;  %v4865_v1 = vadd.f32 %v4860_v5, %v4772_v59 }
 0x495   : > { %v4866_v16 = vadd.f32 %v4862_v61, %v4773_v35 }
 0x498   : > { %v4953_v52 = vpop.f32.mrf.mxu1 }
 0x499   : > { %v4958_v60 = vadd.f32 %v4953_v52, %v4865_v1 }
 0x49a   : > { %v4955_v39 = vpop.f32.mrf.mxu1 }
 0x49b   : > { %v4959_v56 = vadd.f32 %v4955_v39, %v4866_v16  ;;  %v5051_v40 = vadd.f32 %v5046_v23, %v4958_v60 }
 0x49d   : > { %v5052_v37 = vadd.f32 %v5048_v62, %v4959_v56 }
 0x4a0   : > { %v5139_v28 = vpop.f32.mrf.mxu1 }
 0x4a1   : > { %v5144_v19 = vadd.f32 %v5139_v28, %v5051_v40 }
 0x4a2   : > { %v5141_v11 = vpop.f32.mrf.mxu1 }
 0x4a3   : > { %v5145_v26 = vadd.f32 %v5141_v11, %v5052_v37  ;;  %v5237_v63 = vadd.f32 %v5232_v22, %v5144_v19 }
 0x4a5   : > { %v5238_v41 = vadd.f32 %v5234_v31, %v5145_v26 }
 0x4a8   : > { %v5325_v49 = vpop.f32.mrf.mxu1 }
 0x4a9   : > { %v5330_v25 = vadd.f32 %v5325_v49, %v5237_v63 }
 0x4aa   : > { %v5327_v7 = vpop.f32.mrf.mxu1 }
 0x4ab   : > { %v5331_v0 = vadd.f32 %v5327_v7, %v5238_v41  ;;  %v5423_v42 = vadd.f32 %v5418_v2, %v5330_v25 }
 0x4ad   : > { %v5424_v48 = vadd.f32 %v5420_v51, %v5331_v0  ;;  %v5425_v36 = vmax.f32 %v5423_v42, 0.0 }
 0x4af   : > { %v5426_v45 = vmax.f32 %v5424_v48, 0.0 }
 0x4b1   : > { %5907 = vmatprep.mubr.msk.f32.mxu1 %vm5464_vm7, %v5426_v45 }
 0x4b2   : > { %5533 = vmatmul.mubr.f32.vlgmr.msra.gmra.mxu1 %v5425_v36 }
 0x572   : > { %v5534_v21 = vpop.f32.mrf.mxu1 }
 0x573   : > { %v5535_v33 = vadd.f32 %v5906_v6, %v5534_v21 }
 0x574   : > { %v5536_v3 = vpop.f32.mrf.mxu1 }
 0x575   : > { %5538 = vst [vmem:[%s326_s28] sm:$0xff] %v5535_v33 }
 0x576   : > { %6268 = shalt.err (!%p6265_p3)
}
 0x577   : > { %s6269_s27 = scalar_lea.hbm %s8066_s17, 128  ;;  %s6273_s28 = scalar_lea.hbm %s8110_s9, 256 }
 0x578   : > { %p6270_p4 = scmp.ne.s32.totalorder %s8066_s17, %s6269_s27  ;;  %p6274_p9 = scmp.lt.s32.totalorder %s8066_s17, %s8110_s9 }
 0x579   : > { %p6275_p10 = scmp.lt.s32.totalorder %s6273_s28, %s6269_s27 }
 0x57a   : > { %p6271_p7 = pnand %p6270_p4, %p6408_p5 }
 0x57b   : > { %p6276_p11 = por %p6275_p10, %p6274_p9 }
 0x57c   : > { %p6272_p8 = pneg %p6271_p7 }
 0x57e   : > { %p6277_p12 = pnand %p6276_p11, %p6272_p8 }
 0x580   : > { %6280 = shalt.err (!%p6277_p12)
}
 0x581   : > { %6204 = dma.vmem_to_hbm [thread:$0]  (%p6408_p5), %s5554_s29, 128, %s8066_s17, %s5540_s21  }
 0x582 PF: > { %p6210_p13 = scmp.ge.s32.totalorder %s6315_s12, 2  ;;  %s5565_s22 = sand.u32 1, %s6303_s30  }
 0x583   : > { %s5566_s26 = scalar_lea.sflag [#allocation7], %s5565_s22 }
 0x584   : > { %p6207_p0 = pnand %p6210_p13, %p6412_p6 }
 0x586   : > { %p6208_p1 = pneg %p6207_p0 }
 0x588   : > { %6298 = dma.done.wait (%p6208_p1), %s5566_s26, 128  }
 0x589   : > { %6300 = vsyncadd (%p6208_p1), %s5566_s26, 4294967168  ;;  %p19_p2 = scmp.ge.s32.totalorder %s6395_s15, 4   ;;  %s8116_s30 = smov %s6307_s10 }
 0x58a   : > { %s8117_s10 = smov %s6311_s11  ;;  %s8118_s11 = smov %s6406_s18 }
 0x58b   : > { %s8119_s12 = smov %s6395_s15  ;;  %21 = sbr.rel (!%p19_p2) target bundleno = 3 (0x3), region = 229 }
 0x590   :  { %5571 = vsyncpa [#allocation7], 1 }
 0x591   :  { %5573 = vsyncpa [#allocation7 + $0x1], 1 }

</bundles_post_ra>
